<compile_context>
chip_gen: v5e
topology: v5e:2x2
jax: 0.10.0
libtpu: 0.0.40
codegen_flags: <defaults>
</compile_context>

<pallas_src>
import functools

import jax
import jax.numpy as jnp
import numpy as np
from jax.experimental import pallas as pl
from jax.experimental.pallas import tpu as pltpu

HIGHEST = jax.lax.Precision.HIGHEST

# (Cin, Cout, stride) for c0..c5, kernel_size=3, VALID padding.
_CONV_CFG = [(6, 64, 2), (64, 128, 2), (128, 128, 1),
             (128, 256, 2), (256, 256, 1), (256, 256, 1)]
_SLACK = 8  # zeroed spare rows at the tail of a1 / a3 / a4 (offset-tap overread)


def _round_up(x, m):
    return (x + m - 1) // m * m


def _out_len(l, k=3, s=1):
    return (l - k) // s + 1


def _dot3(in_ref, w_ref, starts, n):
    """sum_k  in_ref[starts[k] : starts[k]+n, :] @ w_ref[k]   (f32 accumulation).

    All taps are *contiguous* row slices (the de-interleaved activation layouts make every
    conv tap contiguous), so there are no strided loads and no lane-concat temporaries.
    """
    acc = jnp.dot(in_ref[pl.ds(starts[0], n), :], w_ref[0],
                  preferred_element_type=jnp.float32)
    acc = acc + jnp.dot(in_ref[pl.ds(starts[1], n), :], w_ref[1],
                        preferred_element_type=jnp.float32)
    acc = acc + jnp.dot(in_ref[pl.ds(starts[2], n), :], w_ref[2],
                        preferred_element_type=jnp.float32)
    return acc


def _store_relu(out_ref, start, n, acc, b_ref):
    """Bias + ReLU in f32, single cast to the (bf16) scratch dtype at the store."""
    out_ref[pl.ds(start, n), :] = jnp.maximum(acc + b_ref[...], 0.0).astype(out_ref.dtype)


def _simple_cnn_kernel(x_ref,
                       w0, b0, w1, b1, w2, b2, w3, b3, w4, b4, w5, b5,
                       wl0, bl0, wout, bout, pool_ref,
                       o_ref,
                       a0, a1, a2, a3, a4, a5,
                       *, q_rows, inv_len):
    Q = q_rows  # rows per mod-block = tb * (padded_len // 8); layers 1..5 all use Q

    # Keep the slack tails zero on every step (3 tiny stores).  Deliberately NOT under
    # program_id == 0: with a core-split parallel batch axis each core has fresh scratch.
    for a_ref, ni in ((a1, 2 * Q), (a3, Q), (a4, Q)):
        a_ref[pl.ds(ni, _SLACK), :] = jnp.zeros((_SLACK, a_ref.shape[1]), a_ref.dtype)

    # c0 (6 -> 64, stride 2): wrapper pre-packed the im2col LHS with rows ordered by
    # (position mod 4) -> one dense matmul, no slicing.  a0 layout: 4 blocks of Q rows,
    # block m holds conv positions 4t + m (sample-major, position-minor inside a block).
    acc0 = jnp.dot(x_ref[...], w0[...], preferred_element_type=jnp.float32)
    a0[...] = jnp.maximum(acc0 + b0[...], 0.0).astype(a0.dtype)

    # c1 (64 -> 128, stride 2): taps of the mod-4 layout are whole blocks; write a1
    # de-interleaved mod 2 (even positions in rows [0,Q), odd positions in rows [Q,2Q)).
    _store_relu(a1, 0, Q, _dot3(a0, w1, (0,     Q,     2 * Q), Q), b1)   # positions 2m
    _store_relu(a1, Q, Q, _dot3(a0, w1, (2 * Q, 3 * Q, 1),     Q), b1)   # positions 2m+1

    # c2 (128 -> 128, stride 1): mod-2 in -> mod-2 out, all taps contiguous.
    _store_relu(a2, 0, Q, _dot3(a1, w2, (0, Q, 1),     Q), b2)           # positions 2m
    _store_relu(a2, Q, Q, _dot3(a1, w2, (Q, 1, Q + 1), Q), b2)           # positions 2m+1

    # c3 (128 -> 256, stride 2): mod-2 in -> natural-order out (no strided reads).
    _store_relu(a3, 0, Q, _dot3(a2, w3, (0, Q, 1), Q), b3)

    # c4, c5 (256 -> 256, stride 1): natural order, offset taps.
    _store_relu(a4, 0, Q, _dot3(a3, w4, (0, 1, 2), Q), b4)
    _store_relu(a5, 0, Q, _dot3(a4, w5, (0, 1, 2), Q), b5)

    # AdaptiveAvgPool1d(1): one (tb, Q) @ (Q, 256) matmul with a 0/1 pooling matrix
    # (junk / pad rows get weight 0), scaled by 1 / valid_len.  f32 accumulation.
    pooled = jnp.dot(pool_ref[...], a5[...],
                     preferred_element_type=jnp.float32) * inv_len        # (tb, 256) f32

    # l0: Linear(256, 256) + ReLU;  dropout(p=0.0) is the identity.
    h = jnp.maximum(
        jnp.dot(pooled.astype(jnp.bfloat16), wl0[...],
                preferred_element_type=jnp.float32) + bl0[...], 0.0)

    # out: Linear(256, 1).  Output block is (tb, 1); the masked store is negligible.
    o_ref[...] = jnp.dot(h.astype(jnp.bfloat16), wout[...],
                         preferred_element_type=jnp.float32) + bout[...]


def simple_cnn_forward(x_ncl, params, *, tb=64):
    """x_ncl: (B, 6, L) float32 (PyTorch NCL). params: kernel-layout flat list. -> (B, 1)."""
    B, cin, L = x_ncl.shape
    assert cin == 6

    # Valid (PyTorch) output lengths l0..l5 of the conv stack.
    lengths = [L]
    for (_, _, s) in _CONV_CFG:
        lengths.append(_out_len(lengths[-1], 3, s))
    lvalid = lengths[1:]
    assert lvalid[-1] >= 1, "input length too short for the conv stack"

    # Padded per-sample lengths.  p_in is a multiple of 8, so the cumulative stride
    # product (8) divides it and per-sample blocks stay aligned through the whole stack.
    p_in = _round_up(L, 8)
    q = p_in // 8                              # per-sample rows of a3 / a4 / a5
    pads = [4 * q, 2 * q, 2 * q, q, q, q]      # padded per-sample rows of a0..a5
    prev = p_in
    for pv, (_, _, s) in zip(pads, _CONV_CFG):
        assert prev == pv * s                  # flattened-layout invariant
        prev = pv
    for lv, pv in zip(lvalid, pads):
        assert lv <= pv

    # Batch tile: big enough to amortize per-step overhead and fill MXU rows, but keep
    # >= 2 grid steps when the batch allows it (v7x runs 2 TensorCores on the batch axis).
    b8 = _round_up(B, 8)
    tb = max(8, min(_round_up(tb, 8), b8))
    if tb == b8 and b8 >= 16:
        tb = max(8, (b8 // 2) // 8 * 8)
    b_pad = _round_up(B, tb)
    grid = (b_pad // tb,)

    p0, l5 = pads[0], lvalid[5]
    Q = tb * q

    # ---- host-side prep (tiny XLA work) -------------------------------------------
    # NCL -> NLC, zero-pad batch & length, im2col for layer 0, then reorder rows so the
    # kernel's a0 comes out de-interleaved by (position mod 4): with that layout every
    # downstream conv tap is a contiguous slice (no strided / gathered loads in-kernel).
    x = jnp.transpose(x_ncl, (0, 2, 1)).astype(jnp.float32)              # (B, L, 6)
    x = jnp.pad(x, ((0, b_pad - B), (0, p_in + 2 - L), (0, 0)))          # (b_pad, p_in+2, 6)
    taps0 = [x[:, k::2, :][:, :p0, :] for k in range(3)]                 # stride-2 windows
    lhs = jnp.concatenate(taps0, axis=2)                                 # (b_pad, p0, 18)
    lhs = lhs.reshape(b_pad // tb, tb, q, 4, 18)                         # position = 4t + m
    lhs = jnp.transpose(lhs, (0, 3, 1, 2, 4))                            # (grid, 4, tb, q, 18)
    lhs0 = lhs.reshape(b_pad * p0, 18).astype(jnp.bfloat16)

    # 0/1 pooling matrix selecting the l5 valid rows of each sample (scaled in-kernel).
    r = jnp.arange(Q)[None, :]
    bidx = jnp.arange(tb)[:, None]
    pool = jnp.where((r >= bidx * q) & (r < bidx * q + l5),
                     1.0, 0.0).astype(jnp.bfloat16)                      # (tb, Q)

    flat = list(params) + [pool]

    def _full(arr):
        nd = arr.ndim
        return pl.BlockSpec(arr.shape, lambda g, _nd=nd: (0,) * _nd)

    kernel = pl.pallas_call(
        functools.partial(_simple_cnn_kernel, q_rows=Q, inv_len=float(1.0 / l5)),
        out_shape=jax.ShapeDtypeStruct((b_pad, 1), jnp.float32),
        grid_spec=pltpu.PrefetchScalarGridSpec(
            num_scalar_prefetch=0,
            grid=grid,
            in_specs=[pl.BlockSpec((tb * p0, 18), lambda g: (g, 0))]
                     + [_full(a) for a in flat],
            out_specs=pl.BlockSpec((tb, 1), lambda g: (g, 0)),
            scratch_shapes=[
                pltpu.VMEM((4 * Q, 64), jnp.bfloat16),               # a0 (mod-4 blocks)
                pltpu.VMEM((2 * Q + _SLACK, 128), jnp.bfloat16),     # a1 (mod-2 blocks)
                pltpu.VMEM((2 * Q, 128), jnp.bfloat16),              # a2 (mod-2 blocks)
                pltpu.VMEM((Q + _SLACK, 256), jnp.bfloat16),         # a3
                pltpu.VMEM((Q + _SLACK, 256), jnp.bfloat16),         # a4
                pltpu.VMEM((Q, 256), jnp.bfloat16),                  # a5
            ],
        ),
        compiler_params=pltpu.CompilerParams(
            dimension_semantics=("parallel",)),   # batch grid axis is truly parallel
    )
    out = kernel(lhs0, *flat)
    return out[:B]


def init_params(key):
    """Deterministic synthetic weights matching the nn.Module shapes."""
    keys = jax.random.split(key, 2 * len(_CONV_CFG) + 4)
    conv_oik = []   # (Cout, Cin, 3) PyTorch layout, f32 -- used by the reference
    flat = []       # kernel-layout params, order = kernel signature
    ki = 0
    for li, (cin, cout, _) in enumerate(_CONV_CFG):
        w = jax.random.normal(keys[ki], (cout, cin, 3), jnp.float32) / np.sqrt(cin * 3)
        ki += 1
        b = 0.01 * jax.random.normal(keys[ki], (cout,), jnp.float32)
        ki += 1
        conv_oik.append((w, b))
        w_kio = jnp.transpose(w, (2, 1, 0))                # (3, Cin, Cout)
        if li == 0:
            # layer 0 consumes the wrapper's fused im2col LHS (K = 3*Cin = 18).
            flat.append(w_kio.reshape(3 * cin, cout).astype(jnp.bfloat16))
        else:
            # per-tap weight blocks: the kernel does 3 accumulated dots, no lane-concat.
            flat.append(w_kio.astype(jnp.bfloat16))
        flat.append(b.reshape(1, cout))                    # biases stay f32
    wl0_t = jax.random.normal(keys[ki], (256, 256), jnp.float32) / np.sqrt(256); ki += 1
    bl0 = 0.01 * jax.random.normal(keys[ki], (1, 256), jnp.float32); ki += 1
    wout_t = jax.random.normal(keys[ki], (256, 1), jnp.float32) / np.sqrt(256); ki += 1
    bout = 0.01 * jax.random.normal(keys[ki], (1, 1), jnp.float32); ki += 1
    flat += [wl0_t.astype(jnp.bfloat16), bl0, wout_t.astype(jnp.bfloat16), bout]
    return flat, conv_oik, (wl0_t, bl0, wout_t, bout)


def reference_forward(x_ncl, conv_oik, lin):
    """Pure-JAX f32/HIGHEST reference replicating the PyTorch forward (NCL)."""
    strides = [s for (_, _, s) in _CONV_CFG]
    h = x_ncl.astype(jnp.float32)
    for (w, b), s in zip(conv_oik, strides):
        h = jax.lax.conv_general_dilated(
            h, w, window_strides=(s,), padding="VALID",
            dimension_numbers=("NCH", "OIH", "NCH"), precision=HIGHEST)
        h = jax.nn.relu(h + b[None, :, None])
    h = jnp.mean(h, axis=-1)                       # GAP + squeeze(-1): (B, 256)
    wl0_t, bl0, wout_t, bout = lin
    h = jax.nn.relu(jnp.dot(h, wl0_t, precision=HIGHEST) + bl0)
    return jnp.dot(h, wout_t, precision=HIGHEST) + bout


if __name__ == "__main__":
    key = jax.random.PRNGKey(0)
    pkey, xkey = jax.random.split(key)
    flat_params, conv_oik, lin = init_params(pkey)

    B, Cin, L = 12, 6, 64                      # NCL, same convention as the nn.Module
    x = jax.random.normal(xkey, (B, Cin, L), jnp.float32)

    out = jax.block_until_ready(simple_cnn_forward(x, flat_params))
    ref = jax.block_until_ready(reference_forward(x, conv_oik, lin))

    assert out.shape == (B, 1)
    # bf16 matmul inputs / f32 accumulation across 6 conv layers + head => ~1-2% error budget
    np.testing.assert_allclose(np.asarray(out), np.asarray(ref), rtol=3e-2, atol=3e-2)
    print("KERNEL_OK")
</pallas_src>

<mosaic_0001>
module attributes {stable_mosaic.version = 11 : i64} {
  func.func @_simple_cnn_kernel(%arg0: i32, %arg1: memref<256x18xbf16, #tpu.memory_space<vmem>>, %arg2: memref<18x64xbf16, #tpu.memory_space<vmem>>, %arg3: memref<1x64xf32, #tpu.memory_space<vmem>>, %arg4: memref<3x64x128xbf16, #tpu.memory_space<vmem>>, %arg5: memref<1x128xf32, #tpu.memory_space<vmem>>, %arg6: memref<3x128x128xbf16, #tpu.memory_space<vmem>>, %arg7: memref<1x128xf32, #tpu.memory_space<vmem>>, %arg8: memref<3x128x256xbf16, #tpu.memory_space<vmem>>, %arg9: memref<1x256xf32, #tpu.memory_space<vmem>>, %arg10: memref<3x256x256xbf16, #tpu.memory_space<vmem>>, %arg11: memref<1x256xf32, #tpu.memory_space<vmem>>, %arg12: memref<3x256x256xbf16, #tpu.memory_space<vmem>>, %arg13: memref<1x256xf32, #tpu.memory_space<vmem>>, %arg14: memref<256x256xbf16, #tpu.memory_space<vmem>>, %arg15: memref<1x256xf32, #tpu.memory_space<vmem>>, %arg16: memref<256x1xbf16, #tpu.memory_space<vmem>>, %arg17: memref<1x1xf32, #tpu.memory_space<vmem>>, %arg18: memref<8x64xbf16, #tpu.memory_space<vmem>>, %arg19: memref<8x1xf32, #tpu.memory_space<vmem>>, %arg20: memref<256x64xbf16, #tpu.memory_space<vmem>>, %arg21: memref<136x128xbf16, #tpu.memory_space<vmem>>, %arg22: memref<128x128xbf16, #tpu.memory_space<vmem>>, %arg23: memref<72x256xbf16, #tpu.memory_space<vmem>>, %arg24: memref<72x256xbf16, #tpu.memory_space<vmem>>, %arg25: memref<64x256xbf16, #tpu.memory_space<vmem>>) attributes {dimension_semantics = [#tpu.dimension_semantics<parallel>], iteration_bounds = array<i64: 2>, scalar_prefetch = 0 : i64, scratch_operands = 6 : i64, tpu.core_type = #tpu.core_type<tc>, window_params = [{transform_indices = @transform_0, window_bounds = array<i64: 256, 18>}, {pipeline_mode = #tpu.pipeline_mode<synchronous>, transform_indices = @transform_1, window_bounds = array<i64: 18, 64>}, {pipeline_mode = #tpu.pipeline_mode<synchronous>, transform_indices = @transform_2, window_bounds = array<i64: 1, 64>}, {pipeline_mode = #tpu.pipeline_mode<synchronous>, transform_indices = @transform_3, window_bounds = array<i64: 3, 64, 128>}, {pipeline_mode = #tpu.pipeline_mode<synchronous>, transform_indices = @transform_4, window_bounds = array<i64: 1, 128>}, {pipeline_mode = #tpu.pipeline_mode<synchronous>, transform_indices = @transform_5, window_bounds = array<i64: 3, 128, 128>}, {pipeline_mode = #tpu.pipeline_mode<synchronous>, transform_indices = @transform_6, window_bounds = array<i64: 1, 128>}, {pipeline_mode = #tpu.pipeline_mode<synchronous>, transform_indices = @transform_7, window_bounds = array<i64: 3, 128, 256>}, {pipeline_mode = #tpu.pipeline_mode<synchronous>, transform_indices = @transform_8, window_bounds = array<i64: 1, 256>}, {pipeline_mode = #tpu.pipeline_mode<synchronous>, transform_indices = @transform_9, window_bounds = array<i64: 3, 256, 256>}, {pipeline_mode = #tpu.pipeline_mode<synchronous>, transform_indices = @transform_10, window_bounds = array<i64: 1, 256>}, {pipeline_mode = #tpu.pipeline_mode<synchronous>, transform_indices = @transform_11, window_bounds = array<i64: 3, 256, 256>}, {pipeline_mode = #tpu.pipeline_mode<synchronous>, transform_indices = @transform_12, window_bounds = array<i64: 1, 256>}, {pipeline_mode = #tpu.pipeline_mode<synchronous>, transform_indices = @transform_13, window_bounds = array<i64: 256, 256>}, {pipeline_mode = #tpu.pipeline_mode<synchronous>, transform_indices = @transform_14, window_bounds = array<i64: 1, 256>}, {pipeline_mode = #tpu.pipeline_mode<synchronous>, transform_indices = @transform_15, window_bounds = array<i64: 256, 1>}, {pipeline_mode = #tpu.pipeline_mode<synchronous>, transform_indices = @transform_16, window_bounds = array<i64: 1, 1>}, {pipeline_mode = #tpu.pipeline_mode<synchronous>, transform_indices = @transform_17, window_bounds = array<i64: 8, 64>}, {transform_indices = @transform_18, window_bounds = array<i64: 8, 1>}]} {
    %cst = arith.constant 0.000000e+00 : bf16
    %0 = vector.broadcast %cst : bf16 to vector<8x128xbf16>
    %c128 = arith.constant 128 : index
    %c0 = arith.constant 0 : index
    %1 = vector.load %arg21[%c128, %c0] : memref<136x128xbf16, #tpu.memory_space<vmem>>, vector<8x128xbf16>
    tpu.vector_store %arg21[%c128, %c0], %0 {strides = array<i32>} : memref<136x128xbf16, #tpu.memory_space<vmem>>, vector<8x128xbf16>,
    %cst_0 = arith.constant 0.000000e+00 : bf16
    %2 = vector.broadcast %cst_0 : bf16 to vector<8x256xbf16>
    %c64 = arith.constant 64 : index
    %c0_1 = arith.constant 0 : index
    %3 = vector.load %arg23[%c64, %c0_1] : memref<72x256xbf16, #tpu.memory_space<vmem>>, vector<8x256xbf16>
    tpu.vector_store %arg23[%c64, %c0_1], %2 {strides = array<i32>} : memref<72x256xbf16, #tpu.memory_space<vmem>>, vector<8x256xbf16>,
    %cst_2 = arith.constant 0.000000e+00 : bf16
    %4 = vector.broadcast %cst_2 : bf16 to vector<8x256xbf16>
    %c64_3 = arith.constant 64 : index
    %c0_4 = arith.constant 0 : index
    %5 = vector.load %arg24[%c64_3, %c0_4] : memref<72x256xbf16, #tpu.memory_space<vmem>>, vector<8x256xbf16>
    tpu.vector_store %arg24[%c64_3, %c0_4], %4 {strides = array<i32>} : memref<72x256xbf16, #tpu.memory_space<vmem>>, vector<8x256xbf16>,
    %c0_5 = arith.constant 0 : index
    %c0_6 = arith.constant 0 : index
    %6 = vector.load %arg1[%c0_5, %c0_6] : memref<256x18xbf16, #tpu.memory_space<vmem>>, vector<256x18xbf16>
    %c0_7 = arith.constant 0 : index
    %c0_8 = arith.constant 0 : index
    %7 = vector.load %arg2[%c0_7, %c0_8] : memref<18x64xbf16, #tpu.memory_space<vmem>>, vector<18x64xbf16>
    %cst_9 = arith.constant dense<0.000000e+00> : vector<256x64xf32>
    %8 = tpu.matmul %6, %7, %cst_9 {dimension_numbers = #tpu.dot_dimension_numbers<[1], [0], [0], [1], [0, 0, 1, 1], [], []>} : vector<256x18xbf16>, vector<18x64xbf16>, vector<256x64xf32> -> vector<256x64xf32>
    %c0_10 = arith.constant 0 : index
    %c0_11 = arith.constant 0 : index
    %9 = vector.load %arg3[%c0_10, %c0_11] : memref<1x64xf32, #tpu.memory_space<vmem>>, vector<1x64xf32>
    %10 = vector.broadcast %9 : vector<1x64xf32> to vector<256x64xf32>
    %11 = arith.addf %8, %10 : vector<256x64xf32>
    %cst_12 = arith.constant 0.000000e+00 : f32
    %12 = vector.broadcast %cst_12 : f32 to vector<256x64xf32>
    %13 = arith.maximumf %11, %12 : vector<256x64xf32>
    %14 = arith.truncf %13 : vector<256x64xf32> to vector<256x64xbf16>
    %c0_13 = arith.constant 0 : index
    %c0_14 = arith.constant 0 : index
    %15 = vector.load %arg20[%c0_13, %c0_14] : memref<256x64xbf16, #tpu.memory_space<vmem>>, vector<256x64xbf16>
    tpu.vector_store %arg20[%c0_13, %c0_14], %14 {strides = array<i32>} : memref<256x64xbf16, #tpu.memory_space<vmem>>, vector<256x64xbf16>,
    %c0_15 = arith.constant 0 : index
    %c0_16 = arith.constant 0 : index
    %16 = vector.load %arg20[%c0_15, %c0_16] : memref<256x64xbf16, #tpu.memory_space<vmem>>, vector<64x64xbf16>
    %c0_17 = arith.constant 0 : index
    %c0_18 = arith.constant 0 : index
    %c0_19 = arith.constant 0 : index
    %17 = vector.load %arg4[%c0_17, %c0_18, %c0_19] : memref<3x64x128xbf16, #tpu.memory_space<vmem>>, vector<1x64x128xbf16>
    %18 = vector.shape_cast %17 : vector<1x64x128xbf16> to vector<64x128xbf16>
    %cst_20 = arith.constant dense<0.000000e+00> : vector<64x128xf32>
    %19 = tpu.matmul %16, %18, %cst_20 {dimension_numbers = #tpu.dot_dimension_numbers<[1], [0], [0], [1], [0, 0, 1, 1], [], []>} : vector<64x64xbf16>, vector<64x128xbf16>, vector<64x128xf32> -> vector<64x128xf32>
    %c64_21 = arith.constant 64 : index
    %c0_22 = arith.constant 0 : index
    %20 = vector.load %arg20[%c64_21, %c0_22] : memref<256x64xbf16, #tpu.memory_space<vmem>>, vector<64x64xbf16>
    %c1 = arith.constant 1 : index
    %c0_23 = arith.constant 0 : index
    %c0_24 = arith.constant 0 : index
    %21 = vector.load %arg4[%c1, %c0_23, %c0_24] : memref<3x64x128xbf16, #tpu.memory_space<vmem>>, vector<1x64x128xbf16>
    %22 = vector.shape_cast %21 : vector<1x64x128xbf16> to vector<64x128xbf16>
    %cst_25 = arith.constant dense<0.000000e+00> : vector<64x128xf32>
    %23 = tpu.matmul %20, %22, %cst_25 {dimension_numbers = #tpu.dot_dimension_numbers<[1], [0], [0], [1], [0, 0, 1, 1], [], []>} : vector<64x64xbf16>, vector<64x128xbf16>, vector<64x128xf32> -> vector<64x128xf32>
    %24 = arith.addf %19, %23 : vector<64x128xf32>
    %c128_26 = arith.constant 128 : index
    %c0_27 = arith.constant 0 : index
    %25 = vector.load %arg20[%c128_26, %c0_27] : memref<256x64xbf16, #tpu.memory_space<vmem>>, vector<64x64xbf16>
    %c2 = arith.constant 2 : index
    %c0_28 = arith.constant 0 : index
    %c0_29 = arith.constant 0 : index
    %26 = vector.load %arg4[%c2, %c0_28, %c0_29] : memref<3x64x128xbf16, #tpu.memory_space<vmem>>, vector<1x64x128xbf16>
    %27 = vector.shape_cast %26 : vector<1x64x128xbf16> to vector<64x128xbf16>
    %cst_30 = arith.constant dense<0.000000e+00> : vector<64x128xf32>
    %28 = tpu.matmul %25, %27, %cst_30 {dimension_numbers = #tpu.dot_dimension_numbers<[1], [0], [0], [1], [0, 0, 1, 1], [], []>} : vector<64x64xbf16>, vector<64x128xbf16>, vector<64x128xf32> -> vector<64x128xf32>
    %29 = arith.addf %24, %28 : vector<64x128xf32>
    %c0_31 = arith.constant 0 : index
    %c0_32 = arith.constant 0 : index
    %30 = vector.load %arg5[%c0_31, %c0_32] : memref<1x128xf32, #tpu.memory_space<vmem>>, vector<1x128xf32>
    %31 = vector.broadcast %30 : vector<1x128xf32> to vector<64x128xf32>
    %32 = arith.addf %29, %31 : vector<64x128xf32>
    %cst_33 = arith.constant 0.000000e+00 : f32
    %33 = vector.broadcast %cst_33 : f32 to vector<64x128xf32>
    %34 = arith.maximumf %32, %33 : vector<64x128xf32>
    %35 = arith.truncf %34 : vector<64x128xf32> to vector<64x128xbf16>
    %c0_34 = arith.constant 0 : index
    %c0_35 = arith.constant 0 : index
    %36 = vector.load %arg21[%c0_34, %c0_35] : memref<136x128xbf16, #tpu.memory_space<vmem>>, vector<64x128xbf16>
    tpu.vector_store %arg21[%c0_34, %c0_35], %35 {strides = array<i32>} : memref<136x128xbf16, #tpu.memory_space<vmem>>, vector<64x128xbf16>,
    %c128_36 = arith.constant 128 : index
    %c0_37 = arith.constant 0 : index
    %37 = vector.load %arg20[%c128_36, %c0_37] : memref<256x64xbf16, #tpu.memory_space<vmem>>, vector<64x64xbf16>
    %c0_38 = arith.constant 0 : index
    %c0_39 = arith.constant 0 : index
    %c0_40 = arith.constant 0 : index
    %38 = vector.load %arg4[%c0_38, %c0_39, %c0_40] : memref<3x64x128xbf16, #tpu.memory_space<vmem>>, vector<1x64x128xbf16>
    %39 = vector.shape_cast %38 : vector<1x64x128xbf16> to vector<64x128xbf16>
    %cst_41 = arith.constant dense<0.000000e+00> : vector<64x128xf32>
    %40 = tpu.matmul %37, %39, %cst_41 {dimension_numbers = #tpu.dot_dimension_numbers<[1], [0], [0], [1], [0, 0, 1, 1], [], []>} : vector<64x64xbf16>, vector<64x128xbf16>, vector<64x128xf32> -> vector<64x128xf32>
    %c192 = arith.constant 192 : index
    %c0_42 = arith.constant 0 : index
    %41 = vector.load %arg20[%c192, %c0_42] : memref<256x64xbf16, #tpu.memory_space<vmem>>, vector<64x64xbf16>
    %c1_43 = arith.constant 1 : index
    %c0_44 = arith.constant 0 : index
    %c0_45 = arith.constant 0 : index
    %42 = vector.load %arg4[%c1_43, %c0_44, %c0_45] : memref<3x64x128xbf16, #tpu.memory_space<vmem>>, vector<1x64x128xbf16>
    %43 = vector.shape_cast %42 : vector<1x64x128xbf16> to vector<64x128xbf16>
    %cst_46 = arith.constant dense<0.000000e+00> : vector<64x128xf32>
    %44 = tpu.matmul %41, %43, %cst_46 {dimension_numbers = #tpu.dot_dimension_numbers<[1], [0], [0], [1], [0, 0, 1, 1], [], []>} : vector<64x64xbf16>, vector<64x128xbf16>, vector<64x128xf32> -> vector<64x128xf32>
    %45 = arith.addf %40, %44 : vector<64x128xf32>
    %c1_47 = arith.constant 1 : index
    %c0_48 = arith.constant 0 : index
    %46 = vector.load %arg20[%c1_47, %c0_48] : memref<256x64xbf16, #tpu.memory_space<vmem>>, vector<64x64xbf16>
    %c2_49 = arith.constant 2 : index
    %c0_50 = arith.constant 0 : index
    %c0_51 = arith.constant 0 : index
    %47 = vector.load %arg4[%c2_49, %c0_50, %c0_51] : memref<3x64x128xbf16, #tpu.memory_space<vmem>>, vector<1x64x128xbf16>
    %48 = vector.shape_cast %47 : vector<1x64x128xbf16> to vector<64x128xbf16>
    %cst_52 = arith.constant dense<0.000000e+00> : vector<64x128xf32>
    %49 = tpu.matmul %46, %48, %cst_52 {dimension_numbers = #tpu.dot_dimension_numbers<[1], [0], [0], [1], [0, 0, 1, 1], [], []>} : vector<64x64xbf16>, vector<64x128xbf16>, vector<64x128xf32> -> vector<64x128xf32>
    %50 = arith.addf %45, %49 : vector<64x128xf32>
    %c0_53 = arith.constant 0 : index
    %c0_54 = arith.constant 0 : index
    %51 = vector.load %arg5[%c0_53, %c0_54] : memref<1x128xf32, #tpu.memory_space<vmem>>, vector<1x128xf32>
    %52 = vector.broadcast %51 : vector<1x128xf32> to vector<64x128xf32>
    %53 = arith.addf %50, %52 : vector<64x128xf32>
    %cst_55 = arith.constant 0.000000e+00 : f32
    %54 = vector.broadcast %cst_55 : f32 to vector<64x128xf32>
    %55 = arith.maximumf %53, %54 : vector<64x128xf32>
    %56 = arith.truncf %55 : vector<64x128xf32> to vector<64x128xbf16>
    %c64_56 = arith.constant 64 : index
    %c0_57 = arith.constant 0 : index
    %57 = vector.load %arg21[%c64_56, %c0_57] : memref<136x128xbf16, #tpu.memory_space<vmem>>, vector<64x128xbf16>
    tpu.vector_store %arg21[%c64_56, %c0_57], %56 {strides = array<i32>} : memref<136x128xbf16, #tpu.memory_space<vmem>>, vector<64x128xbf16>,
    %c0_58 = arith.constant 0 : index
    %c0_59 = arith.constant 0 : index
    %58 = vector.load %arg21[%c0_58, %c0_59] : memref<136x128xbf16, #tpu.memory_space<vmem>>, vector<64x128xbf16>
    %c0_60 = arith.constant 0 : index
    %c0_61 = arith.constant 0 : index
    %c0_62 = arith.constant 0 : index
    %59 = vector.load %arg6[%c0_60, %c0_61, %c0_62] : memref<3x128x128xbf16, #tpu.memory_space<vmem>>, vector<1x128x128xbf16>
    %60 = vector.shape_cast %59 : vector<1x128x128xbf16> to vector<128x128xbf16>
    %cst_63 = arith.constant dense<0.000000e+00> : vector<64x128xf32>
    %61 = tpu.matmul %58, %60, %cst_63 {dimension_numbers = #tpu.dot_dimension_numbers<[1], [0], [0], [1], [0, 0, 1, 1], [], []>} : vector<64x128xbf16>, vector<128x128xbf16>, vector<64x128xf32> -> vector<64x128xf32>
    %c64_64 = arith.constant 64 : index
    %c0_65 = arith.constant 0 : index
    %62 = vector.load %arg21[%c64_64, %c0_65] : memref<136x128xbf16, #tpu.memory_space<vmem>>, vector<64x128xbf16>
    %c1_66 = arith.constant 1 : index
    %c0_67 = arith.constant 0 : index
    %c0_68 = arith.constant 0 : index
    %63 = vector.load %arg6[%c1_66, %c0_67, %c0_68] : memref<3x128x128xbf16, #tpu.memory_space<vmem>>, vector<1x128x128xbf16>
    %64 = vector.shape_cast %63 : vector<1x128x128xbf16> to vector<128x128xbf16>
    %cst_69 = arith.constant dense<0.000000e+00> : vector<64x128xf32>
    %65 = tpu.matmul %62, %64, %cst_69 {dimension_numbers = #tpu.dot_dimension_numbers<[1], [0], [0], [1], [0, 0, 1, 1], [], []>} : vector<64x128xbf16>, vector<128x128xbf16>, vector<64x128xf32> -> vector<64x128xf32>
    %66 = arith.addf %61, %65 : vector<64x128xf32>
    %c1_70 = arith.constant 1 : index
    %c0_71 = arith.constant 0 : index
    %67 = vector.load %arg21[%c1_70, %c0_71] : memref<136x128xbf16, #tpu.memory_space<vmem>>, vector<64x128xbf16>
    %c2_72 = arith.constant 2 : index
    %c0_73 = arith.constant 0 : index
    %c0_74 = arith.constant 0 : index
    %68 = vector.load %arg6[%c2_72, %c0_73, %c0_74] : memref<3x128x128xbf16, #tpu.memory_space<vmem>>, vector<1x128x128xbf16>
    %69 = vector.shape_cast %68 : vector<1x128x128xbf16> to vector<128x128xbf16>
    %cst_75 = arith.constant dense<0.000000e+00> : vector<64x128xf32>
    %70 = tpu.matmul %67, %69, %cst_75 {dimension_numbers = #tpu.dot_dimension_numbers<[1], [0], [0], [1], [0, 0, 1, 1], [], []>} : vector<64x128xbf16>, vector<128x128xbf16>, vector<64x128xf32> -> vector<64x128xf32>
    %71 = arith.addf %66, %70 : vector<64x128xf32>
    %c0_76 = arith.constant 0 : index
    %c0_77 = arith.constant 0 : index
    %72 = vector.load %arg7[%c0_76, %c0_77] : memref<1x128xf32, #tpu.memory_space<vmem>>, vector<1x128xf32>
    %73 = vector.broadcast %72 : vector<1x128xf32> to vector<64x128xf32>
    %74 = arith.addf %71, %73 : vector<64x128xf32>
    %cst_78 = arith.constant 0.000000e+00 : f32
    %75 = vector.broadcast %cst_78 : f32 to vector<64x128xf32>
    %76 = arith.maximumf %74, %75 : vector<64x128xf32>
    %77 = arith.truncf %76 : vector<64x128xf32> to vector<64x128xbf16>
    %c0_79 = arith.constant 0 : index
    %c0_80 = arith.constant 0 : index
    %78 = vector.load %arg22[%c0_79, %c0_80] : memref<128x128xbf16, #tpu.memory_space<vmem>>, vector<64x128xbf16>
    tpu.vector_store %arg22[%c0_79, %c0_80], %77 {strides = array<i32>} : memref<128x128xbf16, #tpu.memory_space<vmem>>, vector<64x128xbf16>,
    %c64_81 = arith.constant 64 : index
    %c0_82 = arith.constant 0 : index
    %79 = vector.load %arg21[%c64_81, %c0_82] : memref<136x128xbf16, #tpu.memory_space<vmem>>, vector<64x128xbf16>
    %c0_83 = arith.constant 0 : index
    %c0_84 = arith.constant 0 : index
    %c0_85 = arith.constant 0 : index
    %80 = vector.load %arg6[%c0_83, %c0_84, %c0_85] : memref<3x128x128xbf16, #tpu.memory_space<vmem>>, vector<1x128x128xbf16>
    %81 = vector.shape_cast %80 : vector<1x128x128xbf16> to vector<128x128xbf16>
    %cst_86 = arith.constant dense<0.000000e+00> : vector<64x128xf32>
    %82 = tpu.matmul %79, %81, %cst_86 {dimension_numbers = #tpu.dot_dimension_numbers<[1], [0], [0], [1], [0, 0, 1, 1], [], []>} : vector<64x128xbf16>, vector<128x128xbf16>, vector<64x128xf32> -> vector<64x128xf32>
    %c1_87 = arith.constant 1 : index
    %c0_88 = arith.constant 0 : index
    %83 = vector.load %arg21[%c1_87, %c0_88] : memref<136x128xbf16, #tpu.memory_space<vmem>>, vector<64x128xbf16>
    %c1_89 = arith.constant 1 : index
    %c0_90 = arith.constant 0 : index
    %c0_91 = arith.constant 0 : index
    %84 = vector.load %arg6[%c1_89, %c0_90, %c0_91] : memref<3x128x128xbf16, #tpu.memory_space<vmem>>, vector<1x128x128xbf16>
    %85 = vector.shape_cast %84 : vector<1x128x128xbf16> to vector<128x128xbf16>
    %cst_92 = arith.constant dense<0.000000e+00> : vector<64x128xf32>
    %86 = tpu.matmul %83, %85, %cst_92 {dimension_numbers = #tpu.dot_dimension_numbers<[1], [0], [0], [1], [0, 0, 1, 1], [], []>} : vector<64x128xbf16>, vector<128x128xbf16>, vector<64x128xf32> -> vector<64x128xf32>
    %87 = arith.addf %82, %86 : vector<64x128xf32>
    %c65 = arith.constant 65 : index
    %c0_93 = arith.constant 0 : index
    %88 = vector.load %arg21[%c65, %c0_93] : memref<136x128xbf16, #tpu.memory_space<vmem>>, vector<64x128xbf16>
    %c2_94 = arith.constant 2 : index
    %c0_95 = arith.constant 0 : index
    %c0_96 = arith.constant 0 : index
    %89 = vector.load %arg6[%c2_94, %c0_95, %c0_96] : memref<3x128x128xbf16, #tpu.memory_space<vmem>>, vector<1x128x128xbf16>
    %90 = vector.shape_cast %89 : vector<1x128x128xbf16> to vector<128x128xbf16>
    %cst_97 = arith.constant dense<0.000000e+00> : vector<64x128xf32>
    %91 = tpu.matmul %88, %90, %cst_97 {dimension_numbers = #tpu.dot_dimension_numbers<[1], [0], [0], [1], [0, 0, 1, 1], [], []>} : vector<64x128xbf16>, vector<128x128xbf16>, vector<64x128xf32> -> vector<64x128xf32>
    %92 = arith.addf %87, %91 : vector<64x128xf32>
    %c0_98 = arith.constant 0 : index
    %c0_99 = arith.constant 0 : index
    %93 = vector.load %arg7[%c0_98, %c0_99] : memref<1x128xf32, #tpu.memory_space<vmem>>, vector<1x128xf32>
    %94 = vector.broadcast %93 : vector<1x128xf32> to vector<64x128xf32>
    %95 = arith.addf %92, %94 : vector<64x128xf32>
    %cst_100 = arith.constant 0.000000e+00 : f32
    %96 = vector.broadcast %cst_100 : f32 to vector<64x128xf32>
    %97 = arith.maximumf %95, %96 : vector<64x128xf32>
    %98 = arith.truncf %97 : vector<64x128xf32> to vector<64x128xbf16>
    %c64_101 = arith.constant 64 : index
    %c0_102 = arith.constant 0 : index
    %99 = vector.load %arg22[%c64_101, %c0_102] : memref<128x128xbf16, #tpu.memory_space<vmem>>, vector<64x128xbf16>
    tpu.vector_store %arg22[%c64_101, %c0_102], %98 {strides = array<i32>} : memref<128x128xbf16, #tpu.memory_space<vmem>>, vector<64x128xbf16>,
    %c0_103 = arith.constant 0 : index
    %c0_104 = arith.constant 0 : index
    %100 = vector.load %arg22[%c0_103, %c0_104] : memref<128x128xbf16, #tpu.memory_space<vmem>>, vector<64x128xbf16>
    %c0_105 = arith.constant 0 : index
    %c0_106 = arith.constant 0 : index
    %c0_107 = arith.constant 0 : index
    %101 = vector.load %arg8[%c0_105, %c0_106, %c0_107] : memref<3x128x256xbf16, #tpu.memory_space<vmem>>, vector<1x128x256xbf16>
    %102 = vector.shape_cast %101 : vector<1x128x256xbf16> to vector<128x256xbf16>
    %cst_108 = arith.constant dense<0.000000e+00> : vector<64x256xf32>
    %103 = tpu.matmul %100, %102, %cst_108 {dimension_numbers = #tpu.dot_dimension_numbers<[1], [0], [0], [1], [0, 0, 1, 1], [], []>} : vector<64x128xbf16>, vector<128x256xbf16>, vector<64x256xf32> -> vector<64x256xf32>
    %c64_109 = arith.constant 64 : index
    %c0_110 = arith.constant 0 : index
    %104 = vector.load %arg22[%c64_109, %c0_110] : memref<128x128xbf16, #tpu.memory_space<vmem>>, vector<64x128xbf16>
    %c1_111 = arith.constant 1 : index
    %c0_112 = arith.constant 0 : index
    %c0_113 = arith.constant 0 : index
    %105 = vector.load %arg8[%c1_111, %c0_112, %c0_113] : memref<3x128x256xbf16, #tpu.memory_space<vmem>>, vector<1x128x256xbf16>
    %106 = vector.shape_cast %105 : vector<1x128x256xbf16> to vector<128x256xbf16>
    %cst_114 = arith.constant dense<0.000000e+00> : vector<64x256xf32>
    %107 = tpu.matmul %104, %106, %cst_114 {dimension_numbers = #tpu.dot_dimension_numbers<[1], [0], [0], [1], [0, 0, 1, 1], [], []>} : vector<64x128xbf16>, vector<128x256xbf16>, vector<64x256xf32> -> vector<64x256xf32>
    %108 = arith.addf %103, %107 : vector<64x256xf32>
    %c1_115 = arith.constant 1 : index
    %c0_116 = arith.constant 0 : index
    %109 = vector.load %arg22[%c1_115, %c0_116] : memref<128x128xbf16, #tpu.memory_space<vmem>>, vector<64x128xbf16>
    %c2_117 = arith.constant 2 : index
    %c0_118 = arith.constant 0 : index
    %c0_119 = arith.constant 0 : index
    %110 = vector.load %arg8[%c2_117, %c0_118, %c0_119] : memref<3x128x256xbf16, #tpu.memory_space<vmem>>, vector<1x128x256xbf16>
    %111 = vector.shape_cast %110 : vector<1x128x256xbf16> to vector<128x256xbf16>
    %cst_120 = arith.constant dense<0.000000e+00> : vector<64x256xf32>
    %112 = tpu.matmul %109, %111, %cst_120 {dimension_numbers = #tpu.dot_dimension_numbers<[1], [0], [0], [1], [0, 0, 1, 1], [], []>} : vector<64x128xbf16>, vector<128x256xbf16>, vector<64x256xf32> -> vector<64x256xf32>
    %113 = arith.addf %108, %112 : vector<64x256xf32>
    %c0_121 = arith.constant 0 : index
    %c0_122 = arith.constant 0 : index
    %114 = vector.load %arg9[%c0_121, %c0_122] : memref<1x256xf32, #tpu.memory_space<vmem>>, vector<1x256xf32>
    %115 = vector.broadcast %114 : vector<1x256xf32> to vector<64x256xf32>
    %116 = arith.addf %113, %115 : vector<64x256xf32>
    %cst_123 = arith.constant 0.000000e+00 : f32
    %117 = vector.broadcast %cst_123 : f32 to vector<64x256xf32>
    %118 = arith.maximumf %116, %117 : vector<64x256xf32>
    %119 = arith.truncf %118 : vector<64x256xf32> to vector<64x256xbf16>
    %c0_124 = arith.constant 0 : index
    %c0_125 = arith.constant 0 : index
    %120 = vector.load %arg23[%c0_124, %c0_125] : memref<72x256xbf16, #tpu.memory_space<vmem>>, vector<64x256xbf16>
    tpu.vector_store %arg23[%c0_124, %c0_125], %119 {strides = array<i32>} : memref<72x256xbf16, #tpu.memory_space<vmem>>, vector<64x256xbf16>,
    %c0_126 = arith.constant 0 : index
    %c0_127 = arith.constant 0 : index
    %121 = vector.load %arg23[%c0_126, %c0_127] : memref<72x256xbf16, #tpu.memory_space<vmem>>, vector<64x256xbf16>
    %c0_128 = arith.constant 0 : index
    %c0_129 = arith.constant 0 : index
    %c0_130 = arith.constant 0 : index
    %122 = vector.load %arg10[%c0_128, %c0_129, %c0_130] : memref<3x256x256xbf16, #tpu.memory_space<vmem>>, vector<1x256x256xbf16>
    %123 = vector.shape_cast %122 : vector<1x256x256xbf16> to vector<256x256xbf16>
    %cst_131 = arith.constant dense<0.000000e+00> : vector<64x256xf32>
    %124 = tpu.matmul %121, %123, %cst_131 {dimension_numbers = #tpu.dot_dimension_numbers<[1], [0], [0], [1], [0, 0, 1, 1], [], []>} : vector<64x256xbf16>, vector<256x256xbf16>, vector<64x256xf32> -> vector<64x256xf32>
    %c1_132 = arith.constant 1 : index
    %c0_133 = arith.constant 0 : index
    %125 = vector.load %arg23[%c1_132, %c0_133] : memref<72x256xbf16, #tpu.memory_space<vmem>>, vector<64x256xbf16>
    %c1_134 = arith.constant 1 : index
    %c0_135 = arith.constant 0 : index
    %c0_136 = arith.constant 0 : index
    %126 = vector.load %arg10[%c1_134, %c0_135, %c0_136] : memref<3x256x256xbf16, #tpu.memory_space<vmem>>, vector<1x256x256xbf16>
    %127 = vector.shape_cast %126 : vector<1x256x256xbf16> to vector<256x256xbf16>
    %cst_137 = arith.constant dense<0.000000e+00> : vector<64x256xf32>
    %128 = tpu.matmul %125, %127, %cst_137 {dimension_numbers = #tpu.dot_dimension_numbers<[1], [0], [0], [1], [0, 0, 1, 1], [], []>} : vector<64x256xbf16>, vector<256x256xbf16>, vector<64x256xf32> -> vector<64x256xf32>
    %129 = arith.addf %124, %128 : vector<64x256xf32>
    %c2_138 = arith.constant 2 : index
    %c0_139 = arith.constant 0 : index
    %130 = vector.load %arg23[%c2_138, %c0_139] : memref<72x256xbf16, #tpu.memory_space<vmem>>, vector<64x256xbf16>
    %c2_140 = arith.constant 2 : index
    %c0_141 = arith.constant 0 : index
    %c0_142 = arith.constant 0 : index
    %131 = vector.load %arg10[%c2_140, %c0_141, %c0_142] : memref<3x256x256xbf16, #tpu.memory_space<vmem>>, vector<1x256x256xbf16>
    %132 = vector.shape_cast %131 : vector<1x256x256xbf16> to vector<256x256xbf16>
    %cst_143 = arith.constant dense<0.000000e+00> : vector<64x256xf32>
    %133 = tpu.matmul %130, %132, %cst_143 {dimension_numbers = #tpu.dot_dimension_numbers<[1], [0], [0], [1], [0, 0, 1, 1], [], []>} : vector<64x256xbf16>, vector<256x256xbf16>, vector<64x256xf32> -> vector<64x256xf32>
    %134 = arith.addf %129, %133 : vector<64x256xf32>
    %c0_144 = arith.constant 0 : index
    %c0_145 = arith.constant 0 : index
    %135 = vector.load %arg11[%c0_144, %c0_145] : memref<1x256xf32, #tpu.memory_space<vmem>>, vector<1x256xf32>
    %136 = vector.broadcast %135 : vector<1x256xf32> to vector<64x256xf32>
    %137 = arith.addf %134, %136 : vector<64x256xf32>
    %cst_146 = arith.constant 0.000000e+00 : f32
    %138 = vector.broadcast %cst_146 : f32 to vector<64x256xf32>
    %139 = arith.maximumf %137, %138 : vector<64x256xf32>
    %140 = arith.truncf %139 : vector<64x256xf32> to vector<64x256xbf16>
    %c0_147 = arith.constant 0 : index
    %c0_148 = arith.constant 0 : index
    %141 = vector.load %arg24[%c0_147, %c0_148] : memref<72x256xbf16, #tpu.memory_space<vmem>>, vector<64x256xbf16>
    tpu.vector_store %arg24[%c0_147, %c0_148], %140 {strides = array<i32>} : memref<72x256xbf16, #tpu.memory_space<vmem>>, vector<64x256xbf16>,
    %c0_149 = arith.constant 0 : index
    %c0_150 = arith.constant 0 : index
    %142 = vector.load %arg24[%c0_149, %c0_150] : memref<72x256xbf16, #tpu.memory_space<vmem>>, vector<64x256xbf16>
    %c0_151 = arith.constant 0 : index
    %c0_152 = arith.constant 0 : index
    %c0_153 = arith.constant 0 : index
    %143 = vector.load %arg12[%c0_151, %c0_152, %c0_153] : memref<3x256x256xbf16, #tpu.memory_space<vmem>>, vector<1x256x256xbf16>
    %144 = vector.shape_cast %143 : vector<1x256x256xbf16> to vector<256x256xbf16>
    %cst_154 = arith.constant dense<0.000000e+00> : vector<64x256xf32>
    %145 = tpu.matmul %142, %144, %cst_154 {dimension_numbers = #tpu.dot_dimension_numbers<[1], [0], [0], [1], [0, 0, 1, 1], [], []>} : vector<64x256xbf16>, vector<256x256xbf16>, vector<64x256xf32> -> vector<64x256xf32>
    %c1_155 = arith.constant 1 : index
    %c0_156 = arith.constant 0 : index
    %146 = vector.load %arg24[%c1_155, %c0_156] : memref<72x256xbf16, #tpu.memory_space<vmem>>, vector<64x256xbf16>
    %c1_157 = arith.constant 1 : index
    %c0_158 = arith.constant 0 : index
    %c0_159 = arith.constant 0 : index
    %147 = vector.load %arg12[%c1_157, %c0_158, %c0_159] : memref<3x256x256xbf16, #tpu.memory_space<vmem>>, vector<1x256x256xbf16>
    %148 = vector.shape_cast %147 : vector<1x256x256xbf16> to vector<256x256xbf16>
    %cst_160 = arith.constant dense<0.000000e+00> : vector<64x256xf32>
    %149 = tpu.matmul %146, %148, %cst_160 {dimension_numbers = #tpu.dot_dimension_numbers<[1], [0], [0], [1], [0, 0, 1, 1], [], []>} : vector<64x256xbf16>, vector<256x256xbf16>, vector<64x256xf32> -> vector<64x256xf32>
    %150 = arith.addf %145, %149 : vector<64x256xf32>
    %c2_161 = arith.constant 2 : index
    %c0_162 = arith.constant 0 : index
    %151 = vector.load %arg24[%c2_161, %c0_162] : memref<72x256xbf16, #tpu.memory_space<vmem>>, vector<64x256xbf16>
    %c2_163 = arith.constant 2 : index
    %c0_164 = arith.constant 0 : index
    %c0_165 = arith.constant 0 : index
    %152 = vector.load %arg12[%c2_163, %c0_164, %c0_165] : memref<3x256x256xbf16, #tpu.memory_space<vmem>>, vector<1x256x256xbf16>
    %153 = vector.shape_cast %152 : vector<1x256x256xbf16> to vector<256x256xbf16>
    %cst_166 = arith.constant dense<0.000000e+00> : vector<64x256xf32>
    %154 = tpu.matmul %151, %153, %cst_166 {dimension_numbers = #tpu.dot_dimension_numbers<[1], [0], [0], [1], [0, 0, 1, 1], [], []>} : vector<64x256xbf16>, vector<256x256xbf16>, vector<64x256xf32> -> vector<64x256xf32>
    %155 = arith.addf %150, %154 : vector<64x256xf32>
    %c0_167 = arith.constant 0 : index
    %c0_168 = arith.constant 0 : index
    %156 = vector.load %arg13[%c0_167, %c0_168] : memref<1x256xf32, #tpu.memory_space<vmem>>, vector<1x256xf32>
    %157 = vector.broadcast %156 : vector<1x256xf32> to vector<64x256xf32>
    %158 = arith.addf %155, %157 : vector<64x256xf32>
    %cst_169 = arith.constant 0.000000e+00 : f32
    %159 = vector.broadcast %cst_169 : f32 to vector<64x256xf32>
    %160 = arith.maximumf %158, %159 : vector<64x256xf32>
    %161 = arith.truncf %160 : vector<64x256xf32> to vector<64x256xbf16>
    %c0_170 = arith.constant 0 : index
    %c0_171 = arith.constant 0 : index
    %162 = vector.load %arg25[%c0_170, %c0_171] : memref<64x256xbf16, #tpu.memory_space<vmem>>, vector<64x256xbf16>
    tpu.vector_store %arg25[%c0_170, %c0_171], %161 {strides = array<i32>} : memref<64x256xbf16, #tpu.memory_space<vmem>>, vector<64x256xbf16>,
    %c0_172 = arith.constant 0 : index
    %c0_173 = arith.constant 0 : index
    %163 = vector.load %arg18[%c0_172, %c0_173] : memref<8x64xbf16, #tpu.memory_space<vmem>>, vector<8x64xbf16>
    %c0_174 = arith.constant 0 : index
    %c0_175 = arith.constant 0 : index
    %164 = vector.load %arg25[%c0_174, %c0_175] : memref<64x256xbf16, #tpu.memory_space<vmem>>, vector<64x256xbf16>
    %cst_176 = arith.constant dense<0.000000e+00> : vector<8x256xf32>
    %165 = tpu.matmul %163, %164, %cst_176 {dimension_numbers = #tpu.dot_dimension_numbers<[1], [0], [0], [1], [0, 0, 1, 1], [], []>} : vector<8x64xbf16>, vector<64x256xbf16>, vector<8x256xf32> -> vector<8x256xf32>
    %cst_177 = arith.constant 5.000000e-01 : f32
    %166 = vector.broadcast %cst_177 : f32 to vector<8x256xf32>
    %167 = arith.mulf %165, %166 : vector<8x256xf32>
    %168 = arith.truncf %167 : vector<8x256xf32> to vector<8x256xbf16>
    %c0_178 = arith.constant 0 : index
    %c0_179 = arith.constant 0 : index
    %169 = vector.load %arg14[%c0_178, %c0_179] : memref<256x256xbf16, #tpu.memory_space<vmem>>, vector<256x256xbf16>
    %cst_180 = arith.constant dense<0.000000e+00> : vector<8x256xf32>
    %170 = tpu.matmul %168, %169, %cst_180 {dimension_numbers = #tpu.dot_dimension_numbers<[1], [0], [0], [1], [0, 0, 1, 1], [], []>} : vector<8x256xbf16>, vector<256x256xbf16>, vector<8x256xf32> -> vector<8x256xf32>
    %c0_181 = arith.constant 0 : index
    %c0_182 = arith.constant 0 : index
    %171 = vector.load %arg15[%c0_181, %c0_182] : memref<1x256xf32, #tpu.memory_space<vmem>>, vector<1x256xf32>
    %172 = vector.broadcast %171 : vector<1x256xf32> to vector<8x256xf32>
    %173 = arith.addf %170, %172 : vector<8x256xf32>
    %cst_183 = arith.constant 0.000000e+00 : f32
    %174 = vector.broadcast %cst_183 : f32 to vector<8x256xf32>
    %175 = arith.maximumf %173, %174 : vector<8x256xf32>
    %176 = arith.truncf %175 : vector<8x256xf32> to vector<8x256xbf16>
    %c0_184 = arith.constant 0 : index
    %c0_185 = arith.constant 0 : index
    %177 = vector.load %arg16[%c0_184, %c0_185] : memref<256x1xbf16, #tpu.memory_space<vmem>>, vector<256x1xbf16>
    %cst_186 = arith.constant dense<0.000000e+00> : vector<8x1xf32>
    %178 = tpu.matmul %176, %177, %cst_186 {dimension_numbers = #tpu.dot_dimension_numbers<[1], [0], [0], [1], [0, 0, 1, 1], [], []>} : vector<8x256xbf16>, vector<256x1xbf16>, vector<8x1xf32> -> vector<8x1xf32>
    %c0_187 = arith.constant 0 : index
    %c0_188 = arith.constant 0 : index
    %179 = vector.load %arg17[%c0_187, %c0_188] : memref<1x1xf32, #tpu.memory_space<vmem>>, vector<1x1xf32>
    %180 = vector.broadcast %179 : vector<1x1xf32> to vector<8x1xf32>
    %181 = arith.addf %178, %180 : vector<8x1xf32>
    %c0_189 = arith.constant 0 : index
    %c0_190 = arith.constant 0 : index
    %182 = vector.load %arg19[%c0_189, %c0_190] : memref<8x1xf32, #tpu.memory_space<vmem>>, vector<8x1xf32>
    tpu.vector_store %arg19[%c0_189, %c0_190], %181 {strides = array<i32>} : memref<8x1xf32, #tpu.memory_space<vmem>>, vector<8x1xf32>,
    return
  }
  func.func @transform_0(%arg0: i32) -> (i32, i32) {
    %c0_i32 = arith.constant 0 : i32
    %c0_i32_0 = arith.constant 0 : i32
    return %arg0, %c0_i32 : i32, i32
  }
  func.func @transform_1(%arg0: i32) -> (i32, i32) {
    %c0_i32 = arith.constant 0 : i32
    %c0_i32_0 = arith.constant 0 : i32
    %c0_i32_1 = arith.constant 0 : i32
    return %c0_i32, %c0_i32_0 : i32, i32
  }
  func.func @transform_2(%arg0: i32) -> (i32, i32) {
    %c0_i32 = arith.constant 0 : i32
    %c0_i32_0 = arith.constant 0 : i32
    %c0_i32_1 = arith.constant 0 : i32
    return %c0_i32, %c0_i32_0 : i32, i32
  }
  func.func @transform_3(%arg0: i32) -> (i32, i32, i32) {
    %c0_i32 = arith.constant 0 : i32
    %c0_i32_0 = arith.constant 0 : i32
    %c0_i32_1 = arith.constant 0 : i32
    %c0_i32_2 = arith.constant 0 : i32
    return %c0_i32, %c0_i32_0, %c0_i32_1 : i32, i32, i32
  }
  func.func @transform_4(%arg0: i32) -> (i32, i32) {
    %c0_i32 = arith.constant 0 : i32
    %c0_i32_0 = arith.constant 0 : i32
    %c0_i32_1 = arith.constant 0 : i32
    return %c0_i32, %c0_i32_0 : i32, i32
  }
  func.func @transform_5(%arg0: i32) -> (i32, i32, i32) {
    %c0_i32 = arith.constant 0 : i32
    %c0_i32_0 = arith.constant 0 : i32
    %c0_i32_1 = arith.constant 0 : i32
    %c0_i32_2 = arith.constant 0 : i32
    return %c0_i32, %c0_i32_0, %c0_i32_1 : i32, i32, i32
  }
  func.func @transform_6(%arg0: i32) -> (i32, i32) {
    %c0_i32 = arith.constant 0 : i32
    %c0_i32_0 = arith.constant 0 : i32
    %c0_i32_1 = arith.constant 0 : i32
    return %c0_i32, %c0_i32_0 : i32, i32
  }
  func.func @transform_7(%arg0: i32) -> (i32, i32, i32) {
    %c0_i32 = arith.constant 0 : i32
    %c0_i32_0 = arith.constant 0 : i32
    %c0_i32_1 = arith.constant 0 : i32
    %c0_i32_2 = arith.constant 0 : i32
    return %c0_i32, %c0_i32_0, %c0_i32_1 : i32, i32, i32
  }
  func.func @transform_8(%arg0: i32) -> (i32, i32) {
    %c0_i32 = arith.constant 0 : i32
    %c0_i32_0 = arith.constant 0 : i32
    %c0_i32_1 = arith.constant 0 : i32
    return %c0_i32, %c0_i32_0 : i32, i32
  }
  func.func @transform_9(%arg0: i32) -> (i32, i32, i32) {
    %c0_i32 = arith.constant 0 : i32
    %c0_i32_0 = arith.constant 0 : i32
    %c0_i32_1 = arith.constant 0 : i32
    %c0_i32_2 = arith.constant 0 : i32
    return %c0_i32, %c0_i32_0, %c0_i32_1 : i32, i32, i32
  }
  func.func @transform_10(%arg0: i32) -> (i32, i32) {
    %c0_i32 = arith.constant 0 : i32
    %c0_i32_0 = arith.constant 0 : i32
    %c0_i32_1 = arith.constant 0 : i32
    return %c0_i32, %c0_i32_0 : i32, i32
  }
  func.func @transform_11(%arg0: i32) -> (i32, i32, i32) {
    %c0_i32 = arith.constant 0 : i32
    %c0_i32_0 = arith.constant 0 : i32
    %c0_i32_1 = arith.constant 0 : i32
    %c0_i32_2 = arith.constant 0 : i32
    return %c0_i32, %c0_i32_0, %c0_i32_1 : i32, i32, i32
  }
  func.func @transform_12(%arg0: i32) -> (i32, i32) {
    %c0_i32 = arith.constant 0 : i32
    %c0_i32_0 = arith.constant 0 : i32
    %c0_i32_1 = arith.constant 0 : i32
    return %c0_i32, %c0_i32_0 : i32, i32
  }
  func.func @transform_13(%arg0: i32) -> (i32, i32) {
    %c0_i32 = arith.constant 0 : i32
    %c0_i32_0 = arith.constant 0 : i32
    %c0_i32_1 = arith.constant 0 : i32
    return %c0_i32, %c0_i32_0 : i32, i32
  }
  func.func @transform_14(%arg0: i32) -> (i32, i32) {
    %c0_i32 = arith.constant 0 : i32
    %c0_i32_0 = arith.constant 0 : i32
    %c0_i32_1 = arith.constant 0 : i32
    return %c0_i32, %c0_i32_0 : i32, i32
  }
  func.func @transform_15(%arg0: i32) -> (i32, i32) {
    %c0_i32 = arith.constant 0 : i32
    %c0_i32_0 = arith.constant 0 : i32
    %c0_i32_1 = arith.constant 0 : i32
    return %c0_i32, %c0_i32_0 : i32, i32
  }
  func.func @transform_16(%arg0: i32) -> (i32, i32) {
    %c0_i32 = arith.constant 0 : i32
    %c0_i32_0 = arith.constant 0 : i32
    %c0_i32_1 = arith.constant 0 : i32
    return %c0_i32, %c0_i32_0 : i32, i32
  }
  func.func @transform_17(%arg0: i32) -> (i32, i32) {
    %c0_i32 = arith.constant 0 : i32
    %c0_i32_0 = arith.constant 0 : i32
    %c0_i32_1 = arith.constant 0 : i32
    return %c0_i32, %c0_i32_0 : i32, i32
  }
  func.func @transform_18(%arg0: i32) -> (i32, i32) {
    %c0_i32 = arith.constant 0 : i32
    %c0_i32_0 = arith.constant 0 : i32
    return %arg0, %c0_i32 : i32, i32
  }
}

</mosaic_0001>

<bundles_post_ra>
// kernel: tpu_custom_call.1
= control target key start
LH: loop header
LB: loop body
LE: loop exit
PB: predicated region body
PF: predicated region fallthrough
CT: control target
= control target key end

     0   :  { %s10885_s0 = inlined_call_operand.vmem [shape: bf16[512,18], index: 0, kind: input, shape index: {}]   ;;  %s10886_s1 = inlined_call_operand.hbm [shape: bf16[18,64], index: 1, kind: input, shape index: {}]   ;;  %s10887_s2 = inlined_call_operand.hbm [shape: f32[1,64], index: 2, kind: input, shape index: {}]   ;;  %s10888_s3 = inlined_call_operand.hbm [shape: bf16[3,64,128], index: 3, kind: input, shape index: {}]   ;;  %s10889_s4 = inlined_call_operand.hbm [shape: f32[1,128], index: 4, kind: input, shape index: {}]   ;;  %s10890_s5 = inlined_call_operand.hbm [shape: bf16[3,128,128], index: 5, kind: input, shape index: {}]   ;;  %s10891_s6 = inlined_call_operand.hbm [shape: f32[1,128], index: 6, kind: input, shape index: {}]   ;;  %s10892_s7 = inlined_call_operand.vmem [shape: bf16[3,128,256], index: 7, kind: input, shape index: {}]   ;;  %s10893_s8 = inlined_call_operand.vmem [shape: f32[1,256], index: 8, kind: input, shape index: {}]   ;;  %s10894_s9 = inlined_call_operand.hbm [shape: bf16[3,256,256], index: 9, kind: input, shape index: {}]   ;;  %s10895_s10 = inlined_call_operand.vmem [shape: f32[1,256], index: 10, kind: input, shape index: {}]   ;;  %s10896_s11 = inlined_call_operand.hbm [shape: bf16[3,256,256], index: 11, kind: input, shape index: {}]   ;;  %s10897_s12 = inlined_call_operand.hbm [shape: f32[1,256], index: 12, kind: input, shape index: {}]   ;;  %s10898_s13 = inlined_call_operand.hbm [shape: bf16[256,256], index: 13, kind: input, shape index: {}]   ;;  %s10899_s14 = inlined_call_operand.vmem [shape: f32[1,256], index: 14, kind: input, shape index: {}]   ;;  %s10900_s15 = inlined_call_operand.vmem [shape: bf16[256,1], index: 15, kind: input, shape index: {}]   ;;  %s10901_s16 = inlined_call_operand.<no memory space> [shape: f32[1,1], index: 16, kind: input, shape index: {}]   ;;  %s10902_s17 = inlined_call_operand.vmem [shape: bf16[8,64], index: 17, kind: input, shape index: {}]   ;;  %s10903_s18 = inlined_call_operand.vmem [shape: f32[16,1], index: 18, kind: output, shape index: {}]  }
   0x1   :  { %10909 = sst [smem:[#allocation32_spill]] %s10885_s0  ;;  %v23_v0 = vstv %s10901_s16 }
   0x2   :  { %10910 = sst [smem:[#allocation33_spill]] %s10886_s1  ;;  %24 = vst [vmem:[#allocation8] sm:$0x1] %v23_v0 }
   0x3   :  { %10911 = sst [smem:[#allocation34_spill]] %s10887_s2 }
   0x4   :  { %10912 = sst [smem:[#allocation35_spill]] %s10888_s3 }
   0x5   :  { %10913 = sst [smem:[#allocation36_spill]] %s10889_s4 }
   0x6   :  { %10914 = sst [smem:[#allocation37_spill]] %s10891_s6 }
   0x7   :  { %25 = vsyncpa [#allocation10], 0 }
   0x8   :  { %26 = vsyncpa [#allocation12], 0 }
   0x9   :  { %27 = vsyncpa [#allocation15], 0 }
   0xa   :  { %28 = vsyncpa [#allocation18], 0 }
   0xb   :  { %29 = vsyncpa [#allocation21], 0 }
   0xc   :  { %30 = vsyncpa [#allocation24], 0  ;;  %s9655_s29 = smov 0  }
   0xd LB: > { %10915 = sst [smem:[#allocation31_spill]] %s9540_s29  ;;  %s9664_s1 = sadd.s32 4294967295, %s9540_s29   ;;  %s9540_s29 = sphi %s9655_s29, %s36_s29  }
   0xe   : > { %s10916_s19 = sld [smem:[#allocation34_spill]]  ;;  %p6529_p0 = scmp.ge.s32.totalorder %s9540_s29, 1 }
   0xf   : > { %p450_p1 = scmp.lt.s32.totalorder %s9540_s29, 3  ;;  %p9161_p2 = scmp.eq.s32.totalorder %s9664_s1, 0 }
  0x10   : > { %s9542_s21 = smov [#allocation11]   ;;  %s10918_s4 = sld [smem:[#allocation36_spill]] }
  0x11   : > { %p9669_p3 = pnand %p6529_p0, %p450_p1  ;;  %s478_s22 = sshll.u32 %s9542_s21, 4  ;;  %s479_s22 = int_to_ptr.vmem [resolvable:$true] %s478_s22 }
  0x12   : > { %s10919_s6 = sld [smem:[#allocation37_spill]]  ;;  %s9543_s30 = smov [#allocation14]  }
  0x13   : > { %p9130_p4 = pneg %p9669_p3  ;;  %s504_s0 = sshll.u32 %s9543_s30, 4  ;;  %s505_s0 = int_to_ptr.vmem [resolvable:$true] %s504_s0 }
  0x14   : > { %s476_s16 = sshll.u32 %s10916_s19, 4  ;;  %s9544_s19 = smov [#allocation17]   ;;  %s477_s16 = int_to_ptr.hbm [resolvable:$true] %s476_s16 }
  0x15   : > { %p9683_p5 = pnand %p9161_p2, %p9130_p4  ;;  %s530_s21 = sshll.u32 %s9544_s19, 4  ;;  %s531_s21 = int_to_ptr.vmem [resolvable:$true] %s530_s21 }
  0x16   : > { %s502_s24 = sshll.u32 %s10918_s4, 4  ;;  %s562_s25 = sshll.u32 %s10896_s11, 4  ;;  %s503_s24 = int_to_ptr.hbm [resolvable:$true] %s502_s24  ;;  %s563_s25 = int_to_ptr.hbm [resolvable:$true] %s562_s25 }
  0x17   : > { %9136 = dma.hbm_to_vmem [thread:$0]  (!%p9683_p5), %s477_s16, 16, %s479_s22, [#allocation12]  }
  0x18   : > { %s528_s27 = sshll.u32 %s10919_s6, 4  ;;  %s9545_s26 = smov [#allocation20]   ;;  %s529_s27 = int_to_ptr.hbm [resolvable:$true] %s528_s27 }
  0x19   : > { %9142 = dma.hbm_to_vmem [thread:$0]  (!%p9683_p5), %s503_s24, 16, %s505_s0, [#allocation15]  }
  0x1a   : > { %9148 = dma.hbm_to_vmem [thread:$0]  (!%p9683_p5), %s529_s27, 16, %s531_s21, [#allocation18]  }
  0x1b   : > { %s564_s30 = sshll.u32 %s9545_s26, 4  ;;  %s10921_s29 = sld [smem:[#allocation33_spill]]  ;;  %s565_s30 = int_to_ptr.vmem [resolvable:$true] %s564_s30 }
  0x1c   : > { %s10905_s22 = smov 128   ;;  %s10907_s24 = smov 8  }
  0x1d   : > { %9154 = dma.hbm_to_vmem [thread:$0]  (!%p9683_p5), %s563_s25, 12288, %s565_s30, [#allocation21], %s10905_s22, %s10905_s22, %s10907_s24  }
  0x1e   : > { %s9548_s27 = smov [#allocation9]   ;;  %s9549_s19 = smov 64  }
  0x1f   : > { %s463_s0 = sshll.u32 %s9548_s27, 4  ;;  %s9550_s21 = smov 4   ;;  %s464_s0 = int_to_ptr.vmem [resolvable:$true] %s463_s0 }
  0x20   : > { %s10922_s3 = sld [smem:[#allocation35_spill]]  ;;  %s513_s30 = sshll.u32 %s10890_s5, 4  ;;  %s514_s30 = int_to_ptr.hbm [resolvable:$true] %s513_s30 }
  0x21   : > { %s461_s16 = sshll.u32 %s10921_s29, 4  ;;  %s9551_s29 = smov [#allocation13]   ;;  %s462_s16 = int_to_ptr.hbm [resolvable:$true] %s461_s16 }
  0x22   : > { %9133 = dma.hbm_to_vmem [thread:$0]  (!%p9683_p5), %s462_s16, 192, %s464_s0, [#allocation10], %s9549_s19, %s9549_s19, %s9550_s21  }
  0x23   : > { %s489_s23 = sshll.u32 %s9551_s29, 4  ;;  %s9552_s27 = smov [#allocation16]   ;;  %s490_s23 = int_to_ptr.vmem [resolvable:$true] %s489_s23 }
  0x24   : > { %s515_s22 = sshll.u32 %s9552_s27, 4  ;;  %s545_s2 = sshll.u32 %s10894_s9, 4  ;;  %s516_s22 = int_to_ptr.vmem [resolvable:$true] %s515_s22  ;;  %s546_s2 = int_to_ptr.hbm [resolvable:$true] %s545_s2 }
  0x25   : > { %9145 = dma.hbm_to_vmem [thread:$0]  (!%p9683_p5), %s514_s30, 3072, %s516_s22, [#allocation15], %s9549_s19, %s9549_s19, %s9550_s21  }
  0x26   : > { %s487_s6 = sshll.u32 %s10922_s3, 4  ;;  %s577_s26 = sshll.u32 %s10897_s12, 4  ;;  %s488_s6 = int_to_ptr.hbm [resolvable:$true] %s487_s6  ;;  %s578_s26 = int_to_ptr.hbm [resolvable:$true] %s577_s26 }
  0x27   : > { %9139 = dma.hbm_to_vmem [thread:$0]  (!%p9683_p5), %s488_s6, 1536, %s490_s23, [#allocation12], %s9549_s19, %s9549_s19, %s9550_s21  }
  0x28   : > { %s9553_s25 = smov [#allocation19]   ;;  %s10923_s6 = smov 8  }
  0x29   : > { %s547_s24 = sshll.u32 %s9553_s25, 4  ;;  %s10924_s23 = smov 128   ;;  %s548_s24 = int_to_ptr.vmem [resolvable:$true] %s547_s24 }
  0x2a   : > { %9151 = dma.hbm_to_vmem [thread:$0]  (!%p9683_p5), %s546_s2, 12288, %s548_s24, [#allocation18], %s10924_s23, %s10924_s23, %s10923_s6  }
  0x2b   : > { %s9554_s27 = smov [#allocation22]   ;;  %s588_s22 = sshll.u32 %s10898_s13, 4  ;;  %s589_s22 = int_to_ptr.hbm [resolvable:$true] %s588_s22 }
  0x2c   : > { %s579_s16 = sshll.u32 %s9554_s27, 4  ;;  %s9555_s19 = smov [#allocation23]   ;;  %s580_s16 = int_to_ptr.vmem [resolvable:$true] %s579_s16 }
  0x2d   : > { %9157 = dma.hbm_to_vmem [thread:$0]  (!%p9683_p5), %s578_s26, 32, %s580_s16, [#allocation21]  }
  0x2e   : > { %s590_s21 = sshll.u32 %s9555_s19, 4  ;;  %627 = sbr.rel (%p9669_p3) target bundleno = 2100 (0x834), region = 92  ;;  %s591_s21 = int_to_ptr.vmem [resolvable:$true] %s590_s21 }
  0x2f   : > { %9160 = dma.hbm_to_vmem [thread:$0]  (!%p9683_p5), %s589_s22, 4096, %s591_s21, [#allocation24], %s10924_s23, %s10924_s23, %s10923_s6  }
  0x33   : > { %9515 = dma.done.wait (%p9161_p2), [#allocation10], 192  }
  0x34   : > { %9517 = vsyncadd (%p9161_p2), [#allocation10], 4294967104 }
  0x35   : > { %9519 = dma.done.wait (%p9161_p2), [#allocation12], 1552  }
  0x36   : > { %9521 = vsyncadd (%p9161_p2), [#allocation12], 4294965744 }
  0x37   : > { %9523 = dma.done.wait (%p9161_p2), [#allocation15], 3088  }
  0x38   : > { %9525 = vsyncadd (%p9161_p2), [#allocation15], 4294964208 }
  0x39   : > { %9527 = dma.done.wait (%p9161_p2), [#allocation18], 12304  }
  0x3a   : > { %9529 = vsyncadd (%p9161_p2), [#allocation18], 4294954992 }
  0x3b   : > { %9531 = dma.done.wait (%p9161_p2), [#allocation21], 12320  }
  0x3c   : > { %9533 = vsyncadd (%p9161_p2), [#allocation21], 4294954976 }
  0x3d   : > { %9535 = dma.done.wait (%p9161_p2), [#allocation24], 4096  }
  0x3e   : > { %9537 = vsyncadd (%p9161_p2), [#allocation24], 4294963200  ;;  %s6552_s3 = sshll.u32 %s9664_s1, 5  ;;  %v774_v1 = vld [vmem:[#allocation9 + $0x8] sm:$0x1]  ;;  %vm917_vm0 = vcmask 1040384  }
  0x3f   : > { %p727_p6 = scmp.lt.s32.totalorder %s6552_s3, 63  ;;  %v864_v2 = vunpack.c.l.b16 %v774_v1  ;;  %v8539_v5 = vld [vmem:[#allocation9] sm:$0xff]  ;;  %s10925_s30 = sld [smem:[#allocation32_spill]]  ;;  %vm868_vm1 = vcmask 146432   ;;  %v8545_v16 = vld [vmem:[#allocation13 + $0x8] sm:$0xff]  ;;  %v8544_v17 = vld [vmem:[#allocation13] sm:$0xff] }
  0x40   : > { %v8547_v13 = vld [vmem:[#allocation13 + $0x18] sm:$0xff]  ;;  %v8546_v14 = vld [vmem:[#allocation13 + $0x10] sm:$0xff]  ;;  %vm1074_vm2 = vcmask 519168   ;;  %vm1184_vm3 = vcmask 523264   ;;  %v8553_v51 = vld [vmem:[#allocation13 + $0x28] sm:$0xff]  ;;  %vm4305_vm5 = vcmask 1046528  }
  0x41   : > { %s10928_s3 = smov (!%p727_p6, %s6552_s3), 63  ;;  %v866_v3 = vpack.c.b16 %v864_v2, %v864_v2  ;;  %1286 = vmatpush.bf16.msra.mxu2 %v8547_v13  ;;  %v9785_v18 = vld [vmem:[#allocation11] ss:$0 sm:$0xff]  ;;  %v8554_v48 = vld [vmem:[#allocation13 + $0x30] sm:$0xff]  ;;  %v8552_v55 = vld [vmem:[#allocation13 + $0x20] sm:$0xff]  ;;  %p732_p7 = scmp.lt.s32.totalorder %s9664_s1, 1 }
  0x42   : > { %s6553_s20 = sshll.u32 %s10928_s3, 2  ;;  %v8555_v44 = vld [vmem:[#allocation13 + $0x38] sm:$0xff]  ;;  %vm1699_vm4 = vsmask.f32 7424  ;;  %vm6374_vm6 = vcmask 7168  }
  0x43   : > { %v919_v4 = vsel %vm917_vm0, %v866_v3, 0  ;;  %1201 = vmatpush.bf16.msra.mxu1 %v8555_v44  ;;  %s10930_s1 = smov (!%p732_p7, %s9664_s1), 1 }
  0x44   : > { %927 = vmatpush.bf16.msra.mxu0 %v919_v4 }
  0x45   : > { %s9767_s2 = scalar_lea.vmem %s10925_s30, %s6553_s20  ;;  %1287 = vmatpush.bf16.msra.mxu2 %v8546_v14  ;;  %s6554_s30 = sshll.u32 %s10930_s1, 3 }
  0x46   : > { %v8523_v6 = vld [vmem:[%s9767_s2] sm:$0xff]  ;;  %v8524_v7 = vld [vmem:[%s9767_s2 + $0x8] sm:$0xff]  ;;  %v8525_v8 = vld [vmem:[%s9767_s2 + $0x10] sm:$0xff]  ;;  %s735_s29 = scalar_lea.vmem %s10903_s18, %s6554_s30 }
  0x47   : > { %v8526_v9 = vld [vmem:[%s9767_s2 + $0x18] sm:$0xff]  ;;  %v8527_v10 = vld [vmem:[%s9767_s2 + $0x20] sm:$0xff]  ;;  %v8528_v11 = vld [vmem:[%s9767_s2 + $0x28] sm:$0xff]  ;;  %1202 = vmatpush.bf16.msra.mxu1 %v8554_v48 }
  0x48   : > { %928 = vmatpush.bf16.msra.mxu0 %v8539_v5  ;;  %v8529_v12 = vld [vmem:[%s9767_s2 + $0x30] sm:$0xff]  ;;  %v8530_v15 = vld [vmem:[%s9767_s2 + $0x38] sm:$0xff]  ;;  %v8531_v19 = vld [vmem:[%s9767_s2 + $0x40] sm:$0xff] }
  0x49   : > { %1288 = vmatpush.bf16.msra.mxu2 %v8545_v16  ;;  %v8532_v28 = vld [vmem:[%s9767_s2 + $0x48] sm:$0xff]  ;;  %v8533_v38 = vld [vmem:[%s9767_s2 + $0x50] sm:$0xff]  ;;  %v8534_v50 = vld [vmem:[%s9767_s2 + $0x58] sm:$0xff] }
  0x4a   : > { %v8535_v62 = vld [vmem:[%s9767_s2 + $0x60] sm:$0xff] }
  0x4b   : > { %6623 = vmatmul.msk.bf16.vlgmr.msra.gmra.mxu0 %vm868_vm1, %v8523_v6  ;;  %1203 = vmatpush.bf16.msra.mxu1 %v8553_v51 }
  0x4d   : > { %1289 = vmatpush.bf16.msra.mxu2 %v8544_v17 }
  0x4f   : > { %1204 = vmatpush.bf16.msra.mxu1 %v8552_v55 }
  0x5b   : > { %6624 = vmatmul.msk.bf16.gmra.mxu0 %vm868_vm1, %v8524_v7 }
  0x6b   : > { %6625 = vmatmul.msk.bf16.gmra.mxu0 %vm868_vm1, %v8525_v8  ;;  %v8536_v8 = vld [vmem:[%s9767_s2 + $0x68] sm:$0xff] }
  0x7b   : > { %6626 = vmatmul.msk.bf16.gmra.mxu0 %vm868_vm1, %v8526_v9 }
  0x8b   : > { %6627 = vmatmul.msk.bf16.gmra.mxu0 %vm868_vm1, %v8527_v10 }
  0x9b   : > { %6628 = vmatmul.msk.bf16.gmra.mxu0 %vm868_vm1, %v8528_v11 }
  0xab   : > { %6629 = vmatmul.msk.bf16.gmra.mxu0 %vm868_vm1, %v8529_v12 }
  0xbb   : > { %6630 = vmatmul.msk.bf16.gmra.mxu0 %vm868_vm1, %v8530_v15 }
  0xc8   : > { %v930_v20 = vpop.f32.mrf.mxu0 }
  0xc9   : > { %v931_v21 = vadd.f32 %v9785_v18, %v930_v20 }
  0xcb   : > { %v1010_v22 = vmax.f32 %v931_v21, 0.0  ;;  %6631 = vmatmul.msk.bf16.gmra.mxu0 %vm868_vm1, %v8531_v19  ;;  %v8537_v19 = vld [vmem:[%s9767_s2 + $0x70] sm:$0xff] }
  0xcd   : > { %v1042_v23 = vpack.c.bf16 %v1010_v22, %v1010_v22 }
  0xcf   : > { %1075 = vst.msk [vmem:[#allocation2] sm:$0xf] %vm1074_vm2, %v1042_v23 }
  0xd0   : > { %v932_v24 = vpop.f32.mrf.mxu0 }
  0xd1   : > { %v933_v25 = vadd.f32 %v9785_v18, %v932_v24 }
  0xd3   : > { %v1011_v26 = vmax.f32 %v933_v25, 0.0  ;;  %v8563_v25 = vld [vmem:[#allocation13 + $0x58] sm:$0xff] }
  0xd4   : > { %1388 = vmatpush.bf16.msra.mxu3 %v8563_v25 }
  0xd5   : > { %v1043_v27 = vpack.c.bf16 %v1011_v26, %v1011_v26  ;;  %v8571_v26 = vld [vmem:[#allocation13 + $0x18] sm:$0xff] }
  0xd6   : > { %1634 = vmatpush.bf16.msrb.mxu2 %v8571_v26 }
  0xd7   : > { %1076 = vst.msk [vmem:[#allocation2 + $0x4] sm:$0xf] %vm1074_vm2, %v1043_v27 }
  0xd8   : > { %v935_v29 = vpop.f32.mrf.mxu0 }
  0xd9   : > { %v936_v30 = vadd.f32 %v9785_v18, %v935_v29 }
  0xdb   : > { %v1012_v31 = vmax.f32 %v936_v30, 0.0  ;;  %6632 = vmatmul.msk.bf16.gmra.mxu0 %vm868_vm1, %v8532_v28  ;;  %v8562_v30 = vld [vmem:[#allocation13 + $0x50] sm:$0xff] }
  0xdc   : > { %1389 = vmatpush.bf16.msra.mxu3 %v8562_v30 }
  0xdd   : > { %v1044_v32 = vpack.c.bf16 %v1012_v31, %v1012_v31  ;;  %v8570_v31 = vld [vmem:[#allocation13 + $0x10] sm:$0xff] }
  0xde   : > { %v8540_v33 = vld [vmem:[#allocation2] sm:$0xff]  ;;  %1635 = vmatpush.bf16.msrb.mxu2 %v8570_v31 }
  0xdf   : > { %1077 = vst.msk [vmem:[#allocation2 + $0x8] sm:$0xf] %vm1074_vm2, %v1044_v32  ;;  %6707 = vmatmul.msk.bf16.vlgmr.msra.gmra.mxu2 %vm1184_vm3, %v8540_v33  ;;  %v8538_v33 = vld [vmem:[%s9767_s2 + $0x78] sm:$0xff] }
  0xe0   : > { %v937_v34 = vpop.f32.mrf.mxu0 }
  0xe1   : > { %v938_v35 = vadd.f32 %v9785_v18, %v937_v34  ;;  %v8561_v34 = vld [vmem:[#allocation13 + $0x48] sm:$0xff] }
  0xe2   : > { %1390 = vmatpush.bf16.msra.mxu3 %v8561_v34 }
  0xe3   : > { %v1013_v36 = vmax.f32 %v938_v35, 0.0  ;;  %v8569_v35 = vld [vmem:[#allocation13 + $0x8] sm:$0xff] }
  0xe4   : > { %1636 = vmatpush.bf16.msrb.mxu2 %v8569_v35 }
  0xe5   : > { %v1045_v37 = vpack.c.bf16 %v1013_v36, %v1013_v36 }
  0xe7   : > { %1078 = vst.msk [vmem:[#allocation2 + $0xc] sm:$0xf] %vm1074_vm2, %v1045_v37 }
  0xe8   : > { %v940_v39 = vpop.f32.mrf.mxu0 }
  0xe9   : > { %v941_v40 = vadd.f32 %v9785_v18, %v940_v39  ;;  %v8560_v39 = vld [vmem:[#allocation13 + $0x40] sm:$0xff] }
  0xea   : > { %1391 = vmatpush.bf16.msra.mxu3 %v8560_v39  ;;  %v8580_v39 = vld [vmem:[#allocation2] sm:$0xff] }
  0xeb   : > { %v1014_v41 = vmax.f32 %v941_v40, 0.0  ;;  %6633 = vmatmul.msk.bf16.gmra.mxu0 %vm868_vm1, %v8533_v38  ;;  %v8568_v40 = vld [vmem:[#allocation13] sm:$0xff] }
  0xec   : > { %1637 = vmatpush.bf16.msrb.mxu2 %v8568_v40 }
  0xed   : > { %v1046_v42 = vpack.c.bf16 %v1014_v41, %v1014_v41 }
  0xee   : > { %v8541_v43 = vld [vmem:[#allocation2 + $0x8] sm:$0xff] }
  0xef   : > { %1079 = vst.msk [vmem:[#allocation2 + $0x10] sm:$0xf] %vm1074_vm2, %v1046_v42  ;;  %6708 = vmatmul.msk.bf16.gmra.mxu2 %vm1184_vm3, %v8541_v43 }
  0xf0   : > { %v942_v45 = vpop.f32.mrf.mxu0 }
  0xf1   : > { %v943_v46 = vadd.f32 %v9785_v18, %v942_v45 }
  0xf3   : > { %v1015_v47 = vmax.f32 %v943_v46, 0.0 }
  0xf5   : > { %v1047_v49 = vpack.c.bf16 %v1015_v47, %v1015_v47 }
  0xf7   : > { %1080 = vst.msk [vmem:[#allocation2 + $0x14] sm:$0xf] %vm1074_vm2, %v1047_v49 }
  0xf8   : > { %v945_v52 = vpop.f32.mrf.mxu0 }
  0xf9   : > { %v946_v53 = vadd.f32 %v9785_v18, %v945_v52 }
  0xfb   : > { %v1016_v54 = vmax.f32 %v946_v53, 0.0  ;;  %6634 = vmatmul.msk.bf16.gmra.mxu0 %vm868_vm1, %v8534_v50 }
  0xfd   : > { %v1048_v56 = vpack.c.bf16 %v1016_v54, %v1016_v54 }
  0xfe   : > { %v8542_v57 = vld [vmem:[#allocation2 + $0x10] sm:$0xff] }
  0xff   : > { %1081 = vst.msk [vmem:[#allocation2 + $0x18] sm:$0xf] %vm1074_vm2, %v1048_v56  ;;  %6709 = vmatmul.msk.bf16.gmra.mxu2 %vm1184_vm3, %v8542_v57 }
 0x100   : > { %v947_v58 = vpop.f32.mrf.mxu0 }
 0x101   : > { %v948_v59 = vadd.f32 %v9785_v18, %v947_v58 }
 0x103   : > { %v1017_v60 = vmax.f32 %v948_v59, 0.0 }
 0x105   : > { %v1049_v61 = vpack.c.bf16 %v1017_v60, %v1017_v60 }
 0x107   : > { %1082 = vst.msk [vmem:[#allocation2 + $0x1c] sm:$0xf] %vm1074_vm2, %v1049_v61 }
 0x108   : > { %v950_v63 = vpop.f32.mrf.mxu0 }
 0x109   : > { %v951_v0 = vadd.f32 %v9785_v18, %v950_v63 }
 0x10b   : > { %v1018_v1 = vmax.f32 %v951_v0, 0.0  ;;  %6635 = vmatmul.msk.bf16.gmra.mxu0 %vm868_vm1, %v8535_v62 }
 0x10d   : > { %v1050_v2 = vpack.c.bf16 %v1018_v1, %v1018_v1 }
 0x10e   : > { %v8543_v3 = vld [vmem:[#allocation2 + $0x18] sm:$0xff] }
 0x10f   : > { %1083 = vst.msk [vmem:[#allocation2 + $0x20] sm:$0xf] %vm1074_vm2, %v1050_v2  ;;  %6710 = vmatmul.msk.bf16.gmra.mxu2 %vm1184_vm3, %v8543_v3 }
 0x110   : > { %v952_v4 = vpop.f32.mrf.mxu0 }
 0x111   : > { %v953_v5 = vadd.f32 %v9785_v18, %v952_v4 }
 0x113   : > { %v1019_v6 = vmax.f32 %v953_v5, 0.0 }
 0x115   : > { %v1051_v7 = vpack.c.bf16 %v1019_v6, %v1019_v6 }
 0x117   : > { %1084 = vst.msk [vmem:[#allocation2 + $0x24] sm:$0xf] %vm1074_vm2, %v1051_v7 }
 0x118   : > { %v955_v9 = vpop.f32.mrf.mxu0 }
 0x119   : > { %v956_v10 = vadd.f32 %v9785_v18, %v955_v9  ;;  %v8587_v9 = vld [vmem:[#allocation13 + $0x58] sm:$0xff] }
 0x11a   : > { %1776 = vmatpush.bf16.msrb.mxu3 %v8587_v9  ;;  %v8583_v9 = vld [vmem:[#allocation2 + $0x18] sm:$0xff] }
 0x11b   : > { %v1020_v11 = vmax.f32 %v956_v10, 0.0  ;;  %6636 = vmatmul.msk.bf16.gmra.mxu0 %vm868_vm1, %v8536_v8  ;;  %v8579_v8 = vld [vmem:[#allocation13 + $0x38] sm:$0xff] }
 0x11c   : > { %1549 = vmatpush.bf16.msrb.mxu1 %v8579_v8 }
 0x11d   : > { %v1052_v12 = vpack.c.bf16 %v1020_v11, %v1020_v11 }
 0x11e   : > { %v8548_v13 = vld [vmem:[#allocation2 + $0x20] sm:$0xff] }
 0x11f   : > { %1085 = vst.msk [vmem:[#allocation2 + $0x28] sm:$0xf] %vm1074_vm2, %v1052_v12  ;;  %6671 = vmatmul.msk.bf16.vlgmr.msra.gmra.mxu1 %vm1184_vm3, %v8548_v13  ;;  %v8578_v13 = vld [vmem:[#allocation13 + $0x30] sm:$0xff] }
 0x120   : > { %v957_v14 = vpop.f32.mrf.mxu0  ;;  %1550 = vmatpush.bf16.msrb.mxu1 %v8578_v13 }
 0x121   : > { %v958_v15 = vadd.f32 %v9785_v18, %v957_v14  ;;  %v8586_v14 = vld [vmem:[#allocation13 + $0x50] sm:$0xff] }
 0x122   : > { %1777 = vmatpush.bf16.msrb.mxu3 %v8586_v14 }
 0x123   : > { %v1021_v16 = vmax.f32 %v958_v15, 0.0 }
 0x125   : > { %v1053_v17 = vpack.c.bf16 %v1021_v16, %v1021_v16  ;;  %v8577_v16 = vld [vmem:[#allocation13 + $0x28] sm:$0xff] }
 0x126   : > { %1551 = vmatpush.bf16.msrb.mxu1 %v8577_v16 }
 0x127   : > { %1086 = vst.msk [vmem:[#allocation2 + $0x2c] sm:$0xf] %vm1074_vm2, %v1053_v17  ;;  %v8585_v17 = vld [vmem:[#allocation13 + $0x48] sm:$0xff] }
 0x128   : > { %v960_v20 = vpop.f32.mrf.mxu0  ;;  %1778 = vmatpush.bf16.msrb.mxu3 %v8585_v17 }
 0x129   : > { %v961_v21 = vadd.f32 %v9785_v18, %v960_v20 }
 0x12b   : > { %v1022_v22 = vmax.f32 %v961_v21, 0.0  ;;  %6637 = vmatmul.msk.bf16.gmra.mxu0 %vm868_vm1, %v8537_v19 }
 0x12d   : > { %v1054_v23 = vpack.c.bf16 %v1022_v22, %v1022_v22  ;;  %v8576_v22 = vld [vmem:[#allocation13 + $0x20] sm:$0xff] }
 0x12e   : > { %v8549_v24 = vld [vmem:[#allocation2 + $0x28] sm:$0xff]  ;;  %1552 = vmatpush.bf16.msrb.mxu1 %v8576_v22 }
 0x12f   : > { %1087 = vst.msk [vmem:[#allocation2 + $0x30] sm:$0xf] %vm1074_vm2, %v1054_v23  ;;  %6672 = vmatmul.msk.bf16.gmra.mxu1 %vm1184_vm3, %v8549_v24  ;;  %v8584_v23 = vld [vmem:[#allocation13 + $0x40] sm:$0xff] }
 0x130   : > { %v962_v27 = vpop.f32.mrf.mxu0  ;;  %1779 = vmatpush.bf16.msrb.mxu3 %v8584_v23 }
 0x131   : > { %v963_v28 = vadd.f32 %v9785_v18, %v962_v27 }
 0x133   : > { %v1023_v29 = vmax.f32 %v963_v28, 0.0 }
 0x135   : > { %v1055_v32 = vpack.c.bf16 %v1023_v29, %v1023_v29 }
 0x137   : > { %1088 = vst.msk [vmem:[#allocation2 + $0x34] sm:$0xf] %vm1074_vm2, %v1055_v32 }
 0x138   : > { %v965_v36 = vpop.f32.mrf.mxu0 }
 0x139   : > { %v966_v37 = vadd.f32 %v9785_v18, %v965_v36 }
 0x13b   : > { %v1024_v38 = vmax.f32 %v966_v37, 0.0  ;;  %6638 = vmatmul.msk.bf16.gmra.mxu0 %vm868_vm1, %v8538_v33 }
 0x13d   : > { %v1056_v41 = vpack.c.bf16 %v1024_v38, %v1024_v38 }
 0x13e   : > { %v8550_v42 = vld [vmem:[#allocation2 + $0x30] sm:$0xff] }
 0x13f   : > { %1089 = vst.msk [vmem:[#allocation2 + $0x38] sm:$0xf] %vm1074_vm2, %v1056_v41  ;;  %6673 = vmatmul.msk.bf16.gmra.mxu1 %vm1184_vm3, %v8550_v42  ;;  %v8581_v41 = vld [vmem:[#allocation2 + $0x8] sm:$0xff] }
 0x140   : > { %v967_v43 = vpop.f32.mrf.mxu0 }
 0x141   : > { %v968_v44 = vadd.f32 %v9785_v18, %v967_v43  ;;  %v1703_v43 = vshll.u32 %v8580_v39, 16 }
 0x143   : > { %v1025_v45 = vmax.f32 %v968_v44, 0.0  ;;  %v1708_v44 = vshll.u32 %v8581_v41, 16 }
 0x145   : > { %v1057_v46 = vpack.c.bf16 %v1025_v45, %v1025_v45 }
 0x147   : > { %1090 = vst.msk [vmem:[#allocation2 + $0x3c] sm:$0xf] %vm1074_vm2, %v1057_v46 }
 0x148   : > { %v970_v47 = vpop.f32.mrf.mxu0 }
 0x149   : > { %v971_v48 = vadd.f32 %v9785_v18, %v970_v47  ;;  %v1705_v47 = vrot.slane %v1703_v43, 1  ;;  %v8623_v43 = vld [vmem:[#allocation16 + $0xb8] sm:$0xff] }
 0x14b   : > { %v1026_v49 = vmax.f32 %v971_v48, 0.0 }
 0x14d   : > { %v1058_v50 = vpack.c.bf16 %v1026_v49, %v1026_v49  ;;  %v1701_v49 = vshrl.u32 %v8580_v39, 16 }
 0x14e   : > { %v8551_v51 = vld [vmem:[#allocation2 + $0x38] sm:$0xff] }
 0x14f   : > { %1091 = vst.msk [vmem:[#allocation2 + $0x40] sm:$0xf] %vm1074_vm2, %v1058_v50  ;;  %6674 = vmatmul.msk.bf16.gmra.mxu1 %vm1184_vm3, %v8551_v51  ;;  %v1710_v50 = vrot.slane %v1708_v44, 1  ;;  %v8593_v44 = vld [vmem:[#allocation16 + $0x8] sm:$0xff] }
 0x150   : > { %v972_v52 = vpop.f32.mrf.mxu0 }
 0x151   : > { %v973_v53 = vadd.f32 %v9785_v18, %v972_v52  ;;  %v1706_v52 = vor.u32 %v1705_v47, %v1701_v49  ;;  %v8592_v47 = vld [vmem:[#allocation16] sm:$0xff]  ;;  %v8621_v49 = vld [vmem:[#allocation16 + $0xa8] sm:$0xff] }
 0x153   : > { %v1027_v54 = vmax.f32 %v973_v53, 0.0 }
 0x155   : > { %v1059_v55 = vpack.c.bf16 %v1027_v54, %v1027_v54  ;;  %v1711_v54 = vsel %vm1699_vm4, %v1706_v52, %v1710_v50 }
 0x157   : > { %1092 = vst.msk [vmem:[#allocation2 + $0x44] sm:$0xf] %vm1074_vm2, %v1059_v55 }
 0x158   : > { %v975_v56 = vpop.f32.mrf.mxu0 }
 0x159   : > { %v976_v57 = vadd.f32 %v9785_v18, %v975_v56 }
 0x15b   : > { %v1028_v58 = vmax.f32 %v976_v57, 0.0 }
 0x15d   : > { %v1060_v59 = vpack.c.bf16 %v1028_v58, %v1028_v58  ;;  %v8582_v58 = vld [vmem:[#allocation2 + $0x10] sm:$0xff] }
 0x15e   : > { %v8556_v60 = vld [vmem:[#allocation2 + $0x40] sm:$0xff]  ;;  %v1720_v16 = vshrl.u32 %v8582_v58, 16 }
 0x15f   : > { %v8564_v61 = vld [vmem:[#allocation2 + $0x40] sm:$0xff]  ;;  %1093 = vst.msk [vmem:[#allocation2 + $0x48] sm:$0xf] %vm1074_vm2, %v1060_v59  ;;  %6743 = vmatmul.msk.bf16.vlgmr.msra.gmra.mxu3 %vm1184_vm3, %v8556_v60  ;;  %v1716_v60 = vshll.u32 %v8582_v58, 16 }
 0x160   : > { %v977_v62 = vpop.f32.mrf.mxu0  ;;  %6815 = vmatmul.msk.bf16.vlgmr.msrb.gmra.mxu2 %vm1184_vm3, %v8564_v61  ;;  %2233 = vmatpush.bf16.msra.mxu3 %v8623_v43  ;;  %v9895_v58 = vld [vmem:[#allocation14] ss:$0 sm:$0xff] }
 0x161   : > { %v978_v63 = vadd.f32 %v9785_v18, %v977_v62 }
 0x163   : > { %v1029_v0 = vmax.f32 %v978_v63, 0.0 }
 0x165   : > { %v1061_v1 = vpack.c.bf16 %v1029_v0, %v1029_v0  ;;  %v1712_v0 = vshrl.u32 %v8581_v41, 16 }
 0x167   : > { %1094 = vst.msk [vmem:[#allocation2 + $0x4c] sm:$0xf] %vm1074_vm2, %v1061_v1  ;;  %v1718_v1 = vrot.slane %v1716_v60, 1 }
 0x168   : > { %v980_v2 = vpop.f32.mrf.mxu0 }
 0x169   : > { %v981_v3 = vadd.f32 %v9785_v18, %v980_v2 }
 0x16b   : > { %v1030_v4 = vmax.f32 %v981_v3, 0.0  ;;  %v1714_v3 = vor.u32 %v1712_v0, %v1710_v50  ;;  %v8620_v50 = vld [vmem:[#allocation16 + $0xa0] sm:$0xff] }
 0x16d   : > { %v1062_v5 = vpack.c.bf16 %v1030_v4, %v1030_v4 }
 0x16e   : > { %v8557_v6 = vld [vmem:[#allocation2 + $0x48] sm:$0xff] }
 0x16f   : > { %v8565_v7 = vld [vmem:[#allocation2 + $0x48] sm:$0xff]  ;;  %1095 = vst.msk [vmem:[#allocation2 + $0x50] sm:$0xf] %vm1074_vm2, %v1062_v5  ;;  %6744 = vmatmul.msk.bf16.gmra.mxu3 %vm1184_vm3, %v8557_v6  ;;  %v1719_v5 = vsel %vm1699_vm4, %v1714_v3, %v1718_v1 }
 0x170   : > { %v982_v10 = vpop.f32.mrf.mxu0  ;;  %6816 = vmatmul.msk.bf16.gmra.mxu2 %vm1184_vm3, %v8565_v7 }
 0x171   : > { %v983_v11 = vadd.f32 %v9785_v18, %v982_v10 }
 0x173   : > { %v1031_v12 = vmax.f32 %v983_v11, 0.0  ;;  %v8599_v11 = vld [vmem:[#allocation16 + $0x38] sm:$0xff] }
 0x174   : > { %2067 = vmatpush.bf16.msra.mxu2 %v8599_v11 }
 0x175   : > { %v1063_v15 = vpack.c.bf16 %v1031_v12, %v1031_v12  ;;  %v1724_v12 = vshll.u32 %v8583_v9, 16 }
 0x177   : > { %1096 = vst.msk [vmem:[#allocation2 + $0x54] sm:$0xf] %vm1074_vm2, %v1063_v15  ;;  %v1726_v17 = vrot.slane %v1724_v12, 1 }
 0x178   : > { %v985_v19 = vpop.f32.mrf.mxu0 }
 0x179   : > { %v986_v20 = vadd.f32 %v9785_v18, %v985_v19  ;;  %v1667_v19 = vld [vmem:[#allocation2 + $0x20] sm:$0x1] }
 0x17b   : > { %v1032_v21 = vmax.f32 %v986_v20, 0.0 }
 0x17d   : > { %v1064_v24 = vpack.c.bf16 %v1032_v21, %v1032_v21  ;;  %v1722_v21 = vor.u32 %v1720_v16, %v1718_v1 }
 0x17e   : > { %v8558_v25 = vld [vmem:[#allocation2 + $0x50] sm:$0xff] }
 0x17f   : > { %v8566_v26 = vld [vmem:[#allocation2 + $0x50] sm:$0xff]  ;;  %1097 = vst.msk [vmem:[#allocation2 + $0x58] sm:$0xf] %vm1074_vm2, %v1064_v24  ;;  %6745 = vmatmul.msk.bf16.gmra.mxu3 %vm1184_vm3, %v8558_v25  ;;  %v1727_v23 = vsel %vm1699_vm4, %v1722_v21, %v1726_v17  ;;  %v1693_v24 = vunpack.c.l.b16 %v1667_v19  ;;  %v8635_v19 = vld [vmem:[#allocation16 + $0x38] sm:$0xff] }
 0x180   : > { %v987_v27 = vpop.f32.mrf.mxu0  ;;  %6817 = vmatmul.msk.bf16.gmra.mxu2 %vm1184_vm3, %v8566_v26  ;;  %v8598_v26 = vld [vmem:[#allocation16 + $0x30] sm:$0xff] }
 0x181   : > { %v988_v28 = vadd.f32 %v9785_v18, %v987_v27  ;;  %2068 = vmatpush.bf16.msra.mxu2 %v8598_v26 }
 0x183   : > { %v1033_v29 = vmax.f32 %v988_v28, 0.0 }
 0x185   : > { %v1065_v30 = vpack.c.bf16 %v1033_v29, %v1033_v29  ;;  %v1698_v29 = vpack.c.b16 %v1693_v24, %v1693_v24  ;;  %v8610_v24 = vld [vmem:[#allocation16 + $0x70] sm:$0xff] }
 0x187   : > { %1098 = vst.msk [vmem:[#allocation2 + $0x5c] sm:$0xf] %vm1074_vm2, %v1065_v30  ;;  %v1291_v30 = vpop.f32.mrf.mxu2 }
 0x188   : > { %v990_v31 = vpop.f32.mrf.mxu0 }
 0x189   : > { %v991_v32 = vadd.f32 %v9785_v18, %v990_v31  ;;  %v8597_v31 = vld [vmem:[#allocation16 + $0x28] sm:$0xff] }
 0x18a   : > { %2069 = vmatpush.bf16.msra.mxu2 %v8597_v31  ;;  %v8633_v31 = vld [vmem:[#allocation16 + $0x28] sm:$0xff] }
 0x18b   : > { %v1034_v33 = vmax.f32 %v991_v32, 0.0 }
 0x18d   : > { %v1066_v34 = vpack.c.bf16 %v1034_v33, %v1034_v33  ;;  %v1732_v33 = vshll.u32 %v1698_v29, 16 }
 0x18e   : > { %v8559_v35 = vld [vmem:[#allocation2 + $0x58] sm:$0xff] }
 0x18f   : > { %v8567_v36 = vld [vmem:[#allocation2 + $0x58] sm:$0xff]  ;;  %1099 = vst.msk [vmem:[#allocation2 + $0x60] sm:$0xf] %vm1074_vm2, %v1066_v34  ;;  %6746 = vmatmul.msk.bf16.gmra.mxu3 %vm1184_vm3, %v8559_v35  ;;  %v8596_v34 = vld [vmem:[#allocation16 + $0x20] sm:$0xff]  ;;  %v1728_v35 = vshrl.u32 %v8583_v9, 16  ;;  %v1293_v39 = vpop.f32.mrf.mxu2 }
 0x190   : > { %v992_v37 = vpop.f32.mrf.mxu0  ;;  %6818 = vmatmul.msk.bf16.gmra.mxu2 %vm1184_vm3, %v8567_v36  ;;  %v1734_v36 = vrot.slane %v1732_v33, 1 }
 0x191   : > { %v993_v38 = vadd.f32 %v9785_v18, %v992_v37  ;;  %2070 = vmatpush.bf16.msra.mxu2 %v8596_v34  ;;  %v8595_v37 = vld [vmem:[#allocation16 + $0x18] sm:$0xff] }
 0x193   : > { %v1035_v40 = vmax.f32 %v993_v38, 0.0  ;;  %v1730_v38 = vor.u32 %v1728_v35, %v1726_v17  ;;  %v8611_v17 = vld [vmem:[#allocation16 + $0x78] sm:$0xff]  ;;  %v8608_v35 = vld [vmem:[#allocation16 + $0x60] sm:$0xff] }
 0x194   : > { %1966 = vmatpush.bf16.msra.mxu1 %v8611_v17 }
 0x195   : > { %v1067_v42 = vpack.c.bf16 %v1035_v40, %v1035_v40  ;;  %2071 = vmatpush.bf16.msra.mxu2 %v8595_v37  ;;  %v1735_v41 = vsel %vm1699_vm4, %v1730_v38, %v1734_v36  ;;  %v8632_v36 = vld [vmem:[#allocation16 + $0x20] sm:$0xff] }
 0x197   : > { %1100 = vst.msk [vmem:[#allocation2 + $0x64] sm:$0xf] %vm1074_vm2, %v1067_v42  ;;  %v8594_v42 = vld [vmem:[#allocation16 + $0x10] sm:$0xff] }
 0x198   : > { %v995_v45 = vpop.f32.mrf.mxu0  ;;  %1967 = vmatpush.bf16.msra.mxu1 %v8610_v24 }
 0x199   : > { %v996_v46 = vadd.f32 %v9785_v18, %v995_v45  ;;  %2072 = vmatpush.bf16.msra.mxu2 %v8594_v42  ;;  %v8622_v45 = vld [vmem:[#allocation16 + $0xb0] sm:$0xff] }
 0x19a   : > { %2234 = vmatpush.bf16.msra.mxu3 %v8622_v45  ;;  %v8607_v45 = vld [vmem:[#allocation16 + $0x58] sm:$0xff] }
 0x19b   : > { %v1036_v48 = vmax.f32 %v996_v46, 0.0  ;;  %v1296_v46 = vpop.f32.mrf.mxu2 }
 0x19d   : > { %v1068_v51 = vpack.c.bf16 %v1036_v48, %v1036_v48  ;;  %2073 = vmatpush.bf16.msra.mxu2 %v8593_v44 }
 0x19e   : > { %v8572_v53 = vld [vmem:[#allocation2 + $0x60] sm:$0xff]  ;;  %2235 = vmatpush.bf16.msra.mxu3 %v8621_v49 }
 0x19f   : > { %1101 = vst.msk [vmem:[#allocation2 + $0x68] sm:$0xf] %vm1074_vm2, %v1068_v51  ;;  %6779 = vmatmul.msk.bf16.vlgmr.msrb.gmra.mxu1 %vm1184_vm3, %v8572_v53  ;;  %6851 = vmatmul.msk.bf16.vlgmr.msrb.gmra.mxu3 %vm1184_vm3, %v1711_v54  ;;  %v8619_v51 = vld [vmem:[#allocation16 + $0x98] sm:$0xff] }
 0x1a0   : > { %v997_v55 = vpop.f32.mrf.mxu0 }
 0x1a1   : > { %v998_v56 = vadd.f32 %v9785_v18, %v997_v55  ;;  %2074 = vmatpush.bf16.msra.mxu2 %v8592_v47  ;;  %v8618_v55 = vld [vmem:[#allocation16 + $0x90] sm:$0xff] }
 0x1a2   : > { %2236 = vmatpush.bf16.msra.mxu3 %v8620_v50 }
 0x1a3   : > { %v1037_v57 = vmax.f32 %v998_v56, 0.0  ;;  %v1298_v52 = vpop.f32.mrf.mxu2 }
 0x1a5   : > { %v1069_v59 = vpack.c.bf16 %v1037_v57, %v1037_v57  ;;  %2567 = vmatpush.bf16.msrb.mxu2 %v8635_v19 }
 0x1a6   : > { %2237 = vmatpush.bf16.msra.mxu3 %v8619_v51 }
 0x1a7   : > { %1102 = vst.msk [vmem:[#allocation2 + $0x6c] sm:$0xf] %vm1074_vm2, %v1069_v59  ;;  %v8617_v59 = vld [vmem:[#allocation16 + $0x88] sm:$0xff] }
 0x1a8   : > { %v1000_v61 = vpop.f32.mrf.mxu0 }
 0x1a9   : > { %v1001_v62 = vadd.f32 %v9785_v18, %v1000_v61 }
 0x1aa   : > { %2238 = vmatpush.bf16.msra.mxu3 %v8618_v55  ;;  %v8630_v55 = vld [vmem:[#allocation16 + $0x10] sm:$0xff] }
 0x1ab   : > { %v1038_v63 = vmax.f32 %v1001_v62, 0.0  ;;  %v1301_v62 = vpop.f32.mrf.mxu2 }
 0x1ad   : > { %v1070_v2 = vpack.c.bf16 %v1038_v63, %v1038_v63 }
 0x1ae   : > { %v8573_v4 = vld [vmem:[#allocation2 + $0x68] sm:$0xff]  ;;  %2239 = vmatpush.bf16.msra.mxu3 %v8617_v59 }
 0x1af   : > { %1103 = vst.msk [vmem:[#allocation2 + $0x70] sm:$0xf] %vm1074_vm2, %v1070_v2  ;;  %6780 = vmatmul.msk.bf16.gmra.mxu1 %vm1184_vm3, %v8573_v4  ;;  %6852 = vmatmul.msk.bf16.gmra.mxu3 %vm1184_vm3, %v1719_v5  ;;  %v8616_v2 = vld [vmem:[#allocation16 + $0x80] sm:$0xff] }
 0x1b0   : > { %v1002_v6 = vpop.f32.mrf.mxu0 }
 0x1b1   : > { %v1003_v7 = vadd.f32 %v9785_v18, %v1002_v6 }
 0x1b2   : > { %2240 = vmatpush.bf16.msra.mxu3 %v8616_v2 }
 0x1b3   : > { %v1039_v8 = vmax.f32 %v1003_v7, 0.0 }
 0x1b5   : > { %v1071_v10 = vpack.c.bf16 %v1039_v8, %v1039_v8  ;;  %v1303_v8 = vpop.f32.mrf.mxu2 }
 0x1b7   : > { %1104 = vst.msk [vmem:[#allocation2 + $0x74] sm:$0xf] %vm1074_vm2, %v1071_v10 }
 0x1b8   : > { %v1005_v13 = vpop.f32.mrf.mxu0 }
 0x1b9   : > { %v1006_v14 = vadd.f32 %v9785_v18, %v1005_v13 }
 0x1bb   : > { %v1040_v15 = vmax.f32 %v1006_v14, 0.0 }
 0x1bd   : > { %v1072_v20 = vpack.c.bf16 %v1040_v15, %v1040_v15  ;;  %v1306_v21 = vpop.f32.mrf.mxu2 }
 0x1be   : > { %v8574_v22 = vld [vmem:[#allocation2 + $0x70] sm:$0xff] }
 0x1bf   : > { %1105 = vst.msk [vmem:[#allocation2 + $0x78] sm:$0xf] %vm1074_vm2, %v1072_v20  ;;  %6781 = vmatmul.msk.bf16.gmra.mxu1 %vm1184_vm3, %v8574_v22  ;;  %6853 = vmatmul.msk.bf16.gmra.mxu3 %vm1184_vm3, %v1727_v23 }
 0x1c0   : > { %v1007_v25 = vpop.f32.mrf.mxu0 }
 0x1c1   : > { %v1008_v27 = vadd.f32 %v9785_v18, %v1007_v25  ;;  %v1206_v18 = vpop.f32.mrf.mxu1  ;;  %v8634_v25 = vld [vmem:[#allocation16 + $0x30] sm:$0xff] }
 0x1c2   : > { %v1292_v56 = vadd.f32 %v1291_v30, %v1206_v18  ;;  %2568 = vmatpush.bf16.msrb.mxu2 %v8634_v25  ;;  %v8609_v30 = vld [vmem:[#allocation16 + $0x68] sm:$0xff] }
 0x1c3   : > { %v1041_v28 = vmax.f32 %v1008_v27, 0.0  ;;  %1968 = vmatpush.bf16.msra.mxu1 %v8609_v30 }
 0x1c5   : > { %v1073_v32 = vpack.c.bf16 %v1041_v28, %v1041_v28  ;;  %v1308_v37 = vpop.f32.mrf.mxu2 }
 0x1c6   : > { %2569 = vmatpush.bf16.msrb.mxu2 %v8633_v31  ;;  %v9907_v31 = vld [vmem:[#allocation14] ss:$0 sm:$0xff] }
 0x1c7   : > { %1106 = vst.msk [vmem:[#allocation2 + $0x7c] sm:$0xf] %vm1074_vm2, %v1073_v32  ;;  %1969 = vmatpush.bf16.msra.mxu1 %v8608_v35 }
 0x1c9   : > { %v1208_v48 = vpop.f32.mrf.mxu1 }
 0x1ca   : > { %v1294_v60 = vadd.f32 %v1293_v39, %v1208_v48  ;;  %2570 = vmatpush.bf16.msrb.mxu2 %v8632_v36 }
 0x1cb   : > { %1970 = vmatpush.bf16.msra.mxu1 %v8607_v45 }
 0x1ce   : > { %v8575_v40 = vld [vmem:[#allocation2 + $0x78] sm:$0xff] }
 0x1cf   : > { %6782 = vmatmul.msk.bf16.gmra.mxu1 %vm1184_vm3, %v8575_v40  ;;  %6854 = vmatmul.msk.bf16.gmra.mxu3 %vm1184_vm3, %v1735_v41 }
 0x1d1   : > { %v1211_v53 = vpop.f32.mrf.mxu1 }
 0x1d2   : > { %v1297_v9 = vadd.f32 %v1296_v46, %v1211_v53  ;;  %v8631_v46 = vld [vmem:[#allocation16 + $0x18] sm:$0xff] }
 0x1d3   : > { %2571 = vmatpush.bf16.msrb.mxu2 %v8631_v46 }
 0x1d7   : > { %2572 = vmatpush.bf16.msrb.mxu2 %v8630_v55 }
 0x1d9   : > { %v1213_v1 = vpop.f32.mrf.mxu1 }
 0x1da   : > { %v1299_v12 = vadd.f32 %v1298_v52, %v1213_v1 }
 0x1e1   : > { %v1216_v10 = vpop.f32.mrf.mxu1 }
 0x1e2   : > { %v1393_v54 = vpop.f32.mrf.mxu3  ;;  %v1302_v32 = vadd.f32 %v1301_v62, %v1216_v10  ;;  %v8605_v62 = vld [vmem:[#allocation16 + $0x48] sm:$0xff] }
 0x1e3   : > { %v1413_v57 = vadd.f32 %v1393_v54, %v1292_v56  ;;  %v8606_v54 = vld [vmem:[#allocation16 + $0x50] sm:$0xff]  ;;  %v1639_v59 = vpop.f32.mrf.mxu2 }
 0x1e4   : > { %1971 = vmatpush.bf16.msra.mxu1 %v8606_v54 }
 0x1e5   : > { %v1425_v63 = vadd.f32 %v9895_v58, %v1413_v57 }
 0x1e7   : > { %v1433_v4 = vmax.f32 %v1425_v63, 0.0  ;;  %v8629_v63 = vld [vmem:[#allocation16 + $0x8] sm:$0xff] }
 0x1e8   : > { %1972 = vmatpush.bf16.msra.mxu1 %v8605_v62  ;;  %2573 = vmatpush.bf16.msrb.mxu2 %v8629_v63 }
 0x1e9   : > { %v1218_v26 = vpop.f32.mrf.mxu1 }
 0x1ea   : > { %v1395_v61 = vpop.f32.mrf.mxu3  ;;  %v1304_v38 = vadd.f32 %v1303_v8, %v1218_v26 }
 0x1eb   : > { %v1414_v0 = vadd.f32 %v1395_v61, %v1294_v60  ;;  %v8659_v61 = vld [vmem:[#allocation16 + $0xb8] sm:$0xff] }
 0x1ec   : > { %2732 = vmatpush.bf16.msrb.mxu3 %v8659_v61 }
 0x1ed   : > { %v1426_v3 = vadd.f32 %v9895_v58, %v1414_v0 }
 0x1ef   : > { %v1434_v5 = vmax.f32 %v1426_v3, 0.0  ;;  %v8658_v3 = vld [vmem:[#allocation16 + $0xb0] sm:$0xff] }
 0x1f0   : > { %2733 = vmatpush.bf16.msrb.mxu3 %v8658_v3 }
 0x1f1   : > { %v8999_v6 = vpack.c.bf16 %v1434_v5, %v1433_v4  ;;  %v1221_v39 = vpop.f32.mrf.mxu1  ;;  %v8604_v4 = vld [vmem:[#allocation16 + $0x40] sm:$0xff] }
 0x1f2   : > { %v1398_v7 = vpop.f32.mrf.mxu3  ;;  %v1307_v1 = vadd.f32 %v1306_v21, %v1221_v39  ;;  %v8628_v5 = vld [vmem:[#allocation16] sm:$0xff]  ;;  %1973 = vmatpush.bf16.msra.mxu1 %v8604_v4 }
 0x1f3   : > { %9000 = vst [vmem:[#allocation3] sm:$0xff] %v8999_v6   ;;  %v1415_v11 = vadd.f32 %v1398_v7, %v1297_v9  ;;  %2574 = vmatpush.bf16.msrb.mxu2 %v8628_v5 }
 0x1f5   : > { %v1427_v15 = vadd.f32 %v9895_v58, %v1415_v11 }
 0x1f7   : > { %v1435_v22 = vmax.f32 %v1427_v15, 0.0 }
 0x1f9   : > { %v1223_v0 = vpop.f32.mrf.mxu1 }
 0x1fa   : > { %v1400_v13 = vpop.f32.mrf.mxu3  ;;  %v8588_v14 = vld [vmem:[#allocation3] sm:$0xff]  ;;  %v1309_v6 = vadd.f32 %v1308_v37, %v1223_v0 }
 0x1fb   : > { %v1416_v16 = vadd.f32 %v1400_v13, %v1299_v12  ;;  %2075 = vmatmul.bf16.vlgmr.msra.gmra.mxu2 %v8588_v14  ;;  %v8612_v29 = vld [vmem:[#allocation3] sm:$0xff]  ;;  %v8657_v12 = vld [vmem:[#allocation16 + $0xa8] sm:$0xff]  ;;  %v1641_v13 = vpop.f32.mrf.mxu2 }
 0x1fc   : > { %v2148_v33 = vshll.u32 %v8612_v29, 16  ;;  %v2146_v47 = vshrl.u32 %v8612_v29, 16  ;;  %2734 = vmatpush.bf16.msrb.mxu3 %v8657_v12 }
 0x1fd   : > { %v1428_v20 = vadd.f32 %v9895_v58, %v1416_v16 }
 0x1fe   : > { %v2150_v42 = vrot.slane %v2148_v33, 1  ;;  %v8699_v33 = vld [vmem:[%s10892_s7 + $0xf4] sm:$0xf0] }
 0x1ff   : > { %v1436_v23 = vmax.f32 %v1428_v20, 0.0 }
 0x200   : > { %v2151_v50 = vor.u32 %v2150_v42, %v2146_v47 }
 0x201   : > { %v9004_v27 = vpack.c.bf16 %v1436_v23, %v1435_v22  ;;  %v8656_v23 = vld [vmem:[#allocation16 + $0xa0] sm:$0xff] }
 0x202   : > { %v1403_v28 = vpop.f32.mrf.mxu3  ;;  %2735 = vmatpush.bf16.msrb.mxu3 %v8656_v23  ;;  %v8697_v23 = vld [vmem:[%s10892_s7 + $0xe4] sm:$0xf0] }
 0x203   : > { %9076 = vst [vmem:[#allocation3 + $0x8] sm:$0xff] %v9004_v27   ;;  %v1417_v34 = vadd.f32 %v1403_v28, %v1302_v32  ;;  %v8655_v27 = vld [vmem:[#allocation16 + $0x98] sm:$0xff]  ;;  %v1644_v30 = vpop.f32.mrf.mxu2  ;;  %v7233_v32 = vld [vmem:[%s10892_s7 + $0xf0] sm:$0xf] }
 0x204   : > { %v7234_v35 = vor.u32 %v8699_v33, %v7233_v32 }
 0x205   : > { %v1429_v43 = vadd.f32 %v9895_v58, %v1417_v34  ;;  %v8654_v34 = vld [vmem:[#allocation16 + $0x90] sm:$0xff] }
 0x206   : > { %2736 = vmatpush.bf16.msrb.mxu3 %v8655_v27  ;;  %2958 = vmatpush.bf16.msrb.mxu0 %v7234_v35 }
 0x207   : > { %v1437_v52 = vmax.f32 %v1429_v43, 0.0 }
 0x20a   : > { %v1405_v40 = vpop.f32.mrf.mxu3  ;;  %v8589_v18 = vld [vmem:[#allocation3 + $0x8] sm:$0xff]  ;;  %2737 = vmatpush.bf16.msrb.mxu3 %v8654_v34 }
 0x20b   : > { %v8613_v41 = vld [vmem:[#allocation3 + $0x8] sm:$0xff]  ;;  %v1418_v44 = vadd.f32 %v1405_v40, %v1304_v38  ;;  %2080 = vmatmul.bf16.gmra.mxu2 %v8589_v18 }
 0x20c   : > { %v2153_v48 = vshll.u32 %v8613_v41, 16  ;;  %v2157_v15 = vshrl.u32 %v8613_v41, 16  ;;  %v8653_v41 = vld [vmem:[#allocation16 + $0x88] sm:$0xff] }
 0x20d   : > { %v1430_v49 = vadd.f32 %v9895_v58, %v1418_v44 }
 0x20e   : > { %v2155_v51 = vrot.slane %v2153_v48, 1  ;;  %2738 = vmatpush.bf16.msrb.mxu3 %v8653_v41 }
 0x20f   : > { %v1438_v53 = vmax.f32 %v1430_v49, 0.0 }
 0x210   : > { %v2156_v56 = vsel %vm1699_vm4, %v2151_v50, %v2155_v51  ;;  %v2159_v19 = vor.u32 %v2157_v15, %v2155_v51  ;;  %v8652_v50 = vld [vmem:[#allocation16 + $0x80] sm:$0xff]  ;;  %v1646_v51 = vpop.f32.mrf.mxu2  ;;  %v8646_v15 = vld [vmem:[#allocation16 + $0x70] sm:$0xff] }
 0x211   : > { %v9009_v57 = vpack.c.bf16 %v1438_v53, %v1437_v52  ;;  %2241 = vmatmul.bf16.vlgmr.msra.gmra.mxu3 %v2156_v56 }
 0x212   : > { %v1408_v60 = vpop.f32.mrf.mxu3  ;;  %2739 = vmatpush.bf16.msrb.mxu3 %v8652_v50 }
 0x213   : > { %9077 = vst [vmem:[#allocation3 + $0x10] sm:$0xff] %v9009_v57   ;;  %v1419_v2 = vadd.f32 %v1408_v60, %v1307_v1 }
 0x215   : > { %v1431_v10 = vadd.f32 %v9895_v58, %v1419_v2 }
 0x217   : > { %v1439_v21 = vmax.f32 %v1431_v10, 0.0 }
 0x218   : > { %v1649_v60 = vpop.f32.mrf.mxu2 }
 0x21a   : > { %v1410_v7 = vpop.f32.mrf.mxu3  ;;  %v8590_v8 = vld [vmem:[#allocation3 + $0x10] sm:$0xff] }
 0x21b   : > { %v8614_v9 = vld [vmem:[#allocation3 + $0x10] sm:$0xff]  ;;  %v1420_v11 = vadd.f32 %v1410_v7, %v1309_v6  ;;  %2085 = vmatmul.bf16.gmra.mxu2 %v8590_v8  ;;  %v8647_v7 = vld [vmem:[#allocation16 + $0x78] sm:$0xff] }
 0x21c   : > { %v1554_v14 = vpop.f32.mrf.mxu1  ;;  %v2161_v16 = vshll.u32 %v8614_v9, 16  ;;  %v2165_v43 = vshrl.u32 %v8614_v9, 16  ;;  %2466 = vmatpush.bf16.msrb.mxu1 %v8647_v7 }
 0x21d   : > { %v1432_v17 = vadd.f32 %v9895_v58, %v1420_v11  ;;  %v1640_v29 = vadd.f32 %v1639_v59, %v1554_v14 }
 0x21e   : > { %v2163_v20 = vrot.slane %v2161_v16, 1 }
 0x21f   : > { %v1440_v22 = vmax.f32 %v1432_v17, 0.0 }
 0x220   : > { %v2164_v24 = vsel %vm1699_vm4, %v2159_v19, %v2163_v20  ;;  %v2167_v46 = vor.u32 %v2165_v43, %v2163_v20  ;;  %2467 = vmatpush.bf16.msrb.mxu1 %v8646_v15  ;;  %v1651_v19 = vpop.f32.mrf.mxu2 }
 0x221   : > { %v9014_v25 = vpack.c.bf16 %v1440_v22, %v1439_v21  ;;  %2246 = vmatmul.bf16.gmra.mxu3 %v2164_v24  ;;  %v8645_v21 = vld [vmem:[#allocation16 + $0x68] sm:$0xff]  ;;  %v7225_v22 = vld [vmem:[%s10892_s7 + $0xe0] sm:$0xf]  ;;  %v9556_v24 = vmov 0  }
 0x222   : > { %v1781_v26 = vpop.f32.mrf.mxu3  ;;  %738 = vst [vmem:[#allocation5 + $0x40] sm:$0xff] %v9556_v24  ;;  %v7226_v27 = vor.u32 %v8697_v23, %v7225_v22 }
 0x223   : > { %9078 = vst [vmem:[#allocation3 + $0x18] sm:$0xff] %v9014_v25   ;;  %v1801_v58 = vadd.f32 %v1781_v26, %v1640_v29  ;;  %v8644_v29 = vld [vmem:[#allocation16 + $0x60] sm:$0xff] }
 0x224   : > { %v1556_v28 = vpop.f32.mrf.mxu1  ;;  %737 = vst [vmem:[#allocation3 + $0x40] sm:$0xf] %v9556_v24  ;;  %2468 = vmatpush.bf16.msrb.mxu1 %v8645_v21  ;;  %2959 = vmatpush.bf16.msrb.mxu0 %v7226_v27  ;;  %v8637_v21 = vld [vmem:[#allocation3 + $0x8] sm:$0xff] }
 0x225   : > { %v1642_v36 = vadd.f32 %v1641_v13, %v1556_v28  ;;  %v1813_v40 = vadd.f32 %v9907_v31, %v1801_v58  ;;  %739 = vst [vmem:[#allocation6 + $0x40] sm:$0xff] %v9556_v24 }
 0x227   : > { %v1821_v48 = vmax.f32 %v1813_v40, 0.0  ;;  %v8643_v40 = vld [vmem:[#allocation16 + $0x58] sm:$0xff] }
 0x228   : > { %2469 = vmatpush.bf16.msrb.mxu1 %v8644_v29 }
 0x22a   : > { %v1783_v37 = vpop.f32.mrf.mxu3  ;;  %v8591_v38 = vld [vmem:[#allocation3 + $0x18] sm:$0xff] }
 0x22b   : > { %v8615_v39 = vld [vmem:[#allocation3 + $0x18] sm:$0xff]  ;;  %v1802_v18 = vadd.f32 %v1783_v37, %v1642_v36  ;;  %2090 = vmatmul.bf16.gmra.mxu2 %v8591_v38  ;;  %v2604_v22 = vld [vmem:[#allocation3 + $0x40] sm:$0x1] }
 0x22c   : > { %v1559_v42 = vpop.f32.mrf.mxu1  ;;  %v2169_v44 = vshll.u32 %v8615_v39, 16  ;;  %v2173_v10 = vshrl.u32 %v8615_v39, 16  ;;  %2470 = vmatpush.bf16.msrb.mxu1 %v8643_v40  ;;  %v2638_v27 = vunpack.c.l.b16 %v2604_v22  ;;  %v8671_v22 = vld [vmem:[%s10892_s7 + $0x34] sm:$0xf0] }
 0x22d   : > { %v1814_v45 = vadd.f32 %v9907_v31, %v1802_v18  ;;  %v1645_v56 = vadd.f32 %v1644_v30, %v1559_v42  ;;  %v1654_v42 = vpop.f32.mrf.mxu2 }
 0x22e   : > { %v2171_v47 = vrot.slane %v2169_v44, 1 }
 0x22f   : > { %v1822_v49 = vmax.f32 %v1814_v45, 0.0 }
 0x230   : > { %v2172_v52 = vsel %vm1699_vm4, %v2167_v46, %v2171_v47  ;;  %v2175_v13 = vor.u32 %v2173_v10, %v2171_v47  ;;  %v8642_v47 = vld [vmem:[#allocation16 + $0x50] sm:$0xff] }
 0x231   : > { %v9019_v53 = vpack.c.bf16 %v1822_v49, %v1821_v48  ;;  %2251 = vmatmul.bf16.gmra.mxu3 %v2172_v52  ;;  %2471 = vmatpush.bf16.msrb.mxu1 %v8642_v47  ;;  %v8641_v52 = vld [vmem:[#allocation16 + $0x48] sm:$0xff]  ;;  %v8639_v47 = vld [vmem:[#allocation3 + $0x18] sm:$0xff] }
 0x232   : > { %v1786_v54 = vpop.f32.mrf.mxu3 }
 0x233   : > { %9079 = vst [vmem:[#allocation3 + $0x20] sm:$0xff] %v9019_v53   ;;  %v1803_v57 = vadd.f32 %v1786_v54, %v1645_v56  ;;  %v8640_v56 = vld [vmem:[#allocation16 + $0x40] sm:$0xff] }
 0x234   : > { %v1561_v55 = vpop.f32.mrf.mxu1 }
 0x235   : > { %v1647_v59 = vadd.f32 %v1646_v51, %v1561_v55  ;;  %v1815_v1 = vadd.f32 %v9907_v31, %v1803_v57  ;;  %2472 = vmatpush.bf16.msrb.mxu1 %v8641_v52  ;;  %v1656_v57 = vpop.f32.mrf.mxu2 }
 0x237   : > { %v1823_v8 = vmax.f32 %v1815_v1, 0.0 }
 0x239   : > { %2473 = vmatpush.bf16.msrb.mxu1 %v8640_v56 }
 0x23a   : > { %v1788_v61 = vpop.f32.mrf.mxu3  ;;  %v8600_v62 = vld [vmem:[#allocation3 + $0x20] sm:$0xff] }
 0x23b   : > { %v8624_v63 = vld [vmem:[#allocation3 + $0x20] sm:$0xff]  ;;  %v1804_v2 = vadd.f32 %v1788_v61, %v1647_v59  ;;  %1974 = vmatmul.bf16.vlgmr.msra.gmra.mxu1 %v8600_v62 }
 0x23c   : > { %v2104_v0 = vld [vmem:[#allocation3 + $0x20] sm:$0x1]  ;;  %v1564_v4 = vpop.f32.mrf.mxu1  ;;  %2575 = vmatmul.bf16.vlgmr.msrb.gmra.mxu2 %v8624_v63 }
 0x23d   : > { %v2139_v3 = vunpack.c.l.b16 %v2104_v0  ;;  %v1816_v5 = vadd.f32 %v9907_v31, %v1804_v2  ;;  %v1650_v25 = vadd.f32 %v1649_v60, %v1564_v4  ;;  %v8648_v26 = vld [vmem:[#allocation3 + $0x20] sm:$0xff] }
 0x23e   : > { %v2647_v58 = vshll.u32 %v8648_v26, 16  ;;  %v2645_v45 = vshrl.u32 %v8648_v26, 16  ;;  %v2386_v26 = vshll.u32 %v8637_v21, 16 }
 0x23f   : > { %v2144_v6 = vpack.c.b16 %v2139_v3, %v2139_v3  ;;  %v1824_v9 = vmax.f32 %v1816_v5, 0.0 }
 0x240   : > { %v2649_v41 = vrot.slane %v2647_v58, 1  ;;  %v2643_v58 = vpack.c.b16 %v2638_v27, %v2638_v27 }
 0x241   : > { %v2177_v11 = vshll.u32 %v2144_v6, 16  ;;  %v9024_v12 = vpack.c.bf16 %v1824_v9, %v1823_v8 }
 0x242   : > { %v1791_v16 = vpop.f32.mrf.mxu3  ;;  %v2650_v49 = vor.u32 %v2649_v41, %v2645_v45 }
 0x243   : > { %v2179_v14 = vrot.slane %v2177_v11, 1  ;;  %9080 = vst [vmem:[#allocation3 + $0x28] sm:$0xff] %v9024_v12   ;;  %v1805_v28 = vadd.f32 %v1791_v16, %v1650_v25  ;;  %v7217_v11 = vld [vmem:[%s10892_s7 + $0xd0] sm:$0xf]  ;;  %v8695_v12 = vld [vmem:[%s10892_s7 + $0xd4] sm:$0xf0] }
 0x244   : > { %v1566_v20 = vpop.f32.mrf.mxu1 }
 0x245   : > { %v2180_v17 = vsel %vm1699_vm4, %v2175_v13, %v2179_v14  ;;  %v1652_v30 = vadd.f32 %v1651_v19, %v1566_v20  ;;  %v1817_v36 = vadd.f32 %v9907_v31, %v1805_v28  ;;  %v7218_v13 = vor.u32 %v8695_v12, %v7217_v11 }
 0x246   : > { %2256 = vmatmul.bf16.gmra.mxu3 %v2180_v17  ;;  %v8636_v17 = vld [vmem:[#allocation3] sm:$0xff] }
 0x247   : > { %v1825_v43 = vmax.f32 %v1817_v36, 0.0  ;;  %2960 = vmatpush.bf16.msrb.mxu0 %v7218_v13  ;;  %v2381_v24 = vshll.u32 %v8636_v17, 16  ;;  %v2379_v29 = vshrl.u32 %v8636_v17, 16  ;;  %v7289_v13 = vld [vmem:[%s10892_s7 + $0x40] sm:$0xf] }
 0x249   : > { %v2383_v28 = vrot.slane %v2381_v24, 1 }
 0x24a   : > { %v1793_v32 = vpop.f32.mrf.mxu3  ;;  %v8601_v33 = vld [vmem:[#allocation3 + $0x28] sm:$0xff] }
 0x24b   : > { %v8625_v34 = vld [vmem:[#allocation3 + $0x28] sm:$0xff]  ;;  %v1806_v37 = vadd.f32 %v1793_v32, %v1652_v30  ;;  %1979 = vmatmul.bf16.gmra.mxu1 %v8601_v33  ;;  %v2388_v30 = vrot.slane %v2386_v26, 1  ;;  %v2384_v32 = vor.u32 %v2383_v28, %v2379_v29  ;;  %v2406_v26 = vshrl.u32 %v8639_v47, 16 }
 0x24c   : > { %v8649_v35 = vld [vmem:[#allocation3 + $0x28] sm:$0xff]  ;;  %v1569_v38 = vpop.f32.mrf.mxu1  ;;  %2580 = vmatmul.bf16.gmra.mxu2 %v8625_v34  ;;  %v2676_v34 = vshll.u32 %v2643_v58, 16  ;;  %v7273_v58 = vld [vmem:[%s10892_s7 + $0x20] sm:$0xf] }
 0x24d   : > { %v2652_v39 = vshll.u32 %v8649_v35, 16  ;;  %v1818_v18 = vadd.f32 %v9907_v31, %v1806_v37  ;;  %v1655_v53 = vadd.f32 %v1654_v42, %v1569_v38  ;;  %v2656_v6 = vshrl.u32 %v8649_v35, 16  ;;  %v8638_v38 = vld [vmem:[#allocation3 + $0x10] sm:$0xff]  ;;  %v7209_v42 = vld [vmem:[%s10892_s7 + $0xc0] sm:$0xf] }
 0x24e   : > { %v2389_v33 = vsel %vm1699_vm4, %v2384_v32, %v2388_v30  ;;  %v2678_v37 = vrot.slane %v2676_v34, 1  ;;  %v2394_v40 = vshll.u32 %v8638_v38, 16  ;;  %v8669_v32 = vld [vmem:[%s10892_s7 + $0x24] sm:$0xf0] }
 0x24f   : > { %v1826_v44 = vmax.f32 %v1818_v18, 0.0  ;;  %v2654_v46 = vrot.slane %v2652_v39, 1  ;;  %v2390_v18 = vshrl.u32 %v8637_v21, 16  ;;  %v7281_v21 = vld [vmem:[%s10892_s7 + $0x30] sm:$0xf]  ;;  %v7274_v34 = vor.u32 %v8669_v32, %v7273_v58 }
 0x250   : > { %v2396_v41 = vrot.slane %v2394_v40, 1  ;;  %v7282_v24 = vor.u32 %v8671_v22, %v7281_v21  ;;  %v7235_v21 = vld [vmem:[%s10892_s7 + $0xf8] sm:$0xf0] }
 0x251   : > { %v9029_v48 = vpack.c.bf16 %v1826_v44, %v1825_v43  ;;  %v2655_v51 = vsel %vm1699_vm4, %v2650_v49, %v2654_v46  ;;  %v2658_v9 = vor.u32 %v2656_v6, %v2654_v46  ;;  %v8693_v43 = vld [vmem:[%s10892_s7 + $0xc4] sm:$0xf0]  ;;  %v2392_v45 = vor.u32 %v2390_v18, %v2388_v30  ;;  %v7313_v49 = vld [vmem:[%s10892_s7 + $0x70] sm:$0xf]  ;;  %v8675_v6 = vld [vmem:[%s10892_s7 + $0x54] sm:$0xf0] }
 0x252   : > { %v1796_v50 = vpop.f32.mrf.mxu3  ;;  %v7210_v44 = vor.u32 %v8693_v43, %v7209_v42  ;;  %v7265_v18 = vld [vmem:[%s10892_s7 + $0x10] sm:$0xf]  ;;  %v8666_v42 = vld [vmem:[%s10892_s7 + $0x14] sm:$0xf] }
 0x253   : > { %9081 = vst [vmem:[#allocation3 + $0x30] sm:$0xff] %v9029_v48   ;;  %v1807_v55 = vadd.f32 %v1796_v50, %v1655_v53  ;;  %v2397_v46 = vsel %vm1699_vm4, %v2392_v45, %v2396_v41  ;;  %v2402_v48 = vshll.u32 %v8639_v47, 16  ;;  %v8679_v50 = vld [vmem:[%s10892_s7 + $0x74] sm:$0xf0]  ;;  %v7315_v53 = vld [vmem:[%s10892_s7 + $0x78] sm:$0xf0] }
 0x254   : > { %v1571_v54 = vpop.f32.mrf.mxu1  ;;  %2961 = vmatpush.bf16.msrb.mxu0 %v7210_v44  ;;  %v7314_v52 = vor.u32 %v8679_v50, %v7313_v49  ;;  %v7267_v44 = vld [vmem:[%s10892_s7 + $0x18] sm:$0xf0]  ;;  %v7257_v47 = vld [vmem:[%s10892_s7] sm:$0xf]  ;;  %v8664_v49 = vld [vmem:[%s10892_s7 + $0x4] sm:$0xf] }
 0x255   : > { %v1657_v59 = vadd.f32 %v1656_v57, %v1571_v54  ;;  %v1819_v0 = vadd.f32 %v9907_v31, %v1807_v55  ;;  %v2398_v54 = vshrl.u32 %v8638_v38, 16  ;;  %v2404_v55 = vrot.slane %v2402_v48, 1  ;;  %v2338_v57 = vld [vmem:[#allocation3 + $0x20] sm:$0x1]  ;;  %v7201_v38 = vld [vmem:[%s10892_s7 + $0xb0] sm:$0xf] }
 0x256   : > { %2740 = vmatmul.bf16.vlgmr.msrb.gmra.mxu3 %v2655_v51  ;;  %v8678_v51 = vld [vmem:[%s10892_s7 + $0x74] sm:$0xf]  ;;  %3120 = vmatpush.bf16.msra.mxu2 %v7314_v52  ;;  %v8665_v48 = vld [vmem:[%s10892_s7 + $0x4] sm:$0xf0] }
 0x257   : > { %v1827_v4 = vmax.f32 %v1819_v0, 0.0  ;;  %v7318_v56 = vor.u32 %v8678_v51, %v7315_v53  ;;  %v7307_v0 = vld [vmem:[%s10892_s7 + $0x68] sm:$0xf0]  ;;  %v2408_v30 = vor.u32 %v2406_v26, %v2404_v55  ;;  %v7258_v50 = vor.u32 %v8665_v48, %v7257_v47  ;;  %v8690_v47 = vld [vmem:[%s10892_s7 + $0xb4] sm:$0xf] }
 0x258   : > { %v7259_v51 = vld [vmem:[%s10892_s7 + $0x8] sm:$0xf0]  ;;  %v7203_v48 = vld [vmem:[%s10892_s7 + $0xb8] sm:$0xf0] }
 0x259   : > { %3149 = vmatpush.bf16.msra.mxu3 %v7318_v56  ;;  %v7262_v53 = vor.u32 %v8664_v49, %v7259_v51 }
 0x25a   : > { %v1798_v60 = vpop.f32.mrf.mxu3  ;;  %v8602_v61 = vld [vmem:[#allocation3 + $0x30] sm:$0xff] }
 0x25b   : > { %v8626_v62 = vld [vmem:[#allocation3 + $0x30] sm:$0xff]  ;;  %v1808_v1 = vadd.f32 %v1798_v60, %v1657_v59  ;;  %1984 = vmatmul.bf16.gmra.mxu1 %v8602_v61  ;;  %v2400_v59 = vor.u32 %v2398_v54, %v2396_v41  ;;  %v7305_v60 = vld [vmem:[%s10892_s7 + $0x60] sm:$0xf]  ;;  %v8677_v61 = vld [vmem:[%s10892_s7 + $0x64] sm:$0xf0] }
 0x25c   : > { %v8650_v63 = vld [vmem:[#allocation3 + $0x30] sm:$0xff]  ;;  %2585 = vmatmul.bf16.gmra.mxu2 %v8626_v62  ;;  %v8676_v62 = vld [vmem:[%s10892_s7 + $0x64] sm:$0xf]  ;;  %v8667_v41 = vld [vmem:[%s10892_s7 + $0x14] sm:$0xf0] }
 0x25d   : > { %v2660_v2 = vshll.u32 %v8650_v63, 16  ;;  %v1820_v3 = vadd.f32 %v9907_v31, %v1808_v1  ;;  %v2664_v19 = vshrl.u32 %v8650_v63, 16  ;;  %v7306_v63 = vor.u32 %v8677_v61, %v7305_v60  ;;  %v10059_v60 = vld [vmem:[#allocation17] ss:$0 sm:$0xff] }
 0x25e   : > { %v7266_v43 = vor.u32 %v8667_v41, %v7265_v18  ;;  %v7211_v18 = vld [vmem:[%s10892_s7 + $0xc8] sm:$0xf0] }
 0x25f   : > { %v1828_v5 = vmax.f32 %v1820_v3, 0.0  ;;  %v2662_v7 = vrot.slane %v2660_v2, 1  ;;  %v2405_v2 = vsel %vm1699_vm4, %v2400_v59, %v2404_v55  ;;  %v2372_v3 = vunpack.c.l.b16 %v2338_v57  ;;  %3121 = vmatpush.bf16.msra.mxu2 %v7306_v63 }
 0x261   : > { %v9034_v8 = vpack.c.bf16 %v1828_v5, %v1827_v4  ;;  %v2663_v10 = vsel %vm1699_vm4, %v2658_v9, %v2662_v7  ;;  %v2666_v23 = vor.u32 %v2664_v19, %v2662_v7  ;;  %v7310_v4 = vor.u32 %v8676_v62, %v7307_v0  ;;  %v7297_v5 = vld [vmem:[%s10892_s7 + $0x50] sm:$0xf]  ;;  %v8674_v7 = vld [vmem:[%s10892_s7 + $0x54] sm:$0xf]  ;;  %v7299_v9 = vld [vmem:[%s10892_s7 + $0x58] sm:$0xf0] }
 0x262   : > { %v2377_v11 = vpack.c.b16 %v2372_v3, %v2372_v3  ;;  %v7302_v12 = vor.u32 %v8674_v7, %v7299_v9  ;;  %v7193_v9 = vld [vmem:[%s10892_s7 + $0xa0] sm:$0xf] }
 0x263   : > { %9082 = vst [vmem:[#allocation3 + $0x38] sm:$0xff] %v9034_v8   ;;  %3150 = vmatpush.bf16.msra.mxu3 %v7310_v4  ;;  %v7298_v8 = vor.u32 %v8675_v6, %v7297_v5 }
 0x264   : > { %v2410_v17 = vshll.u32 %v2377_v11, 16 }
 0x265   : > { %3122 = vmatpush.bf16.msra.mxu2 %v7298_v8 }
 0x266   : > { %2745 = vmatmul.bf16.gmra.mxu3 %v2663_v10  ;;  %v2412_v27 = vrot.slane %v2410_v17, 1 }
 0x267   : > { %3151 = vmatpush.bf16.msra.mxu3 %v7302_v12 }
 0x26a   : > { %v8603_v31 = vld [vmem:[#allocation3 + $0x38] sm:$0xff] }
 0x26b   : > { %v8627_v14 = vld [vmem:[#allocation3 + $0x38] sm:$0xff]  ;;  %1989 = vmatmul.bf16.gmra.mxu1 %v8603_v31  ;;  %v8673_v31 = vld [vmem:[%s10892_s7 + $0x44] sm:$0xf0] }
 0x26c   : > { %v8651_v15 = vld [vmem:[#allocation3 + $0x38] sm:$0xff]  ;;  %2590 = vmatmul.bf16.gmra.mxu2 %v8627_v14  ;;  %v8672_v14 = vld [vmem:[%s10892_s7 + $0x44] sm:$0xf] }
 0x26d   : > { %v2668_v16 = vshll.u32 %v8651_v15, 16  ;;  %v2672_v35 = vshrl.u32 %v8651_v15, 16  ;;  %v7290_v15 = vor.u32 %v8673_v31, %v7289_v13 }
 0x26f   : > { %v2670_v20 = vrot.slane %v2668_v16, 1  ;;  %v7291_v16 = vld [vmem:[%s10892_s7 + $0x48] sm:$0xf0]  ;;  %3123 = vmatpush.bf16.msra.mxu2 %v7290_v15 }
 0x270   : > { %v7294_v19 = vor.u32 %v8672_v14, %v7291_v16 }
 0x271   : > { %v2671_v25 = vsel %vm1699_vm4, %v2666_v23, %v2670_v20  ;;  %v2674_v36 = vor.u32 %v2672_v35, %v2670_v20  ;;  %v8670_v23 = vld [vmem:[%s10892_s7 + $0x34] sm:$0xf]  ;;  %v7275_v35 = vld [vmem:[%s10892_s7 + $0x28] sm:$0xf0] }
 0x272   : > { %3152 = vmatpush.bf16.msra.mxu3 %v7294_v19 }
 0x273   : > { %v2679_v39 = vsel %vm1699_vm4, %v2674_v36, %v2678_v37  ;;  %3124 = vmatpush.bf16.msra.mxu2 %v7282_v24  ;;  %v2413_v36 = vsel %vm1699_vm4, %v2408_v30, %v2412_v27  ;;  %v7227_v30 = vld [vmem:[%s10892_s7 + $0xe8] sm:$0xf0] }
 0x276   : > { %2750 = vmatmul.bf16.gmra.mxu3 %v2671_v25  ;;  %v7283_v25 = vld [vmem:[%s10892_s7 + $0x38] sm:$0xf0] }
 0x277   : > { %v7286_v28 = vor.u32 %v8670_v23, %v7283_v25  ;;  %3125 = vmatpush.bf16.msra.mxu2 %v7274_v34  ;;  %v8694_v34 = vld [vmem:[%s10892_s7 + $0xd4] sm:$0xf] }
 0x279   : > { %3153 = vmatpush.bf16.msra.mxu3 %v7286_v28 }
 0x27b   : > { %2474 = vmatmul.bf16.vlgmr.msrb.gmra.mxu1 %v2389_v33  ;;  %v8668_v33 = vld [vmem:[%s10892_s7 + $0x24] sm:$0xf]  ;;  %3126 = vmatpush.bf16.msra.mxu2 %v7266_v43 }
 0x27c   : > { %v7278_v37 = vor.u32 %v8668_v33, %v7275_v35  ;;  %v7219_v35 = vld [vmem:[%s10892_s7 + $0xd8] sm:$0xf0] }
 0x27e   : > { %v9973_v1 = vpop.f32.mrf.mxu2  ;;  %3154 = vmatpush.bf16.msra.mxu3 %v7278_v37 }
 0x27f   : > { %3127 = vmatpush.bf16.msra.mxu2 %v7258_v50  ;;  %v7206_v50 = vor.u32 %v8690_v47, %v7203_v48  ;;  %v7409_v48 = vld [vmem:[%s10892_s7 + $0x170] sm:$0xf] }
 0x286   : > { %2755 = vmatmul.bf16.gmra.mxu3 %v2679_v39  ;;  %v2078_v20 = vpop.f32.mrf.mxu2  ;;  %v8691_v39 = vld [vmem:[%s10892_s7 + $0xb4] sm:$0xf0] }
 0x287   : > { %v7202_v40 = vor.u32 %v8691_v39, %v7201_v38 }
 0x289   : > { %2962 = vmatpush.bf16.msrb.mxu0 %v7202_v40  ;;  %v8692_v40 = vld [vmem:[%s10892_s7 + $0xc4] sm:$0xf] }
 0x28b   : > { %2479 = vmatmul.bf16.gmra.mxu1 %v2397_v46  ;;  %v7270_v46 = vor.u32 %v8666_v42, %v7267_v44  ;;  %v7214_v42 = vor.u32 %v8692_v40, %v7211_v18 }
 0x28d   : > { %3155 = vmatpush.bf16.msra.mxu3 %v7270_v46 }
 0x28e   : > { %v2081_v45 = vpop.f32.mrf.mxu2 }
 0x291   : > { %3156 = vmatpush.bf16.msra.mxu3 %v7262_v53 }
 0x294   : > { %v9988_v10 = vpop.f32.mrf.mxu3 }
 0x296   : > { %v2083_v54 = vpop.f32.mrf.mxu2 }
 0x29b   : > { %2484 = vmatmul.bf16.gmra.mxu1 %v2405_v2 }
 0x29c   : > { %v2244_v29 = vpop.f32.mrf.mxu3 }
 0x29e   : > { %v2086_v63 = vpop.f32.mrf.mxu2 }
 0x2a4   : > { %v2247_v52 = vpop.f32.mrf.mxu3 }
 0x2a6   : > { %v2088_v11 = vpop.f32.mrf.mxu2 }
 0x2ab   : > { %2489 = vmatmul.bf16.gmra.mxu1 %v2413_v36  ;;  %v7222_v36 = vor.u32 %v8694_v34, %v7219_v35 }
 0x2ac   : > { %v2249_v57 = vpop.f32.mrf.mxu3 }
 0x2ae   : > { %v2091_v24 = vpop.f32.mrf.mxu2 }
 0x2b4   : > { %v2252_v4 = vpop.f32.mrf.mxu3 }
 0x2b6   : > { %v2093_v38 = vpop.f32.mrf.mxu2 }
 0x2b8   : > { %v1975_v55 = vpop.f32.mrf.mxu1 }
 0x2b9   : > { %v2077_v56 = vadd.f32 %v9973_v1, %v1975_v55  ;;  %v7195_v55 = vld [vmem:[%s10892_s7 + $0xa8] sm:$0xf0] }
 0x2bb   : > { %v2262_v59 = vadd.f32 %v9988_v10, %v2077_v56  ;;  %v8689_v10 = vld [vmem:[%s10892_s7 + $0xa4] sm:$0xf0] }
 0x2bc   : > { %v7194_v12 = vor.u32 %v8689_v10, %v7193_v9  ;;  %v2254_v31 = vpop.f32.mrf.mxu3  ;;  %v8684_v9 = vld [vmem:[%s10892_s7 + $0x84] sm:$0xf] }
 0x2bd   : > { %v2274_v0 = vadd.f32 %v10059_v60, %v2262_v59 }
 0x2be   : > { %2963 = vmatpush.bf16.msrb.mxu0 %v7194_v12  ;;  %v7179_v12 = vld [vmem:[%s10892_s7 + $0x88] sm:$0xf0] }
 0x2bf   : > { %v2282_v5 = vmax.f32 %v2274_v0, 0.0  ;;  %v2576_v59 = vpop.f32.mrf.mxu2 }
 0x2c0   : > { %v1977_v61 = vpop.f32.mrf.mxu1 }
 0x2c1   : > { %v2079_v62 = vadd.f32 %v2078_v20, %v1977_v61  ;;  %v8698_v20 = vld [vmem:[%s10892_s7 + $0xf4] sm:$0xf] }
 0x2c2   : > { %v7238_v23 = vor.u32 %v8698_v20, %v7235_v21 }
 0x2c3   : > { %v2263_v2 = vadd.f32 %v2244_v29, %v2079_v62  ;;  %v8696_v29 = vld [vmem:[%s10892_s7 + $0xe4] sm:$0xf]  ;;  %v7185_v62 = vld [vmem:[%s10892_s7 + $0x90] sm:$0xf] }
 0x2c4   : > { %2987 = vmatpush.bf16.msra.mxu1 %v7238_v23  ;;  %v7230_v32 = vor.u32 %v8696_v29, %v7227_v30 }
 0x2c5   : > { %v2275_v3 = vadd.f32 %v10059_v60, %v2263_v2 }
 0x2c7   : > { %v2283_v6 = vmax.f32 %v2275_v3, 0.0  ;;  %v8686_v3 = vld [vmem:[%s10892_s7 + $0x94] sm:$0xf] }
 0x2c8   : > { %v1980_v7 = vpop.f32.mrf.mxu1  ;;  %2988 = vmatpush.bf16.msra.mxu1 %v7230_v32 }
 0x2c9   : > { %v9039_v8 = vpack.c.bf16 %v2283_v6, %v2282_v5  ;;  %v2082_v1 = vadd.f32 %v2081_v45, %v1980_v7  ;;  %v2257_v27 = vpop.f32.mrf.mxu3 }
 0x2cb   : > { %9040 = vst [vmem:[#allocation4 + $0x30] sm:$0xff] %v9039_v8   ;;  %v2264_v13 = vadd.f32 %v2247_v52, %v2082_v1  ;;  %v7177_v8 = vld [vmem:[%s10892_s7 + $0x80] sm:$0xf]  ;;  %v8685_v1 = vld [vmem:[%s10892_s7 + $0x84] sm:$0xf0] }
 0x2cc   : > { %2989 = vmatpush.bf16.msra.mxu1 %v7222_v36 }
 0x2cd   : > { %v2276_v17 = vadd.f32 %v10059_v60, %v2264_v13 }
 0x2cf   : > { %v2284_v25 = vmax.f32 %v2276_v17, 0.0 }
 0x2d0   : > { %v1982_v14 = vpop.f32.mrf.mxu1  ;;  %2990 = vmatpush.bf16.msra.mxu1 %v7214_v42 }
 0x2d1   : > { %v2084_v15 = vadd.f32 %v2083_v54, %v1982_v14  ;;  %v2259_v43 = vpop.f32.mrf.mxu3  ;;  %v8688_v54 = vld [vmem:[%s10892_s7 + $0xa4] sm:$0xf] }
 0x2d2   : > { %v8660_v16 = vld [vmem:[#allocation4 + $0x30] sm:$0xff] }
 0x2d3   : > { %v2265_v19 = vadd.f32 %v2249_v57, %v2084_v15  ;;  %3128 = vmatmul.bf16.vlgmr.msra.gmra.mxu2 %v8660_v16  ;;  %3157 = vmatmul.bf16.vlgmr.msra.gmra.mxu3 %v8660_v16  ;;  %v7198_v57 = vor.u32 %v8688_v54, %v7195_v55  ;;  %v2578_v16 = vpop.f32.mrf.mxu2 }
 0x2d4   : > { %2991 = vmatpush.bf16.msra.mxu1 %v7206_v50  ;;  %v8718_v50 = vld [vmem:[%s10892_s7 + $0x174] sm:$0xf] }
 0x2d5   : > { %v2277_v22 = vadd.f32 %v10059_v60, %v2265_v19 }
 0x2d7   : > { %v2285_v26 = vmax.f32 %v2277_v22, 0.0 }
 0x2d8   : > { %v1985_v28 = vpop.f32.mrf.mxu1  ;;  %2992 = vmatpush.bf16.msra.mxu1 %v7198_v57 }
 0x2d9   : > { %v9044_v58 = vpack.c.bf16 %v2285_v26, %v2284_v25  ;;  %v2087_v33 = vadd.f32 %v2086_v63, %v1985_v28  ;;  %v8687_v63 = vld [vmem:[%s10892_s7 + $0x94] sm:$0xf0]  ;;  %v2741_v0 = vpop.f32.mrf.mxu3 }
 0x2da   : > { %v7186_v2 = vor.u32 %v8687_v63, %v7185_v62  ;;  %v8716_v62 = vld [vmem:[%s10892_s7 + $0x164] sm:$0xf] }
 0x2db   : > { %9083 = vst [vmem:[#allocation4] sm:$0xff] %v9044_v58   ;;  %v2266_v37 = vadd.f32 %v2252_v4, %v2087_v33  ;;  %v7187_v4 = vld [vmem:[%s10892_s7 + $0x98] sm:$0xf0]  ;;  %v2581_v25 = vpop.f32.mrf.mxu2 }
 0x2dc   : > { %v7190_v5 = vor.u32 %v8686_v3, %v7187_v4  ;;  %2964 = vmatpush.bf16.msrb.mxu0 %v7186_v2  ;;  %v7403_v2 = vld [vmem:[%s10892_s7 + $0x168] sm:$0xf0] }
 0x2dd   : > { %v2278_v45 = vadd.f32 %v10059_v60, %v2266_v37  ;;  %v7406_v3 = vor.u32 %v8716_v62, %v7403_v2 }
 0x2de   : > { %2993 = vmatpush.bf16.msra.mxu1 %v7190_v5  ;;  %v7393_v5 = vld [vmem:[%s10892_s7 + $0x150] sm:$0xf] }
 0x2df   : > { %v2286_v51 = vmax.f32 %v2278_v45, 0.0 }
 0x2e0   : > { %v1987_v39 = vpop.f32.mrf.mxu1 }
 0x2e1   : > { %v2089_v41 = vadd.f32 %v2088_v11, %v1987_v39  ;;  %v7178_v11 = vor.u32 %v8685_v1, %v7177_v8  ;;  %v2743_v19 = vpop.f32.mrf.mxu3  ;;  %v8714_v1 = vld [vmem:[%s10892_s7 + $0x154] sm:$0xf] }
 0x2e2   : > { %v8661_v44 = vld [vmem:[#allocation4] sm:$0xff] }
 0x2e3   : > { %v2267_v46 = vadd.f32 %v2254_v31, %v2089_v41  ;;  %3133 = vmatmul.bf16.gmra.mxu2 %v8661_v44  ;;  %3162 = vmatmul.bf16.gmra.mxu3 %v8661_v44  ;;  %v7182_v31 = vor.u32 %v8684_v9, %v7179_v12  ;;  %v2583_v36 = vpop.f32.mrf.mxu2  ;;  %v7395_v9 = vld [vmem:[%s10892_s7 + $0x158] sm:$0xf0]  ;;  %v8713_v12 = vld [vmem:[%s10892_s7 + $0x144] sm:$0xf0] }
 0x2e4   : > { %2965 = vmatpush.bf16.msrb.mxu0 %v7178_v11  ;;  %v7398_v11 = vor.u32 %v8714_v1, %v7395_v9 }
 0x2e5   : > { %v2279_v49 = vadd.f32 %v10059_v60, %v2267_v46  ;;  %2994 = vmatpush.bf16.msra.mxu1 %v7182_v31  ;;  %v8712_v31 = vld [vmem:[%s10892_s7 + $0x144] sm:$0xf] }
 0x2e7   : > { %v2287_v52 = vmax.f32 %v2279_v49, 0.0  ;;  %v8719_v49 = vld [vmem:[%s10892_s7 + $0x174] sm:$0xf0] }
 0x2e8   : > { %v1990_v53 = vpop.f32.mrf.mxu1 }
 0x2e9   : > { %v9049_v56 = vpack.c.bf16 %v2287_v52, %v2286_v51  ;;  %v2092_v61 = vadd.f32 %v2091_v24, %v1990_v53  ;;  %v2746_v28 = vpop.f32.mrf.mxu3  ;;  %v7410_v52 = vor.u32 %v8719_v49, %v7409_v48  ;;  %v7411_v53 = vld [vmem:[%s10892_s7 + $0x178] sm:$0xf0]  ;;  %v7353_v48 = vld [vmem:[%s10892_s7 + $0x100] sm:$0xf]  ;;  %v8705_v49 = vld [vmem:[%s10892_s7 + $0x104] sm:$0xf0] }
 0x2ea   : > { %v7414_v54 = vor.u32 %v8718_v50, %v7411_v53 }
 0x2eb   : > { %9084 = vst [vmem:[#allocation4 + $0x18] sm:$0xff] %v9049_v56   ;;  %v2268_v6 = vadd.f32 %v2257_v27, %v2092_v61  ;;  %v10135_v27 = vld [vmem:[#allocation17] ss:$0 sm:$0xff]  ;;  %3347 = vmatpush.bf16.msra.mxu0 %v7410_v52  ;;  %v8717_v61 = vld [vmem:[%s10892_s7 + $0x164] sm:$0xf0] }
 0x2ec   : > { %3376 = vmatpush.bf16.msrb.mxu1 %v7414_v54  ;;  %v7355_v52 = vld [vmem:[%s10892_s7 + $0x108] sm:$0xf0]  ;;  %v7354_v54 = vor.u32 %v8705_v49, %v7353_v48  ;;  %v7497_v49 = vld [vmem:[#allocation19 + $0x170] sm:$0xf] }
 0x2ed   : > { %v2280_v14 = vadd.f32 %v10059_v60, %v2268_v6  ;;  %v8715_v6 = vld [vmem:[%s10892_s7 + $0x154] sm:$0xf0] }
 0x2ee   : > { %v7394_v8 = vor.u32 %v8715_v6, %v7393_v5 }
 0x2ef   : > { %v2288_v20 = vmax.f32 %v2280_v14, 0.0  ;;  %v7387_v14 = vld [vmem:[%s10892_s7 + $0x148] sm:$0xf0] }
 0x2f0   : > { %v1992_v7 = vpop.f32.mrf.mxu1  ;;  %3377 = vmatpush.bf16.msrb.mxu1 %v7406_v3 }
 0x2f1   : > { %v2094_v10 = vadd.f32 %v2093_v38, %v1992_v7  ;;  %v2748_v39 = vpop.f32.mrf.mxu3 }
 0x2f2   : > { %v8662_v13 = vld [vmem:[#allocation4 + $0x18] sm:$0xff] }
 0x2f3   : > { %v2269_v15 = vadd.f32 %v2259_v43, %v2094_v10  ;;  %3138 = vmatmul.bf16.gmra.mxu2 %v8662_v13  ;;  %3167 = vmatmul.bf16.gmra.mxu3 %v8662_v13  ;;  %v2586_v43 = vpop.f32.mrf.mxu2  ;;  %v7385_v10 = vld [vmem:[%s10892_s7 + $0x140] sm:$0xf] }
 0x2f4   : > { %3378 = vmatpush.bf16.msrb.mxu1 %v7398_v11 }
 0x2f5   : > { %v2281_v17 = vadd.f32 %v10059_v60, %v2269_v15 }
 0x2f7   : > { %v2289_v21 = vmax.f32 %v2281_v17, 0.0 }
 0x2f8   : > { %v2475_v22 = vpop.f32.mrf.mxu1 }
 0x2f9   : > { %v9054_v23 = vpack.c.bf16 %v2289_v21, %v2288_v20  ;;  %v2577_v24 = vadd.f32 %v2576_v59, %v2475_v22  ;;  %v2751_v47 = vpop.f32.mrf.mxu3  ;;  %v7401_v59 = vld [vmem:[%s10892_s7 + $0x160] sm:$0xf]  ;;  %v7390_v20 = vor.u32 %v8712_v31, %v7387_v14 }
 0x2fb   : > { %9085 = vst [vmem:[#allocation4 + $0x10] sm:$0xff] %v9054_v23   ;;  %v2761_v26 = vadd.f32 %v2741_v0, %v2577_v24  ;;  %v7402_v0 = vor.u32 %v8717_v61, %v7401_v59  ;;  %v2588_v7 = vpop.f32.mrf.mxu2  ;;  %v7377_v24 = vld [vmem:[%s10892_s7 + $0x130] sm:$0xf]  ;;  %3379 = vmatpush.bf16.msrb.mxu1 %v7390_v20 }
 0x2fd   : > { %v2773_v32 = vadd.f32 %v10135_v27, %v2761_v26  ;;  %3348 = vmatpush.bf16.msra.mxu0 %v7402_v0  ;;  %v8710_v26 = vld [vmem:[%s10892_s7 + $0x134] sm:$0xf] }
 0x2ff   : > { %v2781_v34 = vmax.f32 %v2773_v32, 0.0  ;;  %v8709_v32 = vld [vmem:[%s10892_s7 + $0x124] sm:$0xf0] }
 0x300   : > { %v2477_v29 = vpop.f32.mrf.mxu1 }
 0x301   : > { %v2579_v30 = vadd.f32 %v2578_v16, %v2477_v29  ;;  %v2753_v13 = vpop.f32.mrf.mxu3  ;;  %3349 = vmatpush.bf16.msra.mxu0 %v7394_v8  ;;  %v7386_v16 = vor.u32 %v8713_v12, %v7385_v10  ;;  %v8701_v8 = vld [vmem:[#allocation4] sm:$0xff] }
 0x302   : > { %v8663_v58 = vld [vmem:[#allocation4 + $0x10] sm:$0xff]  ;;  %v3235_v9 = vshll.u32 %v8701_v8, 16 }
 0x303   : > { %v2762_v33 = vadd.f32 %v2743_v19, %v2579_v30  ;;  %3143 = vmatmul.bf16.gmra.mxu2 %v8663_v58  ;;  %3172 = vmatmul.bf16.gmra.mxu3 %v8663_v58  ;;  %v7379_v30 = vld [vmem:[%s10892_s7 + $0x138] sm:$0xf0]  ;;  %v7369_v58 = vld [vmem:[%s10892_s7 + $0x120] sm:$0xf]  ;;  %v8703_v20 = vld [vmem:[#allocation4 + $0x10] sm:$0xff] }
 0x304   : > { %v3237_v12 = vrot.slane %v3235_v9, 1  ;;  %v7555_v9 = vld [vmem:[#allocation19 + $0x1e8] sm:$0xf0] }
 0x305   : > { %v2774_v60 = vadd.f32 %v10135_v27, %v2762_v33  ;;  %3350 = vmatpush.bf16.msra.mxu0 %v7386_v16  ;;  %v2591_v33 = vpop.f32.mrf.mxu2 }
 0x307   : > { %v2782_v35 = vmax.f32 %v2774_v60, 0.0  ;;  %v7382_v60 = vor.u32 %v8710_v26, %v7379_v30 }
 0x308   : > { %v2480_v37 = vpop.f32.mrf.mxu1 }
 0x309   : > { %v9059_v38 = vpack.c.bf16 %v2782_v35, %v2781_v34  ;;  %v2582_v40 = vadd.f32 %v2581_v25, %v2480_v37  ;;  %v8711_v25 = vld [vmem:[%s10892_s7 + $0x134] sm:$0xf0]  ;;  %v8708_v34 = vld [vmem:[%s10892_s7 + $0x124] sm:$0xf]  ;;  %v7371_v35 = vld [vmem:[%s10892_s7 + $0x128] sm:$0xf0]  ;;  %3380 = vmatpush.bf16.msrb.mxu1 %v7382_v60 }
 0x30a   : > { %v7378_v29 = vor.u32 %v8711_v25, %v7377_v24 }
 0x30b   : > { %9086 = vst [vmem:[#allocation4 + $0x8] sm:$0xff] %v9059_v38   ;;  %v2763_v18 = vadd.f32 %v2746_v28, %v2582_v40  ;;  %v7370_v38 = vor.u32 %v8709_v32, %v7369_v58  ;;  %v3255_v58 = vshrl.u32 %v8703_v20, 16 }
 0x30c   : > { %3351 = vmatpush.bf16.msra.mxu0 %v7378_v29 }
 0x30d   : > { %v2775_v45 = vadd.f32 %v10135_v27, %v2763_v18  ;;  %v7361_v18 = vld [vmem:[%s10892_s7 + $0x110] sm:$0xf] }
 0x30f   : > { %v2783_v55 = vmax.f32 %v2775_v45, 0.0  ;;  %v7363_v45 = vld [vmem:[%s10892_s7 + $0x118] sm:$0xf0] }
 0x310   : > { %v2482_v41 = vpop.f32.mrf.mxu1  ;;  %3352 = vmatpush.bf16.msra.mxu0 %v7370_v38 }
 0x311   : > { %v2584_v42 = vadd.f32 %v2583_v36, %v2482_v41  ;;  %v8707_v41 = vld [vmem:[%s10892_s7 + $0x114] sm:$0xf0] }
 0x312   : > { %v8680_v44 = vld [vmem:[#allocation4 + $0x8] sm:$0xff] }
 0x313   : > { %v2764_v46 = vadd.f32 %v2748_v39, %v2584_v42  ;;  %2966 = vmatmul.bf16.vlgmr.msrb.gmra.mxu0 %v8680_v44  ;;  %2995 = vmatmul.bf16.vlgmr.msra.gmra.mxu1 %v8680_v44  ;;  %v2756_v39 = vpop.f32.mrf.mxu3  ;;  %v8706_v44 = vld [vmem:[%s10892_s7 + $0x114] sm:$0xf]  ;;  %v3186_v24 = vld [vmem:[#allocation4 + $0x8] sm:$0x1] }
 0x314   : > { %v7366_v50 = vor.u32 %v8706_v44, %v7363_v45 }
 0x315   : > { %v2776_v51 = vadd.f32 %v10135_v27, %v2764_v46 }
 0x317   : > { %v2784_v56 = vmax.f32 %v2776_v51, 0.0  ;;  %v8704_v51 = vld [vmem:[%s10892_s7 + $0x104] sm:$0xf] }
 0x318   : > { %v2485_v57 = vpop.f32.mrf.mxu1  ;;  %v7358_v59 = vor.u32 %v8704_v51, %v7355_v52  ;;  %v7561_v51 = vld [vmem:[#allocation19 + $0x1f0] sm:$0xf] }
 0x319   : > { %v9064_v63 = vpack.c.bf16 %v2784_v56, %v2783_v55  ;;  %v2587_v4 = vadd.f32 %v2586_v43, %v2485_v57  ;;  %v7374_v43 = vor.u32 %v8708_v34, %v7371_v35  ;;  %v2593_v55 = vpop.f32.mrf.mxu2 }
 0x31b   : > { %9087 = vst [vmem:[#allocation4 + $0x20] sm:$0xff] %v9064_v63   ;;  %v2765_v15 = vadd.f32 %v2751_v47, %v2587_v4  ;;  %v7362_v47 = vor.u32 %v8707_v41, %v7361_v18  ;;  %3381 = vmatpush.bf16.msrb.mxu1 %v7374_v43  ;;  %v2758_v61 = vpop.f32.mrf.mxu3 }
 0x31d   : > { %v2777_v22 = vadd.f32 %v10135_v27, %v2765_v15  ;;  %3353 = vmatpush.bf16.msra.mxu0 %v7362_v47  ;;  %v3239_v15 = vshrl.u32 %v8701_v8, 16 }
 0x31f   : > { %v2785_v36 = vmax.f32 %v2777_v22, 0.0  ;;  %3382 = vmatpush.bf16.msrb.mxu1 %v7366_v50  ;;  %v8781_v50 = vld [vmem:[#allocation19 + $0x174] sm:$0xf0] }
 0x320   : > { %v2487_v17 = vpop.f32.mrf.mxu1  ;;  %v7498_v52 = vor.u32 %v8781_v50, %v7497_v49 }
 0x321   : > { %v2589_v19 = vadd.f32 %v2588_v7, %v2487_v17  ;;  %3354 = vmatpush.bf16.msra.mxu0 %v7354_v54  ;;  %v8700_v7 = vld [vmem:[#allocation4 + $0x30] sm:$0xff]  ;;  %v3241_v17 = vor.u32 %v3239_v15, %v3237_v12 }
 0x322   : > { %v8681_v21 = vld [vmem:[#allocation4 + $0x20] sm:$0xff]  ;;  %v3230_v1 = vshll.u32 %v8700_v7, 16  ;;  %v3228_v11 = vshrl.u32 %v8700_v7, 16  ;;  %v8780_v54 = vld [vmem:[#allocation19 + $0x174] sm:$0xf]  ;;  %3834 = vmatpush.bf16.msrb.mxu2 %v7498_v52 }
 0x323   : > { %v2766_v23 = vadd.f32 %v2753_v13, %v2589_v19  ;;  %2971 = vmatmul.bf16.gmra.mxu0 %v8681_v21  ;;  %3000 = vmatmul.bf16.gmra.mxu1 %v8681_v21  ;;  %v3251_v21 = vshll.u32 %v8703_v20, 16  ;;  %v7483_v20 = vld [vmem:[#allocation19 + $0x158] sm:$0xf0]  ;;  %v8790_v52 = vld [vmem:[#allocation19 + $0x1c4] sm:$0xf] }
 0x324   : > { %3383 = vmatpush.bf16.msrb.mxu1 %v7358_v59  ;;  %v3232_v10 = vrot.slane %v3230_v1, 1  ;;  %v8796_v59 = vld [vmem:[#allocation19 + $0x1f4] sm:$0xf]  ;;  %v8794_v1 = vld [vmem:[#allocation19 + $0x1e4] sm:$0xf] }
 0x325   : > { %v2778_v28 = vadd.f32 %v10135_v27, %v2766_v23  ;;  %v3253_v23 = vrot.slane %v3251_v21, 1 }
 0x326   : > { %v3233_v13 = vor.u32 %v3232_v10, %v3228_v11  ;;  %v7558_v10 = vor.u32 %v8794_v1, %v7555_v9 }
 0x327   : > { %v2786_v37 = vmax.f32 %v2778_v28, 0.0  ;;  %v3221_v28 = vunpack.c.l.b16 %v3186_v24  ;;  %v7547_v24 = vld [vmem:[#allocation19 + $0x1d8] sm:$0xf0] }
 0x328   : > { %v2490_v40 = vpop.f32.mrf.mxu1  ;;  %v3238_v31 = vsel %vm1699_vm4, %v3233_v13, %v3237_v12  ;;  %v7481_v13 = vld [vmem:[#allocation19 + $0x150] sm:$0xf] }
 0x329   : > { %v9069_v42 = vpack.c.bf16 %v2786_v37, %v2785_v36  ;;  %v2592_v46 = vadd.f32 %v2591_v33, %v2490_v40  ;;  %v3226_v29 = vpack.c.b16 %v3221_v28, %v3221_v28  ;;  %v3257_v33 = vor.u32 %v3255_v58, %v3253_v23  ;;  %v7473_v28 = vld [vmem:[#allocation19 + $0x140] sm:$0xf] }
 0x32b   : > { %9088 = vst [vmem:[#allocation4 + $0x28] sm:$0xff] %v9069_v42   ;;  %v2767_v53 = vadd.f32 %v2756_v39, %v2592_v46  ;;  %v3259_v30 = vshll.u32 %v3226_v29, 16  ;;  %v8775_v29 = vld [vmem:[#allocation19 + $0x144] sm:$0xf0] }
 0x32c   : > { %v7474_v58 = vor.u32 %v8775_v29, %v7473_v28  ;;  %v7523_v28 = vld [vmem:[#allocation19 + $0x1a8] sm:$0xf0] }
 0x32d   : > { %v2779_v63 = vadd.f32 %v10135_v27, %v2767_v53  ;;  %v3261_v32 = vrot.slane %v3259_v30, 1  ;;  %v8797_v53 = vld [vmem:[#allocation19 + $0x1f4] sm:$0xf0]  ;;  %v7537_v30 = vld [vmem:[#allocation19 + $0x1c0] sm:$0xf] }
 0x32f   : > { %v2787_v3 = vmax.f32 %v2779_v63, 0.0  ;;  %v3262_v60 = vsel %vm1699_vm4, %v3257_v33, %v3261_v32  ;;  %v7489_v63 = vld [vmem:[#allocation19 + $0x160] sm:$0xf]  ;;  %v8791_v32 = vld [vmem:[#allocation19 + $0x1c4] sm:$0xf0] }
 0x330   : > { %v2492_v56 = vpop.f32.mrf.mxu1  ;;  %v8774_v33 = vld [vmem:[#allocation19 + $0x144] sm:$0xf]  ;;  %v7538_v50 = vor.u32 %v8791_v32, %v7537_v30 }
 0x331   : > { %v2594_v57 = vadd.f32 %v2593_v55, %v2492_v56  ;;  %v7499_v55 = vld [vmem:[#allocation19 + $0x178] sm:$0xf0]  ;;  %v7562_v56 = vor.u32 %v8797_v53, %v7561_v51  ;;  %v7539_v53 = vld [vmem:[#allocation19 + $0x1c8] sm:$0xf0] }
 0x332   : > { %v8682_v62 = vld [vmem:[#allocation4 + $0x28] sm:$0xff] }
 0x333   : > { %v2768_v0 = vadd.f32 %v2758_v61, %v2594_v57  ;;  %2976 = vmatmul.bf16.gmra.mxu0 %v8682_v62  ;;  %3005 = vmatmul.bf16.gmra.mxu1 %v8682_v62  ;;  %v7502_v57 = vor.u32 %v8780_v54, %v7499_v55  ;;  %v7563_v61 = vld [vmem:[#allocation19 + $0x1f8] sm:$0xf0] }
 0x334   : > { %v7566_v62 = vor.u32 %v8796_v59, %v7563_v61  ;;  %3863 = vmatpush.bf16.msrb.mxu3 %v7562_v56 }
 0x335   : > { %v2780_v2 = vadd.f32 %v10135_v27, %v2768_v0  ;;  %v8702_v27 = vld [vmem:[#allocation4 + $0x18] sm:$0xff]  ;;  %3892 = vmatpush.bf16.msrb.mxu0 %v7502_v57  ;;  %v8779_v0 = vld [vmem:[#allocation19 + $0x164] sm:$0xf0]  ;;  %v7542_v57 = vor.u32 %v8790_v52, %v7539_v53 }
 0x336   : > { %v3243_v14 = vshll.u32 %v8702_v27, 16  ;;  %v3247_v22 = vshrl.u32 %v8702_v27, 16  ;;  %3921 = vmatpush.bf16.msra.mxu1 %v7566_v62  ;;  %v7545_v27 = vld [vmem:[#allocation19 + $0x1d0] sm:$0xf]  ;;  %v8785_v53 = vld [vmem:[#allocation19 + $0x194] sm:$0xf0] }
 0x337   : > { %v2788_v4 = vmax.f32 %v2780_v2, 0.0  ;;  %v7553_v2 = vld [vmem:[#allocation19 + $0x1e0] sm:$0xf]  ;;  %v7465_v62 = vld [vmem:[#allocation19 + $0x130] sm:$0xf] }
 0x338   : > { %v3245_v16 = vrot.slane %v3243_v14, 1 }
 0x339   : > { %v9074_v5 = vpack.c.bf16 %v2788_v4, %v2787_v3  ;;  %v7490_v3 = vor.u32 %v8779_v0, %v7489_v63  ;;  %v8795_v4 = vld [vmem:[#allocation19 + $0x1e4] sm:$0xf0]  ;;  %v8773_v63 = vld [vmem:[#allocation19 + $0x134] sm:$0xf0] }
 0x33a   : > { %v3246_v19 = vsel %vm1699_vm4, %v3241_v17, %v3245_v16  ;;  %v3249_v25 = vor.u32 %v3247_v22, %v3245_v16  ;;  %v7554_v7 = vor.u32 %v8795_v4, %v7553_v2  ;;  %3922 = vmatpush.bf16.msra.mxu1 %v7558_v10  ;;  %v8793_v17 = vld [vmem:[#allocation19 + $0x1d4] sm:$0xf0]  ;;  %v7466_v2 = vor.u32 %v8773_v63, %v7465_v62  ;;  %v8772_v4 = vld [vmem:[#allocation19 + $0x134] sm:$0xf] }
 0x33b   : > { %9089 = vst [vmem:[#allocation4 + $0x38] sm:$0xff] %v9074_v5   ;;  %v8778_v5 = vld [vmem:[#allocation19 + $0x164] sm:$0xf]  ;;  %3835 = vmatpush.bf16.msrb.mxu2 %v7490_v3  ;;  %v7546_v21 = vor.u32 %v8793_v17, %v7545_v27  ;;  %v8789_v3 = vld [vmem:[#allocation19 + $0x1b4] sm:$0xf0] }
 0x33c   : > { %v3254_v26 = vsel %vm1699_vm4, %v3249_v25, %v3253_v23  ;;  %3864 = vmatpush.bf16.msrb.mxu3 %v7554_v7  ;;  %v8792_v23 = vld [vmem:[#allocation19 + $0x1d4] sm:$0xf]  ;;  %v3421_v25 = vld [vmem:[%s10893_s8] sm:$0x3]  ;;  %v7531_v7 = vld [vmem:[#allocation19 + $0x1b8] sm:$0xf0] }
 0x33d   : > { %v10292_v55 = vperm.slane %v3421_v25, 0  ;;  %v10294_v56 = vperm.slane %v3421_v25, 1  ;;  %v8771_v27 = vld [vmem:[#allocation19 + $0x124] sm:$0xf0]  ;;  %v7459_v25 = vld [vmem:[#allocation19 + $0x128] sm:$0xf0] }
 0x340   : > { %3865 = vmatpush.bf16.msrb.mxu3 %v7546_v21  ;;  %v8787_v21 = vld [vmem:[#allocation19 + $0x1a4] sm:$0xf0] }
 0x342   : > { %v8683_v6 = vld [vmem:[#allocation4 + $0x38] sm:$0xff] }
 0x343   : > { %2981 = vmatmul.bf16.gmra.mxu0 %v8683_v6  ;;  %3010 = vmatmul.bf16.gmra.mxu1 %v8683_v6  ;;  %v7491_v6 = vld [vmem:[#allocation19 + $0x168] sm:$0xf0] }
 0x344   : > { %v7494_v8 = vor.u32 %v8778_v5, %v7491_v6  ;;  %3866 = vmatpush.bf16.msrb.mxu3 %v7538_v50  ;;  %v8788_v6 = vld [vmem:[#allocation19 + $0x1b4] sm:$0xf]  ;;  %v8769_v50 = vld [vmem:[#allocation19 + $0x114] sm:$0xf0] }
 0x346   : > { %3893 = vmatpush.bf16.msrb.mxu0 %v7494_v8 }
 0x353   : > { %3355 = vmatmul.bf16.vlgmr.msra.gmra.mxu0 %v3238_v31  ;;  %3384 = vmatmul.bf16.vlgmr.msrb.gmra.mxu1 %v3238_v31  ;;  %v8777_v31 = vld [vmem:[#allocation19 + $0x154] sm:$0xf0] }
 0x354   : > { %v7482_v16 = vor.u32 %v8777_v31, %v7481_v13  ;;  %v7534_v13 = vor.u32 %v8788_v6, %v7531_v7  ;;  %v7457_v31 = vld [vmem:[#allocation19 + $0x120] sm:$0xf]  ;;  %v8783_v6 = vld [vmem:[#allocation19 + $0x184] sm:$0xf0]  ;;  %v8766_v7 = vld [vmem:[#allocation19 + $0x104] sm:$0xf] }
 0x356   : > { %v10269_v45 = vpop.f32.mrf.mxu2  ;;  %v10271_v46 = vpop.f32.mrf.mxu3  ;;  %3836 = vmatpush.bf16.msrb.mxu2 %v7482_v16  ;;  %v7521_v16 = vld [vmem:[#allocation19 + $0x1a0] sm:$0xf] }
 0x35a   : > { %3837 = vmatpush.bf16.msrb.mxu2 %v7474_v58 }
 0x35e   : > { %v10281_v14 = vpop.f32.mrf.mxu2  ;;  %v10283_v15 = vpop.f32.mrf.mxu3  ;;  %3838 = vmatpush.bf16.msrb.mxu2 %v7466_v2  ;;  %v7505_v2 = vld [vmem:[#allocation19 + $0x180] sm:$0xf] }
 0x363   : > { %3360 = vmatmul.bf16.gmra.mxu0 %v3246_v19  ;;  %3389 = vmatmul.bf16.gmra.mxu1 %v3246_v19  ;;  %v8776_v19 = vld [vmem:[#allocation19 + $0x154] sm:$0xf] }
 0x364   : > { %v7486_v22 = vor.u32 %v8776_v19, %v7483_v20  ;;  %v7458_v20 = vor.u32 %v8771_v27, %v7457_v31  ;;  %v8782_v31 = vld [vmem:[#allocation19 + $0x184] sm:$0xf]  ;;  %v7507_v27 = vld [vmem:[#allocation19 + $0x188] sm:$0xf0] }
 0x366   : > { %3894 = vmatpush.bf16.msrb.mxu0 %v7486_v22  ;;  %v10296_v8 = vpop.f32.mrf.mxu2  ;;  %v10298_v1 = vpop.f32.mrf.mxu3  ;;  %v8770_v22 = vld [vmem:[#allocation19 + $0x124] sm:$0xf]  ;;  %3839 = vmatpush.bf16.msrb.mxu2 %v7458_v20  ;;  %v7510_v20 = vor.u32 %v8782_v31, %v7507_v27 }
 0x367   : > { %v7462_v58 = vor.u32 %v8770_v22, %v7459_v25 }
 0x373   : > { %3365 = vmatmul.bf16.gmra.mxu0 %v3254_v26  ;;  %3394 = vmatmul.bf16.gmra.mxu1 %v3254_v26  ;;  %v7550_v26 = vor.u32 %v8792_v23, %v7547_v24  ;;  %v7522_v24 = vor.u32 %v8787_v21, %v7521_v16 }
 0x375   : > { %3923 = vmatpush.bf16.msra.mxu1 %v7550_v26  ;;  %v8786_v26 = vld [vmem:[#allocation19 + $0x1a4] sm:$0xf] }
 0x376   : > { %v7526_v32 = vor.u32 %v8786_v26, %v7523_v28 }
 0x379   : > { %3924 = vmatpush.bf16.msra.mxu1 %v7542_v57  ;;  %v8784_v57 = vld [vmem:[#allocation19 + $0x194] sm:$0xf] }
 0x37d   : > { %3925 = vmatpush.bf16.msra.mxu1 %v7534_v13  ;;  %v7443_v13 = vld [vmem:[#allocation19 + $0x108] sm:$0xf0] }
 0x381   : > { %3926 = vmatpush.bf16.msra.mxu1 %v7526_v32 }
 0x383   : > { %3370 = vmatmul.bf16.gmra.mxu0 %v3262_v60  ;;  %3399 = vmatmul.bf16.gmra.mxu1 %v3262_v60  ;;  %v7475_v60 = vld [vmem:[#allocation19 + $0x148] sm:$0xf0] }
 0x384   : > { %v7478_v51 = vor.u32 %v8774_v33, %v7475_v60 }
 0x386   : > { %3895 = vmatpush.bf16.msrb.mxu0 %v7478_v51  ;;  %v7513_v51 = vld [vmem:[#allocation19 + $0x190] sm:$0xf] }
 0x390   : > { %v10245_v34 = vpop.f32.mrf.mxu0  ;;  %v10247_v35 = vpop.f32.mrf.mxu1 }
 0x391   : > { %v3130_v49 = vadd.f32 %v10269_v45, %v10245_v34  ;;  %v3159_v54 = vadd.f32 %v10271_v46, %v10247_v35  ;;  %v7529_v34 = vld [vmem:[#allocation19 + $0x1b0] sm:$0xf]  ;;  %v7467_v35 = vld [vmem:[#allocation19 + $0x138] sm:$0xf0] }
 0x392   : > { %v7530_v46 = vor.u32 %v8789_v3, %v7529_v34  ;;  %v7470_v5 = vor.u32 %v8772_v4, %v7467_v35  ;;  %v3136_v3 = vpop.f32.mrf.mxu2  ;;  %v3165_v4 = vpop.f32.mrf.mxu3 }
 0x394   : > { %3867 = vmatpush.bf16.msrb.mxu3 %v7530_v46  ;;  %3896 = vmatpush.bf16.msrb.mxu0 %v7470_v5 }
 0x398   : > { %v10249_v36 = vpop.f32.mrf.mxu0  ;;  %v10251_v37 = vpop.f32.mrf.mxu1  ;;  %3868 = vmatpush.bf16.msrb.mxu3 %v7522_v24  ;;  %3897 = vmatpush.bf16.msrb.mxu0 %v7462_v58 }
 0x399   : > { %v3132_v23 = vadd.f32 %v10281_v14, %v10249_v36  ;;  %v3161_v29 = vadd.f32 %v10283_v15, %v10251_v37  ;;  %v8768_v37 = vld [vmem:[#allocation19 + $0x114] sm:$0xf]  ;;  %v7514_v15 = vor.u32 %v8785_v53, %v7513_v51 }
 0x39a   : > { %v3168_v26 = vpop.f32.mrf.mxu3 }
 0x39c   : > { %3869 = vmatpush.bf16.msrb.mxu3 %v7514_v15 }
 0x3a0   : > { %v10253_v38 = vpop.f32.mrf.mxu0  ;;  %v10255_v39 = vpop.f32.mrf.mxu1 }
 0x3a1   : > { %v3164_v16 = vadd.f32 %v10298_v1, %v10255_v39  ;;  %v3139_v1 = vpop.f32.mrf.mxu2 }
 0x3a8   : > { %v10257_v40 = vpop.f32.mrf.mxu0  ;;  %v10259_v18 = vpop.f32.mrf.mxu1 }
 0x3a9   : > { %v3137_v28 = vadd.f32 %v3136_v3, %v10257_v40 }
 0x3b0   : > { %v10261_v41 = vpop.f32.mrf.mxu0  ;;  %v10263_v42 = vpop.f32.mrf.mxu1 }
 0x3b1   : > { %v3169_v15 = vadd.f32 %v3168_v26, %v10263_v42 }
 0x3b8   : > { %v10265_v43 = vpop.f32.mrf.mxu0  ;;  %v10267_v44 = vpop.f32.mrf.mxu1 }
 0x3c0   : > { %v10273_v47 = vpop.f32.mrf.mxu0  ;;  %v10275_v48 = vpop.f32.mrf.mxu1 }
 0x3c8   : > { %v10277_v11 = vpop.f32.mrf.mxu0  ;;  %v10279_v12 = vpop.f32.mrf.mxu1 }
 0x3d0   : > { %v3356_v59 = vpop.f32.mrf.mxu0  ;;  %v3385_v61 = vpop.f32.mrf.mxu1 }
 0x3d1   : > { %v3405_v45 = vadd.f32 %v3356_v59, %v3130_v49  ;;  %v3406_v0 = vadd.f32 %v3385_v61, %v3159_v54  ;;  %v7449_v49 = vld [vmem:[#allocation19 + $0x110] sm:$0xf]  ;;  %v7451_v54 = vld [vmem:[#allocation19 + $0x118] sm:$0xf0] }
 0x3d2   : > { %v7450_v52 = vor.u32 %v8769_v50, %v7449_v49  ;;  %v7515_v59 = vld [vmem:[#allocation19 + $0x198] sm:$0xf0]  ;;  %v7454_v63 = vor.u32 %v8768_v37, %v7451_v54  ;;  %v3140_v37 = vadd.f32 %v3139_v1, %v10261_v41 }
 0x3d3   : > { %v3427_v9 = vadd.f32 %v10292_v55, %v3405_v45  ;;  %v3428_v10 = vadd.f32 %v10294_v56, %v3406_v0  ;;  %v7518_v34 = vor.u32 %v8784_v57, %v7515_v59  ;;  %v7441_v45 = vld [vmem:[#allocation19 + $0x100] sm:$0xf]  ;;  %v8767_v0 = vld [vmem:[#allocation19 + $0x104] sm:$0xf0] }
 0x3d4   : > { %3840 = vmatpush.bf16.msrb.mxu2 %v7450_v52  ;;  %3898 = vmatpush.bf16.msrb.mxu0 %v7454_v63  ;;  %v7442_v5 = vor.u32 %v8767_v0, %v7441_v45  ;;  %v3141_v63 = vpop.f32.mrf.mxu2  ;;  %v3170_v0 = vpop.f32.mrf.mxu3 }
 0x3d5   : > { %v3443_v17 = vmax.f32 %v3427_v9, 0.0  ;;  %v3444_v19 = vmax.f32 %v3428_v10, 0.0  ;;  %3927 = vmatpush.bf16.msra.mxu1 %v7518_v34  ;;  %v3135_v9 = vadd.f32 %v10296_v8, %v10253_v38  ;;  %v7506_v10 = vor.u32 %v8783_v6, %v7505_v2 }
 0x3d6   : > { %v3142_v42 = vadd.f32 %v3141_v63, %v10265_v43 }
 0x3d7   : > { %v10306_v30 = vpack.c.bf16 %v3444_v19, %v3443_v17  ;;  %v7446_v19 = vor.u32 %v8766_v7, %v7443_v13  ;;  %3870 = vmatpush.bf16.msrb.mxu3 %v7506_v10  ;;  %v3171_v7 = vadd.f32 %v3170_v0, %v10267_v44  ;;  %v7721_v0 = vld [vmem:[#allocation19 + $0xf0] sm:$0xf] }
 0x3d8   : > { %v3358_v33 = vpop.f32.mrf.mxu0  ;;  %v3387_v60 = vpop.f32.mrf.mxu1  ;;  %3841 = vmatpush.bf16.msrb.mxu2 %v7442_v5 }
 0x3d9   : > { %3467 = vst [vmem:[#allocation5] sm:$0xff] %v10306_v30  ;;  %v3407_v36 = vadd.f32 %v3358_v33, %v3132_v23  ;;  %v3408_v14 = vadd.f32 %v3387_v60, %v3161_v29  ;;  %3899 = vmatpush.bf16.msrb.mxu0 %v7446_v19  ;;  %3928 = vmatpush.bf16.msra.mxu1 %v7510_v20  ;;  %v3566_v40 = vunpack.c.l.b16 %v10306_v30 }
 0x3da   : > { %v3166_v29 = vadd.f32 %v3165_v4, %v10259_v18  ;;  %v3567_v18 = vunpack.c.h.b16 %v10306_v30 }
 0x3db   : > { %v3429_v61 = vadd.f32 %v10292_v55, %v3407_v36  ;;  %v3430_v62 = vadd.f32 %v10294_v56, %v3408_v14 }
 0x3dd   : > { %v3445_v35 = vmax.f32 %v3429_v61, 0.0  ;;  %v3446_v46 = vmax.f32 %v3430_v62, 0.0 }
 0x3df   : > { %v10315_v17 = vpack.c.bf16 %v3446_v46, %v3445_v35 }
 0x3e0   : > { %v3361_v21 = vpop.f32.mrf.mxu0  ;;  %v3390_v22 = vpop.f32.mrf.mxu1  ;;  %v4266_v35 = vld [vmem:[#allocation5] sm:$0xee] }
 0x3e1   : > { %3468 = vst [vmem:[#allocation5 + $0x8] sm:$0xff] %v10315_v17  ;;  %v3409_v23 = vadd.f32 %v3361_v21, %v3135_v9  ;;  %v3410_v24 = vadd.f32 %v3390_v22, %v3164_v16  ;;  %v3568_v36 = vunpack.c.l.b16 %v10315_v17  ;;  %v3569_v14 = vunpack.c.h.b16 %v10315_v17 }
 0x3e2   : > { %v4301_v5 = vunpack.c.l.b16 %v4266_v35  ;;  %v4302_v6 = vunpack.c.h.b16 %v4266_v35 }
 0x3e3   : > { %v3431_v38 = vadd.f32 %v10292_v55, %v3409_v23  ;;  %v3432_v8 = vadd.f32 %v10294_v56, %v3410_v24  ;;  %v3584_v57 = vpack.c.b16 %v3568_v36, %v3566_v40  ;;  %v3585_v59 = vpack.c.b16 %v3569_v14, %v3567_v18 }
 0x3e4   : > { %v4304_v44 = vpack.c.b16 %v3569_v14, %v4302_v6  ;;  %v7723_v6 = vld [vmem:[#allocation19 + $0xf8] sm:$0xf0] }
 0x3e5   : > { %v3447_v25 = vmax.f32 %v3431_v38, 0.0  ;;  %v3448_v39 = vmax.f32 %v3432_v8, 0.0  ;;  %v3597_v4 = vshll.u32 %v3584_v57, 16  ;;  %v3609_v30 = vshll.u32 %v3585_v59, 16 }
 0x3e6   : > { %v3595_v43 = vshrl.u32 %v3584_v57, 16  ;;  %v3607_v38 = vshrl.u32 %v3585_v59, 16  ;;  %v4303_v8 = vpack.c.b16 %v3568_v36, %v4301_v5  ;;  %v7657_v59 = vld [vmem:[#allocation19 + $0x70] sm:$0xf]  ;;  %v8758_v5 = vld [vmem:[#allocation19 + $0xf4] sm:$0xf] }
 0x3e7   : > { %v3461_v58 = vpack.c.bf16 %v3448_v39, %v3447_v25  ;;  %v3599_v13 = vrot.slane %v3597_v4, 1  ;;  %v3611_v31 = vrot.slane %v3609_v30, 1  ;;  %v3144_v25 = vpop.f32.mrf.mxu2  ;;  %v8742_v4 = vld [vmem:[#allocation19 + $0x74] sm:$0xf]  ;;  %v7659_v30 = vld [vmem:[#allocation19 + $0x78] sm:$0xf0] }
 0x3e8   : > { %v3363_v32 = vpop.f32.mrf.mxu0  ;;  %v3392_v33 = vpop.f32.mrf.mxu1  ;;  %v4306_v36 = vrot.slane %v4303_v8, 1 }
 0x3e9   : > { %3469 = vst [vmem:[#allocation5 + $0x10] sm:$0xff] %v3461_v58  ;;  %v3411_v60 = vadd.f32 %v3363_v32, %v3137_v28  ;;  %v3412_v49 = vadd.f32 %v3392_v33, %v3166_v29  ;;  %v3173_v29 = vpop.f32.mrf.mxu3  ;;  %v3145_v58 = vadd.f32 %v3144_v25, %v10273_v47  ;;  %v3600_v32 = vor.u32 %v3599_v13, %v3595_v43  ;;  %v7713_v13 = vld [vmem:[#allocation19 + $0xe0] sm:$0xf]  ;;  %v8756_v25 = vld [vmem:[#allocation19 + $0xe4] sm:$0xf] }
 0x3ea   : > { %v3612_v33 = vor.u32 %v3611_v31, %v3607_v38  ;;  %v3174_v40 = vadd.f32 %v3173_v29, %v10275_v48  ;;  %v8757_v31 = vld [vmem:[#allocation19 + $0xe4] sm:$0xf0] }
 0x3eb   : > { %v3433_v50 = vadd.f32 %v10292_v55, %v3411_v60  ;;  %v3434_v51 = vadd.f32 %v10294_v56, %v3412_v49  ;;  %v7714_v8 = vor.u32 %v8757_v31, %v7713_v13  ;;  %v8752_v31 = vld [vmem:[#allocation19 + $0xc4] sm:$0xf] }
 0x3ed   : > { %v3449_v52 = vmax.f32 %v3433_v50, 0.0  ;;  %v3450_v53 = vmax.f32 %v3434_v51, 0.0 }
 0x3ef   : > { %v3462_v54 = vpack.c.bf16 %v3450_v53, %v3449_v52  ;;  %v4309_v52 = vrot.slane %v4304_v44, 1 }
 0x3f0   : > { %v3366_v61 = vpop.f32.mrf.mxu0  ;;  %v3395_v62 = vpop.f32.mrf.mxu1  ;;  %v7417_v10 = vld [vmem:[#allocation5 + $0x10] sm:$0xf]  ;;  %v8760_v19 = vld [vmem:[#allocation5 + $0x14] sm:$0xf] }
 0x3f1   : > { %3470 = vst [vmem:[#allocation5 + $0x18] sm:$0xff] %v3462_v54  ;;  %v3413_v34 = vadd.f32 %v3366_v61, %v3140_v37  ;;  %v3414_v45 = vadd.f32 %v3395_v62, %v3169_v15 }
 0x3f3   : > { %v3435_v2 = vadd.f32 %v10292_v55, %v3413_v34  ;;  %v3436_v3 = vadd.f32 %v10294_v56, %v3414_v45  ;;  %v8743_v45 = vld [vmem:[#allocation19 + $0x74] sm:$0xf0] }
 0x3f5   : > { %v3451_v41 = vmax.f32 %v3435_v2, 0.0  ;;  %v3452_v46 = vmax.f32 %v3436_v3, 0.0  ;;  %v7658_v2 = vor.u32 %v8743_v45, %v7657_v59  ;;  %v8759_v3 = vld [vmem:[#allocation19 + $0xf4] sm:$0xf0]  ;;  %v8754_v59 = vld [vmem:[#allocation19 + $0xd4] sm:$0xf] }
 0x3f6   : > { %v7707_v45 = vld [vmem:[#allocation19 + $0xd8] sm:$0xf0] }
 0x3f7   : > { %v3463_v9 = vpack.c.bf16 %v3452_v46, %v3451_v41  ;;  %v7722_v46 = vor.u32 %v8759_v3, %v7721_v0  ;;  %4150 = vmatpush.bf16.msra.mxu2 %v7658_v2  ;;  %v7633_v0 = vld [vmem:[#allocation19 + $0x40] sm:$0xf]  ;;  %v8737_v2 = vld [vmem:[#allocation19 + $0x44] sm:$0xf0] }
 0x3f8   : > { %v3368_v27 = vpop.f32.mrf.mxu0  ;;  %v3397_v16 = vpop.f32.mrf.mxu1  ;;  %v8761_v17 = vld [vmem:[#allocation5 + $0x14] sm:$0xf0]  ;;  %v7419_v20 = vld [vmem:[#allocation5 + $0x18] sm:$0xf0] }
 0x3f9   : > { %3471 = vst [vmem:[#allocation5 + $0x20] sm:$0xff] %v3463_v9  ;;  %v3415_v21 = vadd.f32 %v3368_v27, %v3142_v42  ;;  %v3416_v22 = vadd.f32 %v3397_v16, %v3171_v7  ;;  %v10334_v23 = vor.u32 %v8761_v17, %v7417_v10  ;;  %v10336_v24 = vor.u32 %v8760_v19, %v7419_v20  ;;  %v7649_v7 = vld [vmem:[#allocation19 + $0x60] sm:$0xf]  ;;  %v8741_v10 = vld [vmem:[#allocation19 + $0x64] sm:$0xf0] }
 0x3fa   : > { %v7662_v42 = vor.u32 %v8742_v4, %v7659_v30  ;;  %v7726_v9 = vor.u32 %v8758_v5, %v7723_v6  ;;  %4179 = vmatpush.bf16.msra.mxu3 %v7722_v46  ;;  %v7650_v17 = vor.u32 %v8741_v10, %v7649_v7  ;;  %v8740_v19 = vld [vmem:[#allocation19 + $0x64] sm:$0xf]  ;;  %v7651_v20 = vld [vmem:[#allocation19 + $0x68] sm:$0xf0]  ;;  %v8753_v46 = vld [vmem:[#allocation19 + $0xc4] sm:$0xf0]  ;;  %v7710_v6 = vor.u32 %v8754_v59, %v7707_v45 }
 0x3fb   : > { %v3437_v39 = vadd.f32 %v10292_v55, %v3415_v21  ;;  %v3438_v1 = vadd.f32 %v10294_v56, %v3416_v22  ;;  %v3602_v26 = vshll.u32 %v10334_v23, 16  ;;  %v3614_v28 = vshll.u32 %v10336_v24, 16  ;;  %v3146_v21 = vpop.f32.mrf.mxu2  ;;  %v3175_v22 = vpop.f32.mrf.mxu3  ;;  %v7635_v7 = vld [vmem:[#allocation19 + $0x48] sm:$0xf0]  ;;  %v7673_v45 = vld [vmem:[#allocation19 + $0x90] sm:$0xf] }
 0x3fc   : > { %v4307_v14 = vrot.slane %v10334_v23, 1  ;;  %v4310_v53 = vrot.slane %v10336_v24, 1  ;;  %v3618_v57 = vshrl.u32 %v10334_v23, 16  ;;  %v3626_v34 = vshrl.u32 %v10336_v24, 16  ;;  %4208 = vmatpush.bf16.msra.mxu0 %v7662_v42  ;;  %4237 = vmatpush.bf16.msrb.mxu1 %v7726_v9  ;;  %v7683_v59 = vld [vmem:[#allocation19 + $0xa8] sm:$0xf0] }
 0x3fd   : > { %v3453_v60 = vmax.f32 %v3437_v39, 0.0  ;;  %v3454_v49 = vmax.f32 %v3438_v1, 0.0  ;;  %v10343_v50 = vrot.slane %v3602_v26, 1  ;;  %v10345_v51 = vrot.slane %v3614_v28, 1  ;;  %v7715_v39 = vld [vmem:[#allocation19 + $0xe8] sm:$0xf0]  ;;  %4151 = vmatpush.bf16.msra.mxu2 %v7650_v17 }
 0x3fe   : > { %v10358_v61 = vsel %vm4305_vm5, %v4306_v36, %v4307_v14  ;;  %v10363_v48 = vsel %vm4305_vm5, %v4309_v52, %v4310_v53  ;;  %v7654_v44 = vor.u32 %v8740_v19, %v7651_v20  ;;  %v7641_v1 = vld [vmem:[#allocation19 + $0x50] sm:$0xf]  ;;  %v3147_v26 = vadd.f32 %v3146_v21, %v10277_v11  ;;  %4180 = vmatpush.bf16.msra.mxu3 %v7714_v8  ;;  %v8735_v21 = vld [vmem:[#allocation19 + $0x34] sm:$0xf0] }
 0x3ff   : > { %v3464_v18 = vpack.c.bf16 %v3454_v49, %v3453_v60  ;;  %v3605_v47 = vsel %vm1699_vm4, %v3600_v32, %v10343_v50  ;;  %v3617_v37 = vsel %vm1699_vm4, %v3612_v33, %v10345_v51  ;;  %v3176_v28 = vadd.f32 %v3175_v22, %v10279_v12  ;;  %v8739_v32 = vld [vmem:[#allocation19 + $0x54] sm:$0xf0]  ;;  %v7705_v33 = vld [vmem:[#allocation19 + $0xd0] sm:$0xf]  ;;  %v7643_v12 = vld [vmem:[#allocation19 + $0x58] sm:$0xf0] }
 0x400   : > { %v3371_v15 = vpop.f32.mrf.mxu0  ;;  %v3400_v54 = vpop.f32.mrf.mxu1  ;;  %3842 = vmatmul.bf16.vlgmr.msrb.gmra.mxu2 %v3605_v47  ;;  %3871 = vmatmul.bf16.vlgmr.msrb.gmra.mxu3 %v3617_v37  ;;  %v7425_v43 = vld [vmem:[#allocation5 + $0x20] sm:$0xf]  ;;  %v8762_v38 = vld [vmem:[#allocation5 + $0x24] sm:$0xf]  ;;  %v8755_v60 = vld [vmem:[#allocation19 + $0xd4] sm:$0xf0]  ;;  %v3620_v42 = vor.u32 %v3618_v57, %v10343_v50  ;;  %v3628_v5 = vor.u32 %v3626_v34, %v10345_v51 }
 0x401   : > { %3472 = vst [vmem:[#allocation5 + $0x28] sm:$0xff] %v3464_v18  ;;  %v3417_v62 = vadd.f32 %v3371_v15, %v3145_v58  ;;  %v3418_v63 = vadd.f32 %v3400_v54, %v3174_v40  ;;  %3900 = vmatmul.bf16.vlgmr.msrb.gmra.mxu0 %v3605_v47  ;;  %3929 = vmatmul.bf16.vlgmr.msra.gmra.mxu1 %v3617_v37  ;;  %v8738_v47 = vld [vmem:[#allocation19 + $0x54] sm:$0xf]  ;;  %v7699_v50 = vld [vmem:[#allocation19 + $0xc8] sm:$0xf0] }
 0x402   : > { %v7718_v58 = vor.u32 %v8756_v25, %v7715_v39  ;;  %v7642_v18 = vor.u32 %v8739_v32, %v7641_v1  ;;  %4209 = vmatpush.bf16.msra.mxu0 %v7654_v44  ;;  %v7702_v19 = vor.u32 %v8752_v31, %v7699_v50  ;;  %v7625_v20 = vld [vmem:[#allocation19 + $0x30] sm:$0xf]  ;;  %v8751_v8 = vld [vmem:[#allocation19 + $0xb4] sm:$0xf0]  ;;  %v8734_v44 = vld [vmem:[#allocation19 + $0x34] sm:$0xf] }
 0x403   : > { %v3439_v35 = vadd.f32 %v10292_v55, %v3417_v62  ;;  %v3440_v41 = vadd.f32 %v10294_v56, %v3418_v63  ;;  %v7706_v62 = vor.u32 %v8755_v60, %v7705_v33  ;;  %v7646_v63 = vor.u32 %v8738_v47, %v7643_v12  ;;  %v10393_v25 = vld [vmem:[#allocation5 + $0x40] sm:$0x11]  ;;  %v8733_v60 = vld [vmem:[#allocation19 + $0x24] sm:$0xf0]  ;;  %v8748_v12 = vld [vmem:[#allocation19 + $0xa4] sm:$0xf] }
 0x404   : > { %4238 = vmatpush.bf16.msrb.mxu1 %v7718_v58  ;;  %4152 = vmatpush.bf16.msra.mxu2 %v7642_v18  ;;  %v7627_v1 = vld [vmem:[#allocation19 + $0x38] sm:$0xf0]  ;;  %v7617_v33 = vld [vmem:[#allocation19 + $0x20] sm:$0xf]  ;;  %v7609_v23 = vld [vmem:[#allocation19 + $0x10] sm:$0xf] }
 0x405   : > { %v3455_v27 = vmax.f32 %v3439_v35, 0.0  ;;  %v3456_v16 = vmax.f32 %v3440_v41, 0.0  ;;  %v7697_v41 = vld [vmem:[#allocation19 + $0xc0] sm:$0xf]  ;;  %4181 = vmatpush.bf16.msra.mxu3 %v7706_v62  ;;  %v7630_v58 = vor.u32 %v8734_v44, %v7627_v1  ;;  %v7686_v62 = vor.u32 %v8748_v12, %v7683_v59 }
 0x406   : > { %4210 = vmatpush.bf16.msra.mxu0 %v7646_v63  ;;  %v8731_v63 = vld [vmem:[#allocation19 + $0x14] sm:$0xf0]  ;;  %v7601_v31 = vld [vmem:[#allocation19] sm:$0xf] }
 0x407   : > { %v3465_v29 = vpack.c.bf16 %v3456_v16, %v3455_v27  ;;  %v7634_v27 = vor.u32 %v8737_v2, %v7633_v0  ;;  %v7698_v16 = vor.u32 %v8753_v46, %v7697_v41  ;;  %v8747_v0 = vld [vmem:[#allocation19 + $0x94] sm:$0xf0] }
 0x408   : > { %v3373_v49 = vpop.f32.mrf.mxu0  ;;  %v3402_v36 = vpop.f32.mrf.mxu1  ;;  %v8763_v52 = vld [vmem:[#allocation5 + $0x24] sm:$0xf0]  ;;  %v7427_v40 = vld [vmem:[#allocation5 + $0x28] sm:$0xf0]  ;;  %4239 = vmatpush.bf16.msrb.mxu1 %v7710_v6  ;;  %v3583_v6 = vunpack.c.h.b16 %v10393_v25 }
 0x409   : > { %3473 = vst [vmem:[#allocation5 + $0x30] sm:$0xff] %v3465_v29  ;;  %v3419_v37 = vadd.f32 %v3373_v49, %v3147_v26  ;;  %v3420_v15 = vadd.f32 %v3402_v36, %v3176_v28  ;;  %v10370_v54 = vor.u32 %v8763_v52, %v7425_v43  ;;  %v10372_v11 = vor.u32 %v8762_v38, %v7427_v40  ;;  %v7689_v38 = vld [vmem:[#allocation19 + $0xb0] sm:$0xf]  ;;  %v8750_v26 = vld [vmem:[#allocation19 + $0xb4] sm:$0xf] }
 0x40a   : > { %4153 = vmatpush.bf16.msra.mxu2 %v7634_v27  ;;  %4182 = vmatpush.bf16.msra.mxu3 %v7698_v16  ;;  %v7626_v43 = vor.u32 %v8735_v21, %v7625_v20  ;;  %v7690_v39 = vor.u32 %v8751_v8, %v7689_v38  ;;  %v7691_v28 = vld [vmem:[#allocation19 + $0xb8] sm:$0xf0]  ;;  %v7681_v49 = vld [vmem:[#allocation19 + $0xa0] sm:$0xf]  ;;  %v8749_v36 = vld [vmem:[#allocation19 + $0xa4] sm:$0xf0]  ;;  %v3593_v44 = vpack.c.b16 %v3583_v6, %v3583_v6 }
 0x40b   : > { %v3441_v3 = vadd.f32 %v10292_v55, %v3419_v37  ;;  %v3442_v4 = vadd.f32 %v10294_v56, %v3420_v15  ;;  %v3622_v30 = vshll.u32 %v10370_v54, 16  ;;  %v3630_v35 = vshll.u32 %v10372_v11, 16  ;;  %v8736_v55 = vld [vmem:[#allocation19 + $0x44] sm:$0xf]  ;;  %v7619_v40 = vld [vmem:[#allocation19 + $0x28] sm:$0xf0] }
 0x40c   : > { %v7638_v17 = vor.u32 %v8736_v55, %v7635_v7  ;;  %v4312_v22 = vrot.slane %v10370_v54, 1  ;;  %4240 = vmatpush.bf16.msrb.mxu1 %v7702_v19  ;;  %v7694_v32 = vor.u32 %v8750_v26, %v7691_v28  ;;  %v8732_v52 = vld [vmem:[#allocation19 + $0x24] sm:$0xf]  ;;  %v7618_v37 = vor.u32 %v8733_v60, %v7617_v33  ;;  %v7603_v20 = vld [vmem:[#allocation19 + $0x8] sm:$0xf0] }
 0x40d   : > { %v3457_v56 = vmax.f32 %v3441_v3, 0.0  ;;  %v3458_v9 = vmax.f32 %v3442_v4, 0.0  ;;  %v10384_v10 = vrot.slane %v3622_v30, 1  ;;  %v10386_v13 = vrot.slane %v3630_v35, 1  ;;  %v8730_v30 = vld [vmem:[#allocation19 + $0x14] sm:$0xf] }
 0x40e   : > { %4211 = vmatpush.bf16.msra.mxu0 %v7638_v17  ;;  %v10400_v29 = vsel %vm4305_vm5, %v4307_v14, %v4312_v22  ;;  %4154 = vmatpush.bf16.msra.mxu2 %v7626_v43  ;;  %v7682_v15 = vor.u32 %v8749_v36, %v7681_v49  ;;  %v7622_v14 = vor.u32 %v8732_v52, %v7619_v40  ;;  %v3582_v4 = vunpack.c.l.b16 %v10393_v25  ;;  %v8745_v17 = vld [vmem:[#allocation19 + $0x84] sm:$0xf0]  ;;  %v8728_v19 = vld [vmem:[#allocation19 + $0x4] sm:$0xf]  ;;  %v7667_v33 = vld [vmem:[#allocation19 + $0x88] sm:$0xf0] }
 0x40f   : > { %v3466_v57 = vpack.c.bf16 %v3458_v9, %v3457_v56  ;;  %v3625_v51 = vsel %vm1699_vm4, %v3620_v42, %v10384_v10  ;;  %v3633_v34 = vsel %vm1699_vm4, %v3628_v5, %v10386_v13  ;;  %4183 = vmatpush.bf16.msra.mxu3 %v7690_v39  ;;  %v3634_v41 = vshrl.u32 %v10370_v54, 16  ;;  %v7611_v5 = vld [vmem:[#allocation19 + $0x18] sm:$0xf0]  ;;  %v8746_v56 = vld [vmem:[#allocation19 + $0x94] sm:$0xf] }
 0x410   : > { %3847 = vmatmul.bf16.gmra.mxu2 %v3625_v51  ;;  %3876 = vmatmul.bf16.gmra.mxu3 %v3633_v34  ;;  %v7433_v18 = vld [vmem:[#allocation5 + $0x30] sm:$0xf]  ;;  %v8764_v47 = vld [vmem:[#allocation5 + $0x34] sm:$0xf]  ;;  %v3642_v42 = vshrl.u32 %v10372_v11, 16  ;;  %v7610_v55 = vor.u32 %v8731_v63, %v7609_v23  ;;  %v7674_v7 = vor.u32 %v8747_v0, %v7673_v45  ;;  %v7614_v50 = vor.u32 %v8730_v30, %v7611_v5 }
 0x411   : > { %3474 = vst [vmem:[#allocation5 + $0x38] sm:$0xff] %v3466_v57  ;;  %3905 = vmatmul.bf16.gmra.mxu0 %v3625_v51  ;;  %3934 = vmatmul.bf16.gmra.mxu1 %v3633_v34  ;;  %v7675_v9 = vld [vmem:[#allocation19 + $0x98] sm:$0xf0]  ;;  %v8729_v57 = vld [vmem:[#allocation19 + $0x4] sm:$0xf0]  ;;  %v3592_v34 = vpack.c.b16 %v3582_v4, %v3582_v4  ;;  %v3636_v21 = vor.u32 %v3634_v41, %v10384_v10  ;;  %v4314_v10 = vrot.slane %v10372_v11, 1 }
 0x412   : > { %4212 = vmatpush.bf16.msra.mxu0 %v7630_v58  ;;  %4241 = vmatpush.bf16.msrb.mxu1 %v7694_v32  ;;  %v7665_v51 = vld [vmem:[#allocation19 + $0x80] sm:$0xf]  ;;  %v3644_v38 = vor.u32 %v3642_v42, %v10386_v13  ;;  %v7678_v25 = vor.u32 %v8746_v56, %v7675_v9  ;;  %v7602_v39 = vor.u32 %v8729_v57, %v7601_v31  ;;  %v8744_v32 = vld [vmem:[#allocation19 + $0x84] sm:$0xf]  ;;  %v4322_v11 = vrot.slane %v3593_v44, 1 }
 0x413   : > { %4155 = vmatpush.bf16.msra.mxu2 %v7618_v37  ;;  %4184 = vmatpush.bf16.msra.mxu3 %v7682_v15  ;;  %v7666_v28 = vor.u32 %v8745_v17, %v7665_v51  ;;  %v7606_v58 = vor.u32 %v8728_v19, %v7603_v20  ;;  %v4320_v49 = vrot.slane %v3592_v34, 1  ;;  %v7670_v36 = vor.u32 %v8744_v32, %v7667_v33  ;;  %v8721_v63 = vld [vmem:[#allocation5 + $0x4] sm:$0xf0]  ;;  %v7571_v45 = vld [vmem:[#allocation5 + $0x8] sm:$0xf0] }
 0x414   : > { %v10422_v52 = vsel %vm4305_vm5, %v4310_v53, %v4314_v10  ;;  %v3654_v24 = vshll.u32 %v3592_v34, 16  ;;  %v3662_v53 = vshll.u32 %v3593_v44, 16  ;;  %v7569_v0 = vld [vmem:[#allocation5] sm:$0xf]  ;;  %v7785_v30 = vld [vmem:[#allocation19 + $0x270] sm:$0xf] }
 0x415   : > { %v7849_v41 = vld [vmem:[#allocation19 + $0x2f0] sm:$0xf]  ;;  %v8829_v42 = vld [vmem:[#allocation19 + $0x2f4] sm:$0xf0]  ;;  %v8812_v5 = vld [vmem:[#allocation19 + $0x274] sm:$0xf] }
 0x416   : > { %4213 = vmatpush.bf16.msra.mxu0 %v7622_v14  ;;  %4242 = vmatpush.bf16.msrb.mxu1 %v7686_v62  ;;  %v3656_v12 = vrot.slane %v3654_v24, 1  ;;  %v3664_v23 = vrot.slane %v3662_v53, 1  ;;  %v7787_v6 = vld [vmem:[#allocation19 + $0x278] sm:$0xf0]  ;;  %v8828_v56 = vld [vmem:[#allocation19 + $0x2f4] sm:$0xf] }
 0x417   : > { %4156 = vmatpush.bf16.msra.mxu2 %v7610_v55  ;;  %4185 = vmatpush.bf16.msra.mxu3 %v7674_v7  ;;  %v7850_v55 = vor.u32 %v8829_v42, %v7849_v41  ;;  %v7790_v7 = vor.u32 %v8812_v5, %v7787_v6  ;;  %v7851_v9 = vld [vmem:[#allocation19 + $0x2f8] sm:$0xf0]  ;;  %v7777_v31 = vld [vmem:[#allocation19 + $0x260] sm:$0xf]  ;;  %v8827_v57 = vld [vmem:[#allocation19 + $0x2e4] sm:$0xf0] }
 0x418   : > { %v8765_v2 = vld [vmem:[#allocation5 + $0x34] sm:$0xf0]  ;;  %v7435_v3 = vld [vmem:[#allocation5 + $0x38] sm:$0xf0]  ;;  %v8810_v17 = vld [vmem:[#allocation19 + $0x264] sm:$0xf] }
 0x419   : > { %v10403_v35 = vor.u32 %v8765_v2, %v7433_v18  ;;  %v10406_v46 = vor.u32 %v8764_v47, %v7435_v3  ;;  %v8720_v2 = vld [vmem:[#allocation5 + $0x4] sm:$0xf]  ;;  %v7570_v3 = vor.u32 %v8721_v63, %v7569_v0  ;;  %v7779_v19 = vld [vmem:[#allocation19 + $0x268] sm:$0xf0]  ;;  %v7835_v32 = vld [vmem:[#allocation19 + $0x2d8] sm:$0xf0] }
 0x41a   : > { %4214 = vmatpush.bf16.msra.mxu0 %v7614_v50  ;;  %4243 = vmatpush.bf16.msrb.mxu1 %v7678_v25  ;;  %v7574_v4 = vor.u32 %v8720_v2, %v7571_v45  ;;  %v7841_v50 = vld [vmem:[#allocation19 + $0x2e0] sm:$0xf]  ;;  %v8826_v20 = vld [vmem:[#allocation19 + $0x2e4] sm:$0xf]  ;;  %v7833_v25 = vld [vmem:[#allocation19 + $0x2d0] sm:$0xf] }
 0x41b   : > { %v3638_v27 = vshll.u32 %v10403_v35, 16  ;;  %v3646_v16 = vshll.u32 %v10406_v46, 16  ;;  %v4316_v13 = vrot.slane %v10403_v35, 1  ;;  %v4318_v60 = vrot.slane %v10406_v46, 1  ;;  %4157 = vmatpush.bf16.msra.mxu2 %v7602_v39  ;;  %4186 = vmatpush.bf16.msra.mxu3 %v7666_v28  ;;  %v8825_v39 = vld [vmem:[#allocation19 + $0x2d4] sm:$0xf0] }
 0x41c   : > { %v3650_v54 = vshrl.u32 %v10403_v35, 16  ;;  %v8813_v35 = vld [vmem:[#allocation19 + $0x274] sm:$0xf0]  ;;  %v7842_v34 = vor.u32 %v8827_v57, %v7841_v50  ;;  %v7771_v28 = vld [vmem:[#allocation19 + $0x258] sm:$0xf0] }
 0x41d   : > { %v3640_v43 = vrot.slane %v3638_v27, 1  ;;  %v3648_v8 = vrot.slane %v3646_v16, 1  ;;  %v10427_v40 = vsel %vm4305_vm5, %v4312_v22, %v4316_v13  ;;  %v10430_v18 = vsel %vm4305_vm5, %v4314_v10, %v4318_v60  ;;  %v8811_v16 = vld [vmem:[#allocation19 + $0x264] sm:$0xf0]  ;;  %v8723_v33 = vld [vmem:[#allocation5 + $0x14] sm:$0xf0] }
 0x41e   : > { %4215 = vmatpush.bf16.msra.mxu0 %v7606_v58  ;;  %v10433_v47 = vsel %vm4305_vm5, %v4316_v13, %v4320_v49  ;;  %v10436_v37 = vsel %vm4305_vm5, %v4318_v60, %v4322_v11  ;;  %4244 = vmatpush.bf16.msrb.mxu1 %v7670_v36  ;;  %v3658_v22 = vshrl.u32 %v10406_v46, 16  ;;  %v7786_v46 = vor.u32 %v8813_v35, %v7785_v30  ;;  %v8824_v58 = vld [vmem:[#allocation19 + $0x2d4] sm:$0xf]  ;;  %v7579_v60 = vld [vmem:[#allocation5 + $0x18] sm:$0xf0] }
 0x41f   : > { %v3641_v1 = vsel %vm1699_vm4, %v3636_v21, %v3640_v43  ;;  %v3649_v26 = vsel %vm1699_vm4, %v3644_v38, %v3648_v8  ;;  %v3652_v15 = vor.u32 %v3650_v54, %v3640_v43  ;;  %v7854_v27 = vor.u32 %v8828_v56, %v7851_v9  ;;  %4521 = vmatpush.bf16.msrb.mxu3 %v7850_v55  ;;  %v7843_v43 = vld [vmem:[#allocation19 + $0x2e8] sm:$0xf0]  ;;  %v7769_v38 = vld [vmem:[#allocation19 + $0x250] sm:$0xf]  ;;  %v7761_v36 = vld [vmem:[#allocation19 + $0x240] sm:$0xf] }
 0x420   : > { %3852 = vmatmul.bf16.gmra.mxu2 %v3641_v1  ;;  %3881 = vmatmul.bf16.gmra.mxu3 %v3649_v26  ;;  %v3660_v59 = vor.u32 %v3658_v22, %v3648_v8  ;;  %v7778_v51 = vor.u32 %v8811_v16, %v7777_v31  ;;  %v7782_v21 = vor.u32 %v8810_v17, %v7779_v19  ;;  %v8809_v8 = vld [vmem:[#allocation19 + $0x254] sm:$0xf0]  ;;  %v8807_v11 = vld [vmem:[#allocation19 + $0x244] sm:$0xf0]  ;;  %v7825_v24 = vld [vmem:[#allocation19 + $0x2c0] sm:$0xf] }
 0x421   : > { %3910 = vmatmul.bf16.gmra.mxu0 %v3641_v1  ;;  %3939 = vmatmul.bf16.gmra.mxu1 %v3649_v26  ;;  %v3657_v14 = vsel %vm1699_vm4, %v3652_v15, %v3656_v12  ;;  %v7846_v44 = vor.u32 %v8826_v20, %v7843_v43  ;;  %v8808_v1 = vld [vmem:[#allocation19 + $0x254] sm:$0xf]  ;;  %v7770_v26 = vor.u32 %v8809_v8, %v7769_v38  ;;  %v8823_v53 = vld [vmem:[#allocation19 + $0x2c4] sm:$0xf0]  ;;  %v8806_v54 = vld [vmem:[#allocation19 + $0x244] sm:$0xf] }
 0x422   : > { %v3665_v62 = vsel %vm1699_vm4, %v3660_v59, %v3664_v23  ;;  %4492 = vmatpush.bf16.msrb.mxu2 %v7786_v46  ;;  %4550 = vmatpush.bf16.msrb.mxu0 %v7790_v7  ;;  %v7834_v10 = vor.u32 %v8825_v39, %v7833_v25  ;;  %v7774_v13 = vor.u32 %v8808_v1, %v7771_v28  ;;  %v7763_v22 = vld [vmem:[#allocation19 + $0x248] sm:$0xf0]  ;;  %v8822_v15 = vld [vmem:[#allocation19 + $0x2c4] sm:$0xf]  ;;  %v8722_v23 = vld [vmem:[#allocation5 + $0x14] sm:$0xf] }
 0x423   : > { %4579 = vmatpush.bf16.msra.mxu1 %v7854_v27  ;;  %4522 = vmatpush.bf16.msrb.mxu3 %v7842_v34  ;;  %v7838_v49 = vor.u32 %v8824_v58, %v7835_v32  ;;  %v7827_v12 = vld [vmem:[#allocation19 + $0x2c8] sm:$0xf0]  ;;  %v7762_v63 = vor.u32 %v8807_v11, %v7761_v36  ;;  %v7826_v45 = vor.u32 %v8823_v53, %v7825_v24  ;;  %v7817_v30 = vld [vmem:[#allocation19 + $0x2b0] sm:$0xf]  ;;  %v8821_v41 = vld [vmem:[#allocation19 + $0x2b4] sm:$0xf0] }
 0x424   : > { %v7577_v59 = vld [vmem:[#allocation5 + $0x10] sm:$0xf]  ;;  %v7766_v0 = vor.u32 %v8806_v54, %v7763_v22  ;;  %v7830_v2 = vor.u32 %v8822_v15, %v7827_v12  ;;  %v8804_v46 = vld [vmem:[#allocation19 + $0x234] sm:$0xf]  ;;  %v7755_v42 = vld [vmem:[#allocation19 + $0x238] sm:$0xf0]  ;;  %v7818_v5 = vor.u32 %v8821_v41, %v7817_v30 }
 0x425   : > { %v7758_v6 = vor.u32 %v8804_v46, %v7755_v42  ;;  %v8820_v55 = vld [vmem:[#allocation19 + $0x2b4] sm:$0xf]  ;;  %v7819_v7 = vld [vmem:[#allocation19 + $0x2b8] sm:$0xf0]  ;;  %v7745_v56 = vld [vmem:[#allocation19 + $0x220] sm:$0xf] }
 0x426   : > { %4493 = vmatpush.bf16.msrb.mxu2 %v7778_v51  ;;  %4551 = vmatpush.bf16.msrb.mxu0 %v7782_v21  ;;  %v7822_v9 = vor.u32 %v8820_v55, %v7819_v7  ;;  %v8803_v31 = vld [vmem:[#allocation19 + $0x224] sm:$0xf0]  ;;  %v7809_v27 = vld [vmem:[#allocation19 + $0x2a0] sm:$0xf]  ;;  %v8802_v50 = vld [vmem:[#allocation19 + $0x224] sm:$0xf] }
 0x427   : > { %4580 = vmatpush.bf16.msra.mxu1 %v7846_v44  ;;  %4523 = vmatpush.bf16.msrb.mxu3 %v7834_v10  ;;  %v8819_v16 = vld [vmem:[#allocation19 + $0x2a4] sm:$0xf0]  ;;  %v7747_v57 = vld [vmem:[#allocation19 + $0x228] sm:$0xf0]  ;;  %v8818_v51 = vld [vmem:[#allocation19 + $0x2a4] sm:$0xf]  ;;  %v7746_v34 = vor.u32 %v8803_v31, %v7745_v56 }
 0x428   : > { %v7810_v17 = vor.u32 %v8819_v16, %v7809_v27  ;;  %v7811_v19 = vld [vmem:[#allocation19 + $0x2a8] sm:$0xf0]  ;;  %v7737_v20 = vld [vmem:[#allocation19 + $0x210] sm:$0xf]  ;;  %v8801_v21 = vld [vmem:[#allocation19 + $0x214] sm:$0xf0]  ;;  %v7750_v43 = vor.u32 %v8802_v50, %v7747_v57 }
 0x429   : > { %v7814_v38 = vor.u32 %v8818_v51, %v7811_v19  ;;  %v7801_v8 = vld [vmem:[#allocation19 + $0x290] sm:$0xf]  ;;  %v8817_v44 = vld [vmem:[#allocation19 + $0x294] sm:$0xf0]  ;;  %v8800_v25 = vld [vmem:[#allocation19 + $0x214] sm:$0xf]  ;;  %v7738_v28 = vor.u32 %v8801_v21, %v7737_v20 }
 0x42a   : > { %4494 = vmatpush.bf16.msrb.mxu2 %v7770_v26  ;;  %4552 = vmatpush.bf16.msrb.mxu0 %v7774_v13  ;;  %v7739_v39 = vld [vmem:[#allocation19 + $0x218] sm:$0xf0]  ;;  %v8816_v1 = vld [vmem:[#allocation19 + $0x294] sm:$0xf]  ;;  %v7802_v58 = vor.u32 %v8817_v44, %v7801_v8  ;;  %v8725_v32 = vld [vmem:[#allocation5 + $0x24] sm:$0xf0] }
 0x42b   : > { %4581 = vmatpush.bf16.msra.mxu1 %v7838_v49  ;;  %4524 = vmatpush.bf16.msrb.mxu3 %v7826_v45  ;;  %v7803_v26 = vld [vmem:[#allocation19 + $0x298] sm:$0xf0]  ;;  %v7742_v10 = vor.u32 %v8800_v25, %v7739_v39  ;;  %v8724_v49 = vld [vmem:[#allocation5 + $0x24] sm:$0xf]  ;;  %v8799_v53 = vld [vmem:[#allocation19 + $0x204] sm:$0xf0] }
 0x42c   : > { %v7806_v13 = vor.u32 %v8816_v1, %v7803_v26  ;;  %v7729_v24 = vld [vmem:[#allocation19 + $0x200] sm:$0xf]  ;;  %v8815_v15 = vld [vmem:[#allocation19 + $0x284] sm:$0xf0]  ;;  %v8798_v12 = vld [vmem:[#allocation19 + $0x204] sm:$0xf] }
 0x42d   : > { %v7793_v54 = vld [vmem:[#allocation19 + $0x280] sm:$0xf]  ;;  %v7730_v22 = vor.u32 %v8799_v53, %v7729_v24 }
 0x42e   : > { %4495 = vmatpush.bf16.msrb.mxu2 %v7762_v63  ;;  %4553 = vmatpush.bf16.msrb.mxu0 %v7766_v0  ;;  %v7795_v63 = vld [vmem:[#allocation19 + $0x288] sm:$0xf0]  ;;  %v8727_v0 = vld [vmem:[#allocation5 + $0x34] sm:$0xf0] }
 0x42f   : > { %4582 = vmatpush.bf16.msra.mxu1 %v7830_v2  ;;  %4525 = vmatpush.bf16.msrb.mxu3 %v7818_v5  ;;  %v7595_v2 = vld [vmem:[#allocation5 + $0x38] sm:$0xf0] }
 0x430   : > { %3857 = vmatmul.bf16.gmra.mxu2 %v3657_v14  ;;  %3886 = vmatmul.bf16.gmra.mxu3 %v3665_v62 }
 0x431   : > { %3915 = vmatmul.bf16.gmra.mxu0 %v3657_v14  ;;  %3944 = vmatmul.bf16.gmra.mxu1 %v3665_v62  ;;  %v7578_v14 = vor.u32 %v8723_v33, %v7577_v59  ;;  %v7582_v62 = vor.u32 %v8722_v23, %v7579_v60  ;;  %v7587_v33 = vld [vmem:[#allocation5 + $0x28] sm:$0xf0]  ;;  %v7585_v60 = vld [vmem:[#allocation5 + $0x20] sm:$0xf]  ;;  %v7794_v23 = vor.u32 %v8815_v15, %v7793_v54 }
 0x432   : > { %4554 = vmatpush.bf16.msrb.mxu0 %v7758_v6  ;;  %v7586_v36 = vor.u32 %v8725_v32, %v7585_v60  ;;  %v7590_v11 = vor.u32 %v8724_v49, %v7587_v33  ;;  %v7731_v59 = vld [vmem:[#allocation19 + $0x208] sm:$0xf0] }
 0x433   : > { %4583 = vmatpush.bf16.msra.mxu1 %v7822_v9  ;;  %4526 = vmatpush.bf16.msrb.mxu3 %v7810_v17 }
 0x436   : > { %4555 = vmatpush.bf16.msrb.mxu0 %v7750_v43 }
 0x437   : > { %4584 = vmatpush.bf16.msra.mxu1 %v7814_v38  ;;  %4527 = vmatpush.bf16.msrb.mxu3 %v7802_v58 }
 0x43a   : > { %4556 = vmatpush.bf16.msrb.mxu0 %v7742_v10 }
 0x43b   : > { %4585 = vmatpush.bf16.msra.mxu1 %v7806_v13  ;;  %4528 = vmatpush.bf16.msrb.mxu3 %v7794_v23 }
 0x440   : > { %4158 = vmatmul.bf16.vlgmr.msra.gmra.mxu2 %v7570_v3  ;;  %4187 = vmatmul.bf16.vlgmr.msra.gmra.mxu3 %v7574_v4 }
 0x441   : > { %4216 = vmatmul.bf16.vlgmr.msra.gmra.mxu0 %v7570_v3  ;;  %4245 = vmatmul.bf16.vlgmr.msrb.gmra.mxu1 %v7574_v4  ;;  %v7753_v3 = vld [vmem:[#allocation19 + $0x230] sm:$0xf]  ;;  %v8805_v4 = vld [vmem:[#allocation19 + $0x234] sm:$0xf0] }
 0x442   : > { %v7754_v35 = vor.u32 %v8805_v4, %v7753_v3  ;;  %v7593_v3 = vld [vmem:[#allocation5 + $0x30] sm:$0xf]  ;;  %v8726_v4 = vld [vmem:[#allocation5 + $0x34] sm:$0xf] }
 0x443   : > { %v7594_v30 = vor.u32 %v8727_v0, %v7593_v3 }
 0x444   : > { %4496 = vmatpush.bf16.msrb.mxu2 %v7754_v35  ;;  %v7598_v35 = vor.u32 %v8726_v4, %v7595_v2 }
 0x448   : > { %4497 = vmatpush.bf16.msrb.mxu2 %v7746_v34 }
 0x44c   : > { %4498 = vmatpush.bf16.msrb.mxu2 %v7738_v28 }
 0x450   : > { %4163 = vmatmul.bf16.gmra.mxu2 %v7578_v14  ;;  %4192 = vmatmul.bf16.gmra.mxu3 %v7582_v62 }
 0x451   : > { %4221 = vmatmul.bf16.gmra.mxu0 %v7578_v14  ;;  %4250 = vmatmul.bf16.gmra.mxu1 %v7582_v62  ;;  %v7734_v14 = vor.u32 %v8798_v12, %v7731_v59  ;;  %v8814_v62 = vld [vmem:[#allocation19 + $0x284] sm:$0xf] }
 0x452   : > { %4499 = vmatpush.bf16.msrb.mxu2 %v7730_v22  ;;  %v7798_v45 = vor.u32 %v8814_v62, %v7795_v63 }
 0x453   : > { %4557 = vmatpush.bf16.msrb.mxu0 %v7734_v14 }
 0x454   : > { %4586 = vmatpush.bf16.msra.mxu1 %v7798_v45 }
 0x460   : > { %4168 = vmatmul.bf16.gmra.mxu2 %v7586_v36  ;;  %4197 = vmatmul.bf16.gmra.mxu3 %v7590_v11 }
 0x461   : > { %4226 = vmatmul.bf16.gmra.mxu0 %v7586_v36  ;;  %4255 = vmatmul.bf16.gmra.mxu1 %v7590_v11 }
 0x470   : > { %4173 = vmatmul.bf16.gmra.mxu2 %v7594_v30  ;;  %4202 = vmatmul.bf16.gmra.mxu3 %v7598_v35 }
 0x471   : > { %4231 = vmatmul.bf16.gmra.mxu0 %v7594_v30  ;;  %4260 = vmatmul.bf16.gmra.mxu1 %v7598_v35 }
 0x47e   : > { %v3901_v41 = vpop.f32.mrf.mxu0  ;;  %v3930_v46 = vpop.f32.mrf.mxu1 }
 0x47f   : > { %v3931_v42 = vadd.f32 %v3930_v46, %v3901_v41 }
 0x480   : > { %4500 = vmatmul.bf16.vlgmr.msrb.gmra.mxu2 %v10358_v61  ;;  %4529 = vmatmul.bf16.vlgmr.msrb.gmra.mxu3 %v10363_v48 }
 0x481   : > { %4558 = vmatmul.bf16.vlgmr.msrb.gmra.mxu0 %v10358_v61  ;;  %4587 = vmatmul.bf16.vlgmr.msra.gmra.mxu1 %v10363_v48 }
 0x483   : > { %v3843_v5 = vpop.f32.mrf.mxu2  ;;  %v3872_v6 = vpop.f32.mrf.mxu3 }
 0x484   : > { %v3873_v55 = vadd.f32 %v3872_v6, %v3843_v5 }
 0x486   : > { %v10446_v7 = vpop.f32.mrf.mxu0  ;;  %v10448_v56 = vpop.f32.mrf.mxu1 }
 0x48b   : > { %v10450_v9 = vpop.f32.mrf.mxu2  ;;  %v10452_v31 = vpop.f32.mrf.mxu3 }
 0x48e   : > { %v3906_v27 = vpop.f32.mrf.mxu0  ;;  %v3935_v16 = vpop.f32.mrf.mxu1 }
 0x48f   : > { %v3936_v50 = vadd.f32 %v3935_v16, %v3906_v27 }
 0x490   : > { %4505 = vmatmul.bf16.gmra.mxu2 %v10400_v29  ;;  %4534 = vmatmul.bf16.gmra.mxu3 %v10422_v52 }
 0x491   : > { %4563 = vmatmul.bf16.gmra.mxu0 %v10400_v29  ;;  %4592 = vmatmul.bf16.gmra.mxu1 %v10422_v52 }
 0x493   : > { %v3848_v61 = vpop.f32.mrf.mxu2  ;;  %v3877_v48 = vpop.f32.mrf.mxu3 }
 0x494   : > { %v3878_v57 = vadd.f32 %v3877_v48, %v3848_v61 }
 0x496   : > { %v10458_v51 = vpop.f32.mrf.mxu0  ;;  %v10460_v34 = vpop.f32.mrf.mxu1 }
 0x49b   : > { %v10462_v17 = vpop.f32.mrf.mxu2  ;;  %v10464_v19 = vpop.f32.mrf.mxu3 }
 0x49e   : > { %v3911_v20 = vpop.f32.mrf.mxu0  ;;  %v3940_v21 = vpop.f32.mrf.mxu1 }
 0x49f   : > { %v3941_v43 = vadd.f32 %v3940_v21, %v3911_v20 }
 0x4a0   : > { %4510 = vmatmul.bf16.gmra.mxu2 %v10427_v40  ;;  %4539 = vmatmul.bf16.gmra.mxu3 %v10430_v18 }
 0x4a1   : > { %4568 = vmatmul.bf16.gmra.mxu0 %v10427_v40  ;;  %4597 = vmatmul.bf16.gmra.mxu1 %v10430_v18 }
 0x4a3   : > { %v3853_v29 = vpop.f32.mrf.mxu2  ;;  %v3882_v52 = vpop.f32.mrf.mxu3 }
 0x4a4   : > { %v3883_v38 = vadd.f32 %v3882_v52, %v3853_v29 }
 0x4a6   : > { %v10470_v8 = vpop.f32.mrf.mxu0  ;;  %v10472_v44 = vpop.f32.mrf.mxu1 }
 0x4ab   : > { %v10474_v25 = vpop.f32.mrf.mxu2  ;;  %v10476_v39 = vpop.f32.mrf.mxu3 }
 0x4ae   : > { %v3916_v1 = vpop.f32.mrf.mxu0  ;;  %v3945_v26 = vpop.f32.mrf.mxu1 }
 0x4af   : > { %v3946_v28 = vadd.f32 %v3945_v26, %v3916_v1 }
 0x4b0   : > { %4515 = vmatmul.bf16.gmra.mxu2 %v10433_v47  ;;  %4544 = vmatmul.bf16.gmra.mxu3 %v10436_v37 }
 0x4b1   : > { %4573 = vmatmul.bf16.gmra.mxu0 %v10433_v47  ;;  %4602 = vmatmul.bf16.gmra.mxu1 %v10436_v37 }
 0x4b3   : > { %v3858_v40 = vpop.f32.mrf.mxu2  ;;  %v3887_v18 = vpop.f32.mrf.mxu3 }
 0x4b4   : > { %v3888_v58 = vadd.f32 %v3887_v18, %v3858_v40 }
 0x4b6   : > { %v10482_v32 = vpop.f32.mrf.mxu0  ;;  %v10484_v33 = vpop.f32.mrf.mxu1 }
 0x4bb   : > { %v10486_v10 = vpop.f32.mrf.mxu2  ;;  %v10488_v13 = vpop.f32.mrf.mxu3 }
 0x4be   : > { %v4217_v60 = vpop.f32.mrf.mxu0  ;;  %v4246_v49 = vpop.f32.mrf.mxu1 }
 0x4bf   : > { %v4218_v36 = vadd.f32 %v4217_v60, %v3931_v42  ;;  %v4624_v60 = vld [vmem:[%s10895_s10] sm:$0x3] }
 0x4c1   : > { %v10490_v11 = vadd.f32 %v4246_v49, %v4218_v36 }
 0x4c3   : > { %v4159_v24 = vpop.f32.mrf.mxu2  ;;  %v4188_v47 = vpop.f32.mrf.mxu3 }
 0x4c4   : > { %v4160_v53 = vadd.f32 %v4159_v24, %v3873_v55 }
 0x4c6   : > { %v10492_v37 = vadd.f32 %v4188_v47, %v4160_v53  ;;  %v10494_v54 = vpop.f32.mrf.mxu0  ;;  %v10496_v22 = vpop.f32.mrf.mxu1  ;;  %v7937_v53 = vld [vmem:[#allocation20 + $0x170] sm:$0xf] }
 0x4cb   : > { %v10498_v15 = vpop.f32.mrf.mxu2  ;;  %v10500_v12 = vpop.f32.mrf.mxu3 }
 0x4ce   : > { %v4222_v59 = vpop.f32.mrf.mxu0  ;;  %v4251_v23 = vpop.f32.mrf.mxu1 }
 0x4cf   : > { %v4223_v14 = vadd.f32 %v4222_v59, %v3936_v50  ;;  %v8001_v59 = vld [vmem:[#allocation20 + $0x1f0] sm:$0xf] }
 0x4d1   : > { %v10502_v62 = vadd.f32 %v4251_v23, %v4223_v14 }
 0x4d3   : > { %v4164_v63 = vpop.f32.mrf.mxu2  ;;  %v4193_v45 = vpop.f32.mrf.mxu3 }
 0x4d4   : > { %v4165_v0 = vadd.f32 %v4164_v63, %v3878_v57  ;;  %v8907_v63 = vld [vmem:[#allocation20 + $0x1f4] sm:$0xf0] }
 0x4d6   : > { %v10504_v2 = vadd.f32 %v4193_v45, %v4165_v0  ;;  %v10506_v3 = vpop.f32.mrf.mxu0  ;;  %v10508_v4 = vpop.f32.mrf.mxu1  ;;  %v8890_v45 = vld [vmem:[#allocation20 + $0x174] sm:$0xf]  ;;  %v7939_v0 = vld [vmem:[#allocation20 + $0x178] sm:$0xf0] }
 0x4db   : > { %v10510_v30 = vpop.f32.mrf.mxu2  ;;  %v10512_v35 = vpop.f32.mrf.mxu3 }
 0x4de   : > { %v4227_v41 = vpop.f32.mrf.mxu0  ;;  %v4256_v46 = vpop.f32.mrf.mxu1 }
 0x4df   : > { %v4228_v42 = vadd.f32 %v4227_v41, %v3941_v43  ;;  %v8002_v41 = vor.u32 %v8907_v63, %v8001_v59 }
 0x4e1   : > { %v10514_v5 = vadd.f32 %v4256_v46, %v4228_v42  ;;  %v7942_v46 = vor.u32 %v8890_v45, %v7939_v0  ;;  %v8906_v42 = vld [vmem:[#allocation20 + $0x1f4] sm:$0xf]  ;;  %5066 = vmatpush.bf16.msra.mxu3 %v8002_v41 }
 0x4e3   : > { %v4169_v6 = vpop.f32.mrf.mxu2  ;;  %v4198_v55 = vpop.f32.mrf.mxu3  ;;  %5095 = vmatpush.bf16.msra.mxu0 %v7942_v46  ;;  %v3875_v46 = vadd.f32 %v10452_v31, %v10450_v9 }
 0x4e4   : > { %v4170_v27 = vadd.f32 %v4169_v6, %v3883_v38  ;;  %v8003_v6 = vld [vmem:[#allocation20 + $0x1f8] sm:$0xf0] }
 0x4e6   : > { %v10516_v16 = vadd.f32 %v4198_v55, %v4170_v27  ;;  %v10518_v50 = vpop.f32.mrf.mxu0  ;;  %v10520_v61 = vpop.f32.mrf.mxu1  ;;  %v7929_v55 = vld [vmem:[#allocation20 + $0x160] sm:$0xf]  ;;  %v3933_v27 = vadd.f32 %v10448_v56, %v10446_v7 }
 0x4e8   : > { %v4220_v59 = vadd.f32 %v10494_v54, %v3933_v27  ;;  %v8887_v27 = vld [vmem:[#allocation20 + $0x154] sm:$0xf0] }
 0x4eb   : > { %v10522_v48 = vpop.f32.mrf.mxu2  ;;  %v10524_v57 = vpop.f32.mrf.mxu3 }
 0x4ee   : > { %v4232_v20 = vpop.f32.mrf.mxu0  ;;  %v4261_v21 = vpop.f32.mrf.mxu1 }
 0x4ef   : > { %v4233_v29 = vadd.f32 %v4232_v20, %v3946_v28  ;;  %v10541_v28 = vperm.slane %v4624_v60, 1 }
 0x4f1   : > { %v10526_v52 = vadd.f32 %v4261_v21, %v4233_v29  ;;  %v8006_v21 = vor.u32 %v8906_v42, %v8003_v6  ;;  %v8889_v29 = vld [vmem:[#allocation20 + $0x164] sm:$0xf0] }
 0x4f3   : > { %v4174_v43 = vpop.f32.mrf.mxu2  ;;  %v4203_v1 = vpop.f32.mrf.mxu3  ;;  %5124 = vmatpush.bf16.msrb.mxu1 %v8006_v21  ;;  %v4249_v21 = vadd.f32 %v10496_v22, %v4220_v59  ;;  %v8901_v22 = vld [vmem:[#allocation20 + $0x1c4] sm:$0xf0] }
 0x4f4   : > { %v4175_v26 = vadd.f32 %v4174_v43, %v3888_v58  ;;  %v8891_v58 = vld [vmem:[#allocation20 + $0x174] sm:$0xf0]  ;;  %v7993_v43 = vld [vmem:[#allocation20 + $0x1e0] sm:$0xf] }
 0x4f5   : > { %v7938_v14 = vor.u32 %v8891_v58, %v7937_v53  ;;  %v7931_v53 = vld [vmem:[#allocation20 + $0x168] sm:$0xf0]  ;;  %v8904_v58 = vld [vmem:[#allocation20 + $0x1e4] sm:$0xf] }
 0x4f6   : > { %v10528_v40 = vadd.f32 %v4203_v1, %v4175_v26  ;;  %v10530_v38 = vpop.f32.mrf.mxu0  ;;  %v10532_v18 = vpop.f32.mrf.mxu1  ;;  %v8905_v1 = vld [vmem:[#allocation20 + $0x1e4] sm:$0xf0]  ;;  %v7930_v26 = vor.u32 %v8889_v29, %v7929_v55  ;;  %v7921_v55 = vld [vmem:[#allocation20 + $0x150] sm:$0xf] }
 0x4f7   : > { %5037 = vmatpush.bf16.msra.mxu2 %v7938_v14  ;;  %v10548_v14 = vperm.slane %v4624_v60, 0  ;;  %v7922_v60 = vor.u32 %v8887_v27, %v7921_v55  ;;  %v7979_v55 = vld [vmem:[#allocation20 + $0x1c8] sm:$0xf0] }
 0x4fb   : > { %v10537_v49 = vpop.f32.mrf.mxu2  ;;  %v10539_v36 = vpop.f32.mrf.mxu3  ;;  %5038 = vmatpush.bf16.msra.mxu2 %v7930_v26  ;;  %v7923_v26 = vld [vmem:[#allocation20 + $0x158] sm:$0xf0] }
 0x4fe   : > { %v4559_v24 = vpop.f32.mrf.mxu0  ;;  %v4588_v47 = vpop.f32.mrf.mxu1 }
 0x4ff   : > { %v4589_v23 = vadd.f32 %v4588_v47, %v4559_v24  ;;  %v7994_v24 = vor.u32 %v8905_v1, %v7993_v43  ;;  %v8888_v47 = vld [vmem:[#allocation20 + $0x164] sm:$0xf]  ;;  %v8903_v43 = vld [vmem:[#allocation20 + $0x1d4] sm:$0xf0]  ;;  %v8886_v1 = vld [vmem:[#allocation20 + $0x154] sm:$0xf]  ;;  %5039 = vmatpush.bf16.msra.mxu2 %v7922_v60 }
 0x500   : > { %v7934_v56 = vor.u32 %v8888_v47, %v7931_v53  ;;  %v4162_v47 = vadd.f32 %v10498_v15, %v3875_v46  ;;  %v8902_v53 = vld [vmem:[#allocation20 + $0x1d4] sm:$0xf]  ;;  %v7915_v15 = vld [vmem:[#allocation20 + $0x148] sm:$0xf0] }
 0x501   : > { %v4609_v20 = vadd.f32 %v4589_v23, %v10490_v11  ;;  %v7995_v11 = vld [vmem:[#allocation20 + $0x1e8] sm:$0xf0]  ;;  %5067 = vmatpush.bf16.msra.mxu3 %v7994_v24  ;;  %v7987_v24 = vld [vmem:[#allocation20 + $0x1d8] sm:$0xf0] }
 0x502   : > { %v7998_v0 = vor.u32 %v8904_v58, %v7995_v11  ;;  %5096 = vmatpush.bf16.msra.mxu0 %v7934_v56  ;;  %v7913_v58 = vld [vmem:[#allocation20 + $0x140] sm:$0xf]  ;;  %v4191_v27 = vadd.f32 %v10500_v12, %v4162_v47  ;;  %v7969_v12 = vld [vmem:[#allocation20 + $0x1b0] sm:$0xf]  ;;  %v8882_v47 = vld [vmem:[#allocation20 + $0x134] sm:$0xf] }
 0x503   : > { %v4631_v63 = vadd.f32 %v10541_v28, %v4609_v20  ;;  %v4501_v45 = vpop.f32.mrf.mxu2  ;;  %v4530_v7 = vpop.f32.mrf.mxu3  ;;  %v7985_v20 = vld [vmem:[#allocation20 + $0x1d0] sm:$0xf] }
 0x504   : > { %v4531_v23 = vadd.f32 %v4530_v7, %v4501_v45  ;;  %5125 = vmatpush.bf16.msrb.mxu1 %v7998_v0  ;;  %v7986_v31 = vor.u32 %v8903_v43, %v7985_v20  ;;  %v8885_v45 = vld [vmem:[#allocation20 + $0x144] sm:$0xf0]  ;;  %v7977_v7 = vld [vmem:[#allocation20 + $0x1c0] sm:$0xf]  ;;  %v8884_v0 = vld [vmem:[#allocation20 + $0x144] sm:$0xf] }
 0x505   : > { %v4647_v41 = vmax.f32 %v4631_v63, 0.0  ;;  %v7990_v63 = vor.u32 %v8902_v53, %v7987_v24  ;;  %v7914_v11 = vor.u32 %v8885_v45, %v7913_v58  ;;  %v8898_v45 = vld [vmem:[#allocation20 + $0x1b4] sm:$0xf] }
 0x506   : > { %v4608_v42 = vadd.f32 %v4531_v23, %v10492_v37  ;;  %v4561_v6 = vpop.f32.mrf.mxu0  ;;  %v4590_v54 = vpop.f32.mrf.mxu1  ;;  %v7926_v37 = vor.u32 %v8886_v1, %v7923_v26  ;;  %5068 = vmatpush.bf16.msra.mxu3 %v7986_v31  ;;  %v7978_v23 = vor.u32 %v8901_v22, %v7977_v7  ;;  %v8883_v31 = vld [vmem:[#allocation20 + $0x134] sm:$0xf0]  ;;  %v7971_v7 = vld [vmem:[#allocation20 + $0x1b8] sm:$0xf0]  ;;  %v3938_v22 = vadd.f32 %v10460_v34, %v10458_v51  ;;  %v7899_v34 = vld [vmem:[#allocation20 + $0x128] sm:$0xf0] }
 0x507   : > { %v4591_v29 = vadd.f32 %v4590_v54, %v4561_v6  ;;  %v7918_v6 = vor.u32 %v8884_v0, %v7915_v15  ;;  %v8900_v54 = vld [vmem:[#allocation20 + $0x1c4] sm:$0xf]  ;;  %5040 = vmatpush.bf16.msra.mxu2 %v7914_v11  ;;  %v7897_v11 = vld [vmem:[#allocation20 + $0x120] sm:$0xf] }
 0x508   : > { %v4630_v9 = vadd.f32 %v10548_v14, %v4608_v42  ;;  %5097 = vmatpush.bf16.msra.mxu0 %v7926_v37  ;;  %5126 = vmatpush.bf16.msrb.mxu1 %v7990_v63  ;;  %v7982_v43 = vor.u32 %v8900_v54, %v7979_v55  ;;  %v7907_v63 = vld [vmem:[#allocation20 + $0x138] sm:$0xf0]  ;;  %v7961_v0 = vld [vmem:[#allocation20 + $0x1a0] sm:$0xf]  ;;  %v8897_v54 = vld [vmem:[#allocation20 + $0x1a4] sm:$0xf0] }
 0x509   : > { %v4611_v56 = vadd.f32 %v4591_v29, %v4249_v21  ;;  %v8880_v55 = vld [vmem:[#allocation20 + $0x124] sm:$0xf]  ;;  %v7962_v51 = vor.u32 %v8897_v54, %v7961_v0 }
 0x50a   : > { %v4646_v59 = vmax.f32 %v4630_v9, 0.0  ;;  %5069 = vmatpush.bf16.msra.mxu3 %v7978_v23  ;;  %v7905_v9 = vld [vmem:[#allocation20 + $0x130] sm:$0xf]  ;;  %v8881_v23 = vld [vmem:[#allocation20 + $0x124] sm:$0xf0] }
 0x50b   : > { %v4503_v46 = vpop.f32.mrf.mxu2  ;;  %v4532_v42 = vpop.f32.mrf.mxu3  ;;  %v4633_v21 = vadd.f32 %v10541_v28, %v4611_v56  ;;  %v7906_v53 = vor.u32 %v8883_v31, %v7905_v9  ;;  %v7974_v56 = vor.u32 %v8898_v45, %v7971_v7  ;;  %v7902_v9 = vor.u32 %v8880_v55, %v7899_v34  ;;  %v7953_v45 = vld [vmem:[#allocation20 + $0x190] sm:$0xf] }
 0x50c   : > { %v10557_v20 = vpack.c.bf16 %v4647_v41, %v4646_v59  ;;  %v4533_v60 = vadd.f32 %v4532_v42, %v4503_v46  ;;  %5098 = vmatpush.bf16.msra.mxu0 %v7918_v6  ;;  %5127 = vmatpush.bf16.msrb.mxu1 %v7982_v43  ;;  %v8899_v41 = vld [vmem:[#allocation20 + $0x1b4] sm:$0xf0]  ;;  %v7910_v59 = vor.u32 %v8882_v47, %v7907_v63 }
 0x50d   : > { %v7970_v58 = vor.u32 %v8899_v41, %v7969_v12  ;;  %5041 = vmatpush.bf16.msra.mxu2 %v7906_v53  ;;  %v4649_v15 = vmax.f32 %v4633_v21, 0.0  ;;  %v7898_v6 = vor.u32 %v8881_v23, %v7897_v11  ;;  %v7889_v41 = vld [vmem:[#allocation20 + $0x110] sm:$0xf]  ;;  %v8879_v47 = vld [vmem:[#allocation20 + $0x114] sm:$0xf0] }
 0x50e   : > { %4670 = vst [vmem:[#allocation6] sm:$0xff] %v10557_v20  ;;  %v4610_v29 = vadd.f32 %v4533_v60, %v4191_v27  ;;  %v4564_v1 = vpop.f32.mrf.mxu0  ;;  %v4593_v26 = vpop.f32.mrf.mxu1  ;;  %v4225_v27 = vadd.f32 %v10506_v3, %v3938_v22  ;;  %v7890_v63 = vor.u32 %v8879_v47, %v7889_v41  ;;  %v7955_v11 = vld [vmem:[#allocation20 + $0x198] sm:$0xf0] }
 0x50f   : > { %v4594_v37 = vadd.f32 %v4593_v26, %v4564_v1  ;;  %5070 = vmatpush.bf16.msra.mxu3 %v7970_v58  ;;  %v7963_v1 = vld [vmem:[#allocation20 + $0x1a8] sm:$0xf0] }
 0x510   : > { %v4632_v24 = vadd.f32 %v10548_v14, %v4610_v29  ;;  %5099 = vmatpush.bf16.msra.mxu0 %v7910_v59  ;;  %5128 = vmatpush.bf16.msrb.mxu1 %v7974_v56  ;;  %v8896_v29 = vld [vmem:[#allocation20 + $0x1a4] sm:$0xf]  ;;  %v4254_v7 = vadd.f32 %v10508_v4, %v4225_v27  ;;  %v8894_v56 = vld [vmem:[#allocation20 + $0x194] sm:$0xf] }
 0x511   : > { %v4613_v42 = vadd.f32 %v4594_v37, %v10502_v62  ;;  %v7966_v31 = vor.u32 %v8896_v29, %v7963_v1  ;;  %v3880_v62 = vadd.f32 %v10464_v19, %v10462_v17  ;;  %5042 = vmatpush.bf16.msra.mxu2 %v7898_v6  ;;  %v8895_v17 = vld [vmem:[#allocation20 + $0x194] sm:$0xf0]  ;;  %v8878_v19 = vld [vmem:[#allocation20 + $0x114] sm:$0xf]  ;;  %v7958_v0 = vor.u32 %v8894_v56, %v7955_v11  ;;  %v7883_v29 = vld [vmem:[#allocation20 + $0x108] sm:$0xf0] }
 0x512   : > { %v4648_v46 = vmax.f32 %v4632_v24, 0.0  ;;  %v7954_v59 = vor.u32 %v8895_v17, %v7953_v45  ;;  %v8892_v1 = vld [vmem:[#allocation20 + $0x184] sm:$0xf]  ;;  %v4769_v45 = vunpack.c.l.b16 %v10557_v20  ;;  %v4770_v17 = vunpack.c.h.b16 %v10557_v20 }
 0x513   : > { %v4506_v60 = vpop.f32.mrf.mxu2  ;;  %v4535_v43 = vpop.f32.mrf.mxu3  ;;  %v4635_v3 = vadd.f32 %v10541_v28, %v4613_v42  ;;  %5071 = vmatpush.bf16.msra.mxu3 %v7962_v51  ;;  %v4167_v24 = vadd.f32 %v10510_v30, %v3880_v62  ;;  %v8877_v30 = vld [vmem:[#allocation20 + $0x104] sm:$0xf0] }
 0x514   : > { %v10566_v26 = vpack.c.bf16 %v4649_v15, %v4648_v46  ;;  %v4536_v21 = vadd.f32 %v4535_v43, %v4506_v60  ;;  %5100 = vmatpush.bf16.msra.mxu0 %v7902_v9  ;;  %5129 = vmatpush.bf16.msrb.mxu1 %v7966_v31  ;;  %v7881_v15 = vld [vmem:[#allocation20 + $0x100] sm:$0xf]  ;;  %v8893_v60 = vld [vmem:[#allocation20 + $0x184] sm:$0xf0]  ;;  %v8876_v43 = vld [vmem:[#allocation20 + $0x104] sm:$0xf] }
 0x515   : > { %5043 = vmatpush.bf16.msra.mxu2 %v7890_v63  ;;  %v7945_v46 = vld [vmem:[#allocation20 + $0x180] sm:$0xf]  ;;  %v4651_v42 = vmax.f32 %v4635_v3, 0.0  ;;  %v7882_v55 = vor.u32 %v8877_v30, %v7881_v15  ;;  %v4196_v4 = vadd.f32 %v10512_v35, %v4167_v24  ;;  %v7886_v62 = vor.u32 %v8876_v43, %v7883_v29 }
 0x516   : > { %4671 = vst [vmem:[#allocation6 + $0x8] sm:$0xff] %v10566_v26  ;;  %v4612_v37 = vadd.f32 %v4536_v21, %v10504_v2  ;;  %v4566_v53 = vpop.f32.mrf.mxu0  ;;  %v4595_v12 = vpop.f32.mrf.mxu1  ;;  %v7891_v2 = vld [vmem:[#allocation20 + $0x118] sm:$0xf0]  ;;  %v7946_v34 = vor.u32 %v8893_v60, %v7945_v46  ;;  %v7947_v21 = vld [vmem:[#allocation20 + $0x188] sm:$0xf0]  ;;  %v4771_v47 = vunpack.c.l.b16 %v10566_v26  ;;  %v4772_v24 = vunpack.c.h.b16 %v10566_v26 }
 0x517   : > { %v4596_v58 = vadd.f32 %v4595_v12, %v4566_v53  ;;  %v7894_v23 = vor.u32 %v8878_v19, %v7891_v2  ;;  %5072 = vmatpush.bf16.msra.mxu3 %v7954_v59  ;;  %v7950_v3 = vor.u32 %v8892_v1, %v7947_v21 }
 0x518   : > { %v4634_v22 = vadd.f32 %v10548_v14, %v4612_v37  ;;  %5130 = vmatpush.bf16.msrb.mxu1 %v7958_v0  ;;  %v4787_v11 = vpack.c.b16 %v4771_v47, %v4769_v45  ;;  %v3948_v45 = vadd.f32 %v10484_v33, %v10482_v32 }
 0x519   : > { %v4615_v54 = vadd.f32 %v4596_v58, %v4254_v7  ;;  %5101 = vmatpush.bf16.msra.mxu0 %v7894_v23  ;;  %5044 = vmatpush.bf16.msra.mxu2 %v7882_v55  ;;  %v3943_v58 = vadd.f32 %v10472_v44, %v10470_v8  ;;  %v4788_v23 = vpack.c.b16 %v4772_v24, %v4770_v17  ;;  %v5469_v44 = vld [vmem:[#allocation6] sm:$0xee] }
 0x51a   : > { %v4650_v6 = vmax.f32 %v4634_v22, 0.0  ;;  %v3885_v8 = vadd.f32 %v10476_v39, %v10474_v25  ;;  %v5504_v60 = vunpack.c.l.b16 %v5469_v44  ;;  %v5505_v25 = vunpack.c.h.b16 %v5469_v44 }
 0x51b   : > { %v4508_v27 = vpop.f32.mrf.mxu2  ;;  %v4537_v51 = vpop.f32.mrf.mxu3  ;;  %v4637_v37 = vadd.f32 %v10541_v28, %v4615_v54  ;;  %5073 = vmatpush.bf16.msra.mxu3 %v7946_v34  ;;  %v4230_v19 = vadd.f32 %v10518_v50, %v3943_v58  ;;  %v4812_v54 = vshll.u32 %v4788_v23, 16  ;;  %v4798_v34 = vshrl.u32 %v4787_v11, 16 }
 0x51c   : > { %v4664_v9 = vpack.c.bf16 %v4651_v42, %v4650_v6  ;;  %v4538_v31 = vadd.f32 %v4537_v51, %v4508_v27  ;;  %5131 = vmatpush.bf16.msrb.mxu1 %v7950_v3  ;;  %v4800_v6 = vshll.u32 %v4787_v11, 16 }
 0x51d   : > { %5102 = vmatpush.bf16.msra.mxu0 %v7886_v62  ;;  %v4653_v7 = vmax.f32 %v4637_v37, 0.0  ;;  %v4259_v15 = vadd.f32 %v10520_v61, %v4230_v19  ;;  %v4814_v29 = vrot.slane %v4812_v54, 1 }
 0x51e   : > { %4672 = vst [vmem:[#allocation6 + $0x10] sm:$0xff] %v4664_v9  ;;  %v4614_v53 = vadd.f32 %v4538_v31, %v4196_v4  ;;  %v4569_v12 = vpop.f32.mrf.mxu0  ;;  %v4598_v41 = vpop.f32.mrf.mxu1  ;;  %v4810_v9 = vshrl.u32 %v4788_v23, 16  ;;  %v5506_v31 = vpack.c.b16 %v4771_v47, %v5504_v60 }
 0x51f   : > { %v4599_v35 = vadd.f32 %v4598_v41, %v4569_v12  ;;  %v5507_v12 = vpack.c.b16 %v4772_v24, %v5505_v25  ;;  %v8853_v25 = vld [vmem:[#allocation20 + $0x74] sm:$0xf0] }
 0x520   : > { %v4636_v63 = vadd.f32 %v10548_v14, %v4614_v53  ;;  %v4815_v47 = vor.u32 %v4814_v29, %v4810_v9  ;;  %v8868_v29 = vld [vmem:[#allocation20 + $0xf4] sm:$0xf] }
 0x521   : > { %v4617_v59 = vadd.f32 %v4599_v35, %v10514_v5  ;;  %v4172_v5 = vadd.f32 %v10522_v48, %v3885_v8  ;;  %v5511_v11 = vrot.slane %v5507_v12, 1  ;;  %v4235_v8 = vadd.f32 %v10530_v38, %v3948_v45  ;;  %v8850_v12 = vld [vmem:[#allocation20 + $0x64] sm:$0xf] }
 0x522   : > { %v4652_v22 = vmax.f32 %v4636_v63, 0.0 }
 0x523   : > { %v4511_v2 = vpop.f32.mrf.mxu2  ;;  %v4540_v56 = vpop.f32.mrf.mxu3  ;;  %v4639_v20 = vadd.f32 %v10541_v28, %v4617_v59  ;;  %v4201_v61 = vadd.f32 %v10524_v57, %v4172_v5  ;;  %v5508_v59 = vrot.slane %v5506_v31, 1  ;;  %v3890_v5 = vadd.f32 %v10488_v13, %v10486_v10  ;;  %v8089_v31 = vld [vmem:[#allocation20 + $0x60] sm:$0xf] }
 0x524   : > { %v4665_v26 = vpack.c.bf16 %v4653_v7, %v4652_v22  ;;  %v4541_v0 = vadd.f32 %v4540_v56, %v4511_v2 }
 0x525   : > { %v4655_v39 = vmax.f32 %v4639_v20, 0.0  ;;  %v7857_v48 = vld [vmem:[#allocation6 + $0x10] sm:$0xf]  ;;  %v8870_v37 = vld [vmem:[#allocation6 + $0x14] sm:$0xf] }
 0x526   : > { %4673 = vst [vmem:[#allocation6 + $0x18] sm:$0xff] %v4665_v26  ;;  %v4616_v50 = vadd.f32 %v4541_v0, %v10516_v16  ;;  %v4571_v30 = vpop.f32.mrf.mxu0  ;;  %v4600_v46 = vpop.f32.mrf.mxu1  ;;  %v4802_v16 = vrot.slane %v4800_v6, 1 }
 0x527   : > { %v4601_v42 = vadd.f32 %v4600_v46, %v4571_v30 }
 0x528   : > { %v4638_v55 = vadd.f32 %v10548_v14, %v4616_v50  ;;  %v4803_v19 = vor.u32 %v4802_v16, %v4798_v34  ;;  %v8099_v16 = vld [vmem:[#allocation20 + $0x78] sm:$0xf0] }
 0x529   : > { %v4619_v43 = vadd.f32 %v4601_v42, %v4259_v15 }
 0x52a   : > { %v4654_v4 = vmax.f32 %v4638_v55, 0.0 }
 0x52b   : > { %v4513_v27 = vpop.f32.mrf.mxu2  ;;  %v4542_v51 = vpop.f32.mrf.mxu3  ;;  %v4641_v62 = vadd.f32 %v10541_v28, %v4619_v43  ;;  %v8097_v43 = vld [vmem:[#allocation20 + $0x70] sm:$0xf] }
 0x52c   : > { %v4666_v1 = vpack.c.bf16 %v4655_v39, %v4654_v4  ;;  %v4543_v21 = vadd.f32 %v4542_v51, %v4513_v27  ;;  %v4264_v39 = vadd.f32 %v10532_v18, %v4235_v8  ;;  %v4177_v4 = vadd.f32 %v10537_v49, %v3890_v5  ;;  %v8869_v27 = vld [vmem:[#allocation20 + $0xf4] sm:$0xf0]  ;;  %v8852_v51 = vld [vmem:[#allocation20 + $0x74] sm:$0xf]  ;;  %v8153_v18 = vld [vmem:[#allocation20 + $0xe0] sm:$0xf] }
 0x52d   : > { %v8871_v3 = vld [vmem:[#allocation6 + $0x14] sm:$0xf0]  ;;  %v7859_v53 = vld [vmem:[#allocation6 + $0x18] sm:$0xf0]  ;;  %v4657_v2 = vmax.f32 %v4641_v62, 0.0  ;;  %v8098_v13 = vor.u32 %v8853_v25, %v8097_v43 }
 0x52e   : > { %4674 = vst [vmem:[#allocation6 + $0x20] sm:$0xff] %v4666_v1  ;;  %v4618_v41 = vadd.f32 %v4543_v21, %v4201_v61  ;;  %v4574_v35 = vpop.f32.mrf.mxu0  ;;  %v4603_v57 = vpop.f32.mrf.mxu1  ;;  %v10596_v58 = vor.u32 %v8871_v3, %v7857_v48  ;;  %v10598_v63 = vor.u32 %v8870_v37, %v7859_v53  ;;  %v8161_v61 = vld [vmem:[#allocation20 + $0xf0] sm:$0xf]  ;;  %v8163_v1 = vld [vmem:[#allocation20 + $0xf8] sm:$0xf0]  ;;  %v8102_v48 = vor.u32 %v8852_v51, %v8099_v16 }
 0x52f   : > { %v4604_v17 = vadd.f32 %v4603_v57, %v4574_v35  ;;  %5353 = vmatpush.bf16.msrb.mxu2 %v8098_v13  ;;  %v8166_v9 = vor.u32 %v8868_v29, %v8163_v1  ;;  %v8851_v62 = vld [vmem:[#allocation20 + $0x64] sm:$0xf0]  ;;  %v8147_v43 = vld [vmem:[#allocation20 + $0xd8] sm:$0xf0]  ;;  %v8073_v13 = vld [vmem:[#allocation20 + $0x40] sm:$0xf] }
 0x530   : > { %v4640_v7 = vadd.f32 %v10548_v14, %v4618_v41  ;;  %v4805_v22 = vshll.u32 %v10596_v58, 16  ;;  %v4817_v24 = vshll.u32 %v10598_v63, 16  ;;  %v5509_v56 = vrot.slane %v10596_v58, 1  ;;  %v8867_v53 = vld [vmem:[#allocation20 + $0xe4] sm:$0xf0]  ;;  %5411 = vmatpush.bf16.msrb.mxu0 %v8102_v48 }
 0x531   : > { %v5512_v23 = vrot.slane %v10598_v63, 1  ;;  %v4621_v0 = vadd.f32 %v4604_v17, %v10526_v52  ;;  %v4821_v60 = vshrl.u32 %v10596_v58, 16  ;;  %v8090_v37 = vor.u32 %v8851_v62, %v8089_v31  ;;  %5440 = vmatpush.bf16.msra.mxu1 %v8166_v9  ;;  %v8075_v9 = vld [vmem:[#allocation20 + $0x48] sm:$0xf0]  ;;  %v8862_v31 = vld [vmem:[#allocation20 + $0xc4] sm:$0xf] }
 0x532   : > { %v4656_v26 = vmax.f32 %v4640_v7, 0.0  ;;  %v10608_v32 = vrot.slane %v4805_v22, 1  ;;  %v10610_v33 = vrot.slane %v4817_v24, 1  ;;  %v10616_v20 = vsel %vm4305_vm5, %v5508_v59, %v5509_v56  ;;  %v8155_v7 = vld [vmem:[#allocation20 + $0xe8] sm:$0xf0] }
 0x533   : > { %v4516_v44 = vpop.f32.mrf.mxu2  ;;  %v4545_v15 = vpop.f32.mrf.mxu3  ;;  %v10621_v50 = vsel %vm4305_vm5, %v5511_v11, %v5512_v23  ;;  %v4643_v42 = vadd.f32 %v10541_v28, %v4621_v0  ;;  %v4206_v41 = vadd.f32 %v10539_v36, %v4177_v4  ;;  %v8154_v17 = vor.u32 %v8867_v53, %v8153_v18  ;;  %v8081_v11 = vld [vmem:[#allocation20 + $0x50] sm:$0xf]  ;;  %5354 = vmatpush.bf16.msrb.mxu2 %v8090_v37  ;;  %v8139_v37 = vld [vmem:[#allocation20 + $0xc8] sm:$0xf0]  ;;  %v8845_v58 = vld [vmem:[#allocation20 + $0x34] sm:$0xf0] }
 0x534   : > { %v4667_v30 = vpack.c.bf16 %v4657_v2, %v4656_v26  ;;  %v4546_v52 = vadd.f32 %v4545_v15, %v4516_v44  ;;  %v4808_v46 = vsel %vm1699_vm4, %v4803_v19, %v10608_v32  ;;  %v4820_v38 = vsel %vm1699_vm4, %v4815_v47, %v10610_v33  ;;  %v8091_v19 = vld [vmem:[#allocation20 + $0x68] sm:$0xf0]  ;;  %v8866_v47 = vld [vmem:[#allocation20 + $0xe4] sm:$0xf]  ;;  %v8849_v26 = vld [vmem:[#allocation20 + $0x54] sm:$0xf0] }
 0x535   : > { %5045 = vmatmul.bf16.vlgmr.msra.gmra.mxu2 %v4808_v46  ;;  %5074 = vmatmul.bf16.vlgmr.msra.gmra.mxu3 %v4820_v38  ;;  %v4659_v3 = vmax.f32 %v4643_v42, 0.0  ;;  %v7865_v45 = vld [vmem:[#allocation6 + $0x20] sm:$0xf]  ;;  %v8094_v59 = vor.u32 %v8850_v12, %v8091_v19  ;;  %v8158_v2 = vor.u32 %v8866_v47, %v8155_v7  ;;  %v8145_v0 = vld [vmem:[#allocation20 + $0xd0] sm:$0xf]  ;;  %v4829_v5 = vshrl.u32 %v10598_v63, 16 }
 0x536   : > { %4675 = vst [vmem:[#allocation6 + $0x28] sm:$0xff] %v4667_v30  ;;  %v4620_v6 = vadd.f32 %v4546_v52, %v10528_v40  ;;  %v4576_v54 = vpop.f32.mrf.mxu0  ;;  %v4605_v55 = vpop.f32.mrf.mxu1  ;;  %5103 = vmatmul.bf16.vlgmr.msra.gmra.mxu0 %v4808_v46  ;;  %5132 = vmatmul.bf16.vlgmr.msrb.gmra.mxu1 %v4820_v38  ;;  %v8162_v40 = vor.u32 %v8869_v27, %v8161_v61  ;;  %v8872_v36 = vld [vmem:[#allocation6 + $0x24] sm:$0xf]  ;;  %v8865_v42 = vld [vmem:[#allocation20 + $0xd4] sm:$0xf0] }
 0x537   : > { %v4606_v10 = vadd.f32 %v4605_v55, %v4576_v54  ;;  %v8082_v30 = vor.u32 %v8849_v26, %v8081_v11  ;;  %5412 = vmatpush.bf16.msrb.mxu0 %v8094_v59  ;;  %5441 = vmatpush.bf16.msra.mxu1 %v8158_v2  ;;  %v8146_v54 = vor.u32 %v8865_v42, %v8145_v0  ;;  %v8864_v55 = vld [vmem:[#allocation20 + $0xd4] sm:$0xf]  ;;  %v8067_v47 = vld [vmem:[#allocation20 + $0x38] sm:$0xf0]  ;;  %v8057_v26 = vld [vmem:[#allocation20 + $0x20] sm:$0xf] }
 0x538   : > { %v4642_v34 = vadd.f32 %v10548_v14, %v4620_v6  ;;  %5382 = vmatpush.bf16.msrb.mxu3 %v8162_v40  ;;  %v8848_v6 = vld [vmem:[#allocation20 + $0x54] sm:$0xf]  ;;  %v4831_v61 = vor.u32 %v4829_v5, %v10610_v33  ;;  %v8150_v51 = vor.u32 %v8864_v55, %v8147_v43  ;;  %v8137_v40 = vld [vmem:[#allocation20 + $0xc0] sm:$0xf]  ;;  %v8846_v33 = vld [vmem:[#allocation20 + $0x44] sm:$0xf]  ;;  %v8142_v12 = vor.u32 %v8862_v31, %v8139_v37 }
 0x539   : > { %v4623_v21 = vadd.f32 %v4606_v10, %v4264_v39  ;;  %v4823_v39 = vor.u32 %v4821_v60, %v10608_v32  ;;  %5355 = vmatpush.bf16.msrb.mxu2 %v8082_v30  ;;  %v8863_v32 = vld [vmem:[#allocation20 + $0xc4] sm:$0xf0]  ;;  %v8078_v53 = vor.u32 %v8846_v33, %v8075_v9  ;;  %v8860_v7 = vld [vmem:[#allocation20 + $0xb4] sm:$0xf]  ;;  %v8842_v5 = vld [vmem:[#allocation20 + $0x24] sm:$0xf] }
 0x53a   : > { %v4658_v49 = vmax.f32 %v4642_v34, 0.0  ;;  %v8847_v34 = vld [vmem:[#allocation20 + $0x44] sm:$0xf0]  ;;  %v8138_v48 = vor.u32 %v8863_v32, %v8137_v40  ;;  %v8059_v42 = vld [vmem:[#allocation20 + $0x28] sm:$0xf0] }
 0x53b   : > { %v4518_v35 = vpop.f32.mrf.mxu2  ;;  %v4547_v57 = vpop.f32.mrf.mxu3  ;;  %v4645_v8 = vadd.f32 %v10541_v28, %v4623_v21  ;;  %v8083_v28 = vld [vmem:[#allocation20 + $0x58] sm:$0xf0]  ;;  %5442 = vmatpush.bf16.msra.mxu1 %v8150_v51  ;;  %v8074_v60 = vor.u32 %v8847_v34, %v8073_v13  ;;  %v8843_v0 = vld [vmem:[#allocation20 + $0x24] sm:$0xf0]  ;;  %v8841_v13 = vld [vmem:[#allocation20 + $0x14] sm:$0xf0] }
 0x53c   : > { %v4668_v22 = vpack.c.bf16 %v4659_v3, %v4658_v49  ;;  %v4548_v24 = vadd.f32 %v4547_v57, %v4518_v35  ;;  %5383 = vmatpush.bf16.msrb.mxu3 %v8154_v17  ;;  %v8086_v27 = vor.u32 %v8848_v6, %v8083_v28  ;;  %v8129_v57 = vld [vmem:[#allocation20 + $0xb0] sm:$0xf]  ;;  %v8844_v17 = vld [vmem:[#allocation20 + $0x34] sm:$0xf]  ;;  %v8058_v30 = vor.u32 %v8843_v0, %v8057_v26  ;;  %v8858_v6 = vld [vmem:[#allocation20 + $0xa4] sm:$0xf] }
 0x53d   : > { %v8873_v44 = vld [vmem:[#allocation6 + $0x24] sm:$0xf0]  ;;  %v7867_v15 = vld [vmem:[#allocation6 + $0x28] sm:$0xf0]  ;;  %v4661_v29 = vmax.f32 %v4645_v8, 0.0  ;;  %5356 = vmatpush.bf16.msrb.mxu2 %v8074_v60  ;;  %v8070_v2 = vor.u32 %v8844_v17, %v8067_v47 }
 0x53e   : > { %4676 = vst [vmem:[#allocation6 + $0x30] sm:$0xff] %v4668_v22  ;;  %v4622_v52 = vadd.f32 %v4548_v24, %v4206_v41  ;;  %v10637_v46 = vor.u32 %v8873_v44, %v7865_v45  ;;  %v10639_v38 = vor.u32 %v8872_v36, %v7867_v15  ;;  %5413 = vmatpush.bf16.msrb.mxu0 %v8086_v27  ;;  %v8065_v41 = vld [vmem:[#allocation20 + $0x30] sm:$0xf]  ;;  %v8861_v45 = vld [vmem:[#allocation20 + $0xb4] sm:$0xf0] }
 0x53f   : > { %v8066_v35 = vor.u32 %v8845_v58, %v8065_v41  ;;  %5443 = vmatpush.bf16.msra.mxu1 %v8142_v12  ;;  %v8130_v19 = vor.u32 %v8861_v45, %v8129_v57  ;;  %v8131_v22 = vld [vmem:[#allocation20 + $0xb8] sm:$0xf0]  ;;  %v4726_v8 = vld [vmem:[#allocation6 + $0x40] sm:$0x11]  ;;  %v8121_v44 = vld [vmem:[#allocation20 + $0xa0] sm:$0xf] }
 0x540   : > { %v4644_v25 = vadd.f32 %v10548_v14, %v4622_v52  ;;  %v4825_v4 = vshll.u32 %v10637_v46, 16  ;;  %v4833_v10 = vshll.u32 %v10639_v38, 16  ;;  %v5514_v16 = vrot.slane %v10637_v46, 1  ;;  %5384 = vmatpush.bf16.msrb.mxu3 %v8146_v54  ;;  %v8859_v36 = vld [vmem:[#allocation20 + $0xa4] sm:$0xf0] }
 0x541   : > { %v4837_v59 = vshrl.u32 %v10637_v46, 16  ;;  %v8134_v11 = vor.u32 %v8860_v7, %v8131_v22  ;;  %5357 = vmatpush.bf16.msrb.mxu2 %v8066_v35  ;;  %v8122_v52 = vor.u32 %v8859_v36, %v8121_v44  ;;  %v8123_v54 = vld [vmem:[#allocation20 + $0xa8] sm:$0xf0]  ;;  %v8857_v27 = vld [vmem:[#allocation20 + $0x94] sm:$0xf0]  ;;  %v4845_v51 = vshrl.u32 %v10639_v38, 16 }
 0x542   : > { %v4660_v14 = vmax.f32 %v4644_v25, 0.0  ;;  %v10650_v1 = vrot.slane %v4825_v4, 1  ;;  %v10652_v21 = vrot.slane %v4833_v10, 1  ;;  %v10659_v62 = vsel %vm4305_vm5, %v5509_v56, %v5514_v16  ;;  %5414 = vmatpush.bf16.msrb.mxu0 %v8078_v53  ;;  %v8049_v25 = vld [vmem:[#allocation20 + $0x10] sm:$0xf] }
 0x543   : > { %v5516_v56 = vrot.slane %v10639_v38, 1  ;;  %5444 = vmatpush.bf16.msra.mxu1 %v8134_v11  ;;  %v8126_v43 = vor.u32 %v8858_v6, %v8123_v54  ;;  %v4785_v10 = vunpack.c.l.b16 %v4726_v8  ;;  %v4786_v34 = vunpack.c.h.b16 %v4726_v8  ;;  %v8051_v32 = vld [vmem:[#allocation20 + $0x18] sm:$0xf0]  ;;  %v8856_v33 = vld [vmem:[#allocation20 + $0x94] sm:$0xf] }
 0x544   : > { %v4669_v18 = vpack.c.bf16 %v4661_v29, %v4660_v14  ;;  %v4828_v3 = vsel %vm1699_vm4, %v4823_v39, %v10650_v1  ;;  %v4836_v49 = vsel %vm1699_vm4, %v4831_v61, %v10652_v21  ;;  %5385 = vmatpush.bf16.msrb.mxu3 %v8138_v48  ;;  %v8113_v61 = vld [vmem:[#allocation20 + $0x90] sm:$0xf]  ;;  %v8050_v40 = vor.u32 %v8841_v13, %v8049_v25  ;;  %v8840_v14 = vld [vmem:[#allocation20 + $0x14] sm:$0xf]  ;;  %v8115_v9 = vld [vmem:[#allocation20 + $0x98] sm:$0xf0] }
 0x545   : > { %5050 = vmatmul.bf16.gmra.mxu2 %v4828_v3  ;;  %5079 = vmatmul.bf16.gmra.mxu3 %v4836_v49  ;;  %v10671_v24 = vsel %vm4305_vm5, %v5512_v23, %v5516_v56  ;;  %v7873_v15 = vld [vmem:[#allocation6 + $0x30] sm:$0xf]  ;;  %v8874_v63 = vld [vmem:[#allocation6 + $0x34] sm:$0xf]  ;;  %v8062_v23 = vor.u32 %v8842_v5, %v8059_v42  ;;  %v8114_v29 = vor.u32 %v8857_v27, %v8113_v61  ;;  %v8105_v37 = vld [vmem:[#allocation20 + $0x80] sm:$0xf] }
 0x546   : > { %4677 = vst [vmem:[#allocation6 + $0x38] sm:$0xff] %v4669_v18  ;;  %5108 = vmatmul.bf16.gmra.mxu0 %v4828_v3  ;;  %5137 = vmatmul.bf16.gmra.mxu1 %v4836_v49  ;;  %v4839_v31 = vor.u32 %v4837_v59, %v10650_v1  ;;  %v8054_v18 = vor.u32 %v8840_v14, %v8051_v32  ;;  %v8041_v3 = vld [vmem:[#allocation20] sm:$0xf]  ;;  %v8839_v49 = vld [vmem:[#allocation20 + $0x4] sm:$0xf0] }
 0x547   : > { %5415 = vmatpush.bf16.msrb.mxu0 %v8070_v2  ;;  %5358 = vmatpush.bf16.msrb.mxu2 %v8058_v30  ;;  %v4847_v12 = vor.u32 %v4845_v51, %v10652_v21  ;;  %v4795_v58 = vpack.c.b16 %v4785_v10, %v4785_v10  ;;  %v8855_v35 = vld [vmem:[#allocation20 + $0x84] sm:$0xf0]  ;;  %v8838_v57 = vld [vmem:[#allocation20 + $0x4] sm:$0xf]  ;;  %v4796_v45 = vpack.c.b16 %v4786_v34, %v4786_v34  ;;  %v8043_v47 = vld [vmem:[#allocation20 + $0x8] sm:$0xf0] }
 0x548   : > { %5386 = vmatpush.bf16.msrb.mxu3 %v8130_v19  ;;  %5445 = vmatpush.bf16.msra.mxu1 %v8126_v43  ;;  %v8118_v17 = vor.u32 %v8856_v33, %v8115_v9  ;;  %v8042_v19 = vor.u32 %v8839_v49, %v8041_v3  ;;  %v8106_v22 = vor.u32 %v8855_v35, %v8105_v37  ;;  %v8854_v59 = vld [vmem:[#allocation20 + $0x84] sm:$0xf]  ;;  %v8107_v2 = vld [vmem:[#allocation20 + $0x88] sm:$0xf0]  ;;  %v8923_v13 = vld [vmem:[#allocation20 + $0x274] sm:$0xf0] }
 0x549   : > { %v8046_v21 = vor.u32 %v8838_v57, %v8043_v47  ;;  %v8110_v26 = vor.u32 %v8854_v59, %v8107_v2  ;;  %v5522_v8 = vrot.slane %v4795_v58, 1  ;;  %v5524_v44 = vrot.slane %v4796_v45, 1  ;;  %v8009_v43 = vld [vmem:[#allocation6] sm:$0xf]  ;;  %v8830_v25 = vld [vmem:[#allocation6 + $0x4] sm:$0xf] }
 0x54a   : > { %v4857_v5 = vshll.u32 %v4795_v58, 16  ;;  %v4865_v42 = vshll.u32 %v4796_v45, 16  ;;  %v8289_v61 = vld [vmem:[#allocation20 + $0x2f0] sm:$0xf]  ;;  %v8939_v51 = vld [vmem:[#allocation20 + $0x2f4] sm:$0xf0] }
 0x54b   : > { %5416 = vmatpush.bf16.msrb.mxu0 %v8062_v23  ;;  %5359 = vmatpush.bf16.msrb.mxu2 %v8050_v40  ;;  %v8922_v34 = vld [vmem:[#allocation20 + $0x274] sm:$0xf]  ;;  %v8227_v40 = vld [vmem:[#allocation20 + $0x278] sm:$0xf0]  ;;  %v8921_v9 = vld [vmem:[#allocation20 + $0x264] sm:$0xf0] }
 0x54c   : > { %5387 = vmatpush.bf16.msrb.mxu3 %v8122_v52  ;;  %5446 = vmatpush.bf16.msra.mxu1 %v8118_v17  ;;  %v4859_v23 = vrot.slane %v4857_v5, 1  ;;  %v4867_v38 = vrot.slane %v4865_v42, 1  ;;  %v8230_v14 = vor.u32 %v8922_v34, %v8227_v40  ;;  %v8938_v32 = vld [vmem:[#allocation20 + $0x2f4] sm:$0xf]  ;;  %v8920_v37 = vld [vmem:[#allocation20 + $0x264] sm:$0xf] }
 0x54d   : > { %v8875_v28 = vld [vmem:[#allocation6 + $0x34] sm:$0xf0]  ;;  %v7875_v55 = vld [vmem:[#allocation6 + $0x38] sm:$0xf0]  ;;  %v8283_v58 = vld [vmem:[#allocation20 + $0x2e8] sm:$0xf0] }
 0x54e   : > { %v10674_v39 = vor.u32 %v8875_v28, %v7873_v15  ;;  %v10676_v4 = vor.u32 %v8874_v63, %v7875_v55  ;;  %v8831_v28 = vld [vmem:[#allocation6 + $0x4] sm:$0xf0]  ;;  %v8011_v55 = vld [vmem:[#allocation6 + $0x8] sm:$0xf0]  ;;  %v8919_v57 = vld [vmem:[#allocation20 + $0x254] sm:$0xf0] }
 0x54f   : > { %5417 = vmatpush.bf16.msrb.mxu0 %v8054_v18  ;;  %5360 = vmatpush.bf16.msrb.mxu2 %v8042_v19  ;;  %v8010_v10 = vor.u32 %v8831_v28, %v8009_v43  ;;  %v8937_v18 = vld [vmem:[#allocation20 + $0x2e4] sm:$0xf0]  ;;  %v8209_v35 = vld [vmem:[#allocation20 + $0x250] sm:$0xf]  ;;  %v8935_v19 = vld [vmem:[#allocation20 + $0x2d4] sm:$0xf0] }
 0x550   : > { %v4841_v60 = vshll.u32 %v10674_v39, 16  ;;  %v4849_v48 = vshll.u32 %v10676_v4, 16  ;;  %5388 = vmatpush.bf16.msrb.mxu3 %v8114_v29  ;;  %v5518_v11 = vrot.slane %v10674_v39, 1  ;;  %v5520_v0 = vrot.slane %v10676_v4, 1  ;;  %5447 = vmatpush.bf16.msra.mxu1 %v8110_v26  ;;  %v8273_v17 = vld [vmem:[#allocation20 + $0x2d0] sm:$0xf] }
 0x551   : > { %v4853_v63 = vshrl.u32 %v10674_v39, 16  ;;  %v4861_v46 = vshrl.u32 %v10676_v4, 16  ;;  %v8014_v39 = vor.u32 %v8830_v25, %v8011_v55  ;;  %v8225_v4 = vld [vmem:[#allocation20 + $0x270] sm:$0xf]  ;;  %v8290_v29 = vor.u32 %v8939_v51, %v8289_v61  ;;  %v8918_v47 = vld [vmem:[#allocation20 + $0x254] sm:$0xf] }
 0x552   : > { %v4843_v53 = vrot.slane %v4841_v60, 1  ;;  %v4851_v41 = vrot.slane %v4849_v48, 1  ;;  %v10690_v36 = vsel %vm4305_vm5, %v5514_v16, %v5518_v11  ;;  %v10695_v15 = vsel %vm4305_vm5, %v5516_v56, %v5520_v0  ;;  %v8291_v60 = vld [vmem:[#allocation20 + $0x2f8] sm:$0xf0]  ;;  %v8217_v48 = vld [vmem:[#allocation20 + $0x260] sm:$0xf] }
 0x553   : > { %5418 = vmatpush.bf16.msrb.mxu0 %v8046_v21  ;;  %v10698_v30 = vsel %vm4305_vm5, %v5518_v11, %v5522_v8  ;;  %v10701_v52 = vsel %vm4305_vm5, %v5520_v0, %v5524_v44  ;;  %v8226_v27 = vor.u32 %v8923_v13, %v8225_v4  ;;  %v8294_v33 = vor.u32 %v8938_v32, %v8291_v60  ;;  %v8275_v59 = vld [vmem:[#allocation20 + $0x2d8] sm:$0xf0]  ;;  %v8019_v26 = vld [vmem:[#allocation6 + $0x18] sm:$0xf0]  ;;  %v8917_v44 = vld [vmem:[#allocation20 + $0x244] sm:$0xf0] }
 0x554   : > { %v4844_v7 = vsel %vm1699_vm4, %v4839_v31, %v4843_v53  ;;  %v4852_v1 = vsel %vm1699_vm4, %v4847_v12, %v4851_v41  ;;  %5389 = vmatpush.bf16.msrb.mxu3 %v8106_v22  ;;  %v4855_v16 = vor.u32 %v4853_v63, %v4843_v53  ;;  %v4863_v6 = vor.u32 %v4861_v46, %v4851_v41  ;;  %v8281_v31 = vld [vmem:[#allocation20 + $0x2e0] sm:$0xf]  ;;  %v8219_v53 = vld [vmem:[#allocation20 + $0x268] sm:$0xf0]  ;;  %v8936_v12 = vld [vmem:[#allocation20 + $0x2e4] sm:$0xf] }
 0x555   : > { %5055 = vmatmul.bf16.gmra.mxu2 %v4844_v7  ;;  %5084 = vmatmul.bf16.gmra.mxu3 %v4852_v1  ;;  %v8218_v3 = vor.u32 %v8921_v9, %v8217_v48  ;;  %v8282_v49 = vor.u32 %v8937_v18, %v8281_v31  ;;  %v8222_v41 = vor.u32 %v8920_v37, %v8219_v53  ;;  %v8934_v22 = vld [vmem:[#allocation20 + $0x2d4] sm:$0xf]  ;;  %v8833_v2 = vld [vmem:[#allocation6 + $0x14] sm:$0xf0]  ;;  %v8933_v42 = vld [vmem:[#allocation20 + $0x2c4] sm:$0xf0] }
 0x556   : > { %5113 = vmatmul.bf16.gmra.mxu0 %v4844_v7  ;;  %5142 = vmatmul.bf16.gmra.mxu1 %v4852_v1  ;;  %v4860_v56 = vsel %vm1699_vm4, %v4855_v16, %v4859_v23  ;;  %v4868_v54 = vsel %vm1699_vm4, %v4863_v6, %v4867_v38  ;;  %v8286_v45 = vor.u32 %v8936_v12, %v8283_v58  ;;  %v8211_v1 = vld [vmem:[#allocation20 + $0x258] sm:$0xf0]  ;;  %v8201_v8 = vld [vmem:[#allocation20 + $0x240] sm:$0xf]  ;;  %v8916_v63 = vld [vmem:[#allocation20 + $0x244] sm:$0xf] }
 0x557   : > { %5694 = vmatpush.bf16.msra.mxu2 %v8226_v27  ;;  %5752 = vmatpush.bf16.msra.mxu0 %v8230_v14  ;;  %v8210_v7 = vor.u32 %v8919_v57, %v8209_v35  ;;  %v8274_v21 = vor.u32 %v8935_v19, %v8273_v17  ;;  %v8214_v11 = vor.u32 %v8918_v47, %v8211_v1  ;;  %v8265_v5 = vld [vmem:[#allocation20 + $0x2c0] sm:$0xf]  ;;  %v8203_v46 = vld [vmem:[#allocation20 + $0x248] sm:$0xf0]  ;;  %v8932_v16 = vld [vmem:[#allocation20 + $0x2c4] sm:$0xf] }
 0x558   : > { %5723 = vmatpush.bf16.msra.mxu3 %v8290_v29  ;;  %5781 = vmatpush.bf16.msrb.mxu1 %v8294_v33  ;;  %v8278_v0 = vor.u32 %v8934_v22, %v8275_v59  ;;  %v8267_v23 = vld [vmem:[#allocation20 + $0x2c8] sm:$0xf0]  ;;  %v8017_v6 = vld [vmem:[#allocation6 + $0x10] sm:$0xf]  ;;  %v8832_v38 = vld [vmem:[#allocation6 + $0x14] sm:$0xf]  ;;  %v8202_v28 = vor.u32 %v8917_v44, %v8201_v8  ;;  %v8266_v55 = vor.u32 %v8933_v42, %v8265_v5 }
 0x559   : > { %v8206_v43 = vor.u32 %v8916_v63, %v8203_v46  ;;  %v8270_v25 = vor.u32 %v8932_v16, %v8267_v23  ;;  %v8257_v4 = vld [vmem:[#allocation20 + $0x2b0] sm:$0xf]  ;;  %v8931_v61 = vld [vmem:[#allocation20 + $0x2b4] sm:$0xf0]  ;;  %v8914_v27 = vld [vmem:[#allocation20 + $0x234] sm:$0xf] }
 0x55a   : > { %v8195_v51 = vld [vmem:[#allocation20 + $0x238] sm:$0xf0]  ;;  %v8258_v34 = vor.u32 %v8931_v61, %v8257_v4  ;;  %v8930_v29 = vld [vmem:[#allocation20 + $0x2b4] sm:$0xf]  ;;  %v8185_v32 = vld [vmem:[#allocation20 + $0x220] sm:$0xf] }
 0x55b   : > { %5695 = vmatpush.bf16.msra.mxu2 %v8218_v3  ;;  %5753 = vmatpush.bf16.msra.mxu0 %v8222_v41  ;;  %v8198_v40 = vor.u32 %v8914_v27, %v8195_v51  ;;  %v8259_v14 = vld [vmem:[#allocation20 + $0x2b8] sm:$0xf0]  ;;  %v8913_v48 = vld [vmem:[#allocation20 + $0x224] sm:$0xf0]  ;;  %v8249_v33 = vld [vmem:[#allocation20 + $0x2a0] sm:$0xf] }
 0x55c   : > { %5724 = vmatpush.bf16.msra.mxu3 %v8282_v49  ;;  %5782 = vmatpush.bf16.msrb.mxu1 %v8286_v45  ;;  %v8262_v60 = vor.u32 %v8930_v29, %v8259_v14  ;;  %v8929_v9 = vld [vmem:[#allocation20 + $0x2a4] sm:$0xf0]  ;;  %v8912_v31 = vld [vmem:[#allocation20 + $0x224] sm:$0xf]  ;;  %v8187_v18 = vld [vmem:[#allocation20 + $0x228] sm:$0xf0]  ;;  %v8186_v49 = vor.u32 %v8913_v48, %v8185_v32 }
 0x55d   : > { %v8928_v3 = vld [vmem:[#allocation20 + $0x2a4] sm:$0xf]  ;;  %v8250_v37 = vor.u32 %v8929_v9, %v8249_v33  ;;  %v8251_v53 = vld [vmem:[#allocation20 + $0x2a8] sm:$0xf0]  ;;  %v8177_v12 = vld [vmem:[#allocation20 + $0x210] sm:$0xf]  ;;  %v8190_v58 = vor.u32 %v8912_v31, %v8187_v18 }
 0x55e   : > { %v8911_v41 = vld [vmem:[#allocation20 + $0x214] sm:$0xf0]  ;;  %v8254_v35 = vor.u32 %v8928_v3, %v8251_v53  ;;  %v8241_v57 = vld [vmem:[#allocation20 + $0x290] sm:$0xf]  ;;  %v8910_v17 = vld [vmem:[#allocation20 + $0x214] sm:$0xf] }
 0x55f   : > { %5696 = vmatpush.bf16.msra.mxu2 %v8210_v7  ;;  %5754 = vmatpush.bf16.msra.mxu0 %v8214_v11  ;;  %v8927_v45 = vld [vmem:[#allocation20 + $0x294] sm:$0xf0]  ;;  %v8179_v19 = vld [vmem:[#allocation20 + $0x218] sm:$0xf0]  ;;  %v8926_v47 = vld [vmem:[#allocation20 + $0x294] sm:$0xf]  ;;  %v8178_v1 = vor.u32 %v8911_v41, %v8177_v12 }
 0x560   : > { %5725 = vmatpush.bf16.msra.mxu3 %v8274_v21  ;;  %5783 = vmatpush.bf16.msrb.mxu1 %v8278_v0  ;;  %v8243_v7 = vld [vmem:[#allocation20 + $0x298] sm:$0xf0]  ;;  %v8242_v22 = vor.u32 %v8927_v45, %v8241_v57  ;;  %v8835_v59 = vld [vmem:[#allocation6 + $0x24] sm:$0xf0]  ;;  %v8182_v21 = vor.u32 %v8910_v17, %v8179_v19  ;;  %v8834_v0 = vld [vmem:[#allocation6 + $0x24] sm:$0xf] }
 0x561   : > { %v8246_v11 = vor.u32 %v8926_v47, %v8243_v7  ;;  %v8169_v5 = vld [vmem:[#allocation20 + $0x200] sm:$0xf]  ;;  %v8909_v42 = vld [vmem:[#allocation20 + $0x204] sm:$0xf0]  ;;  %v8908_v23 = vld [vmem:[#allocation20 + $0x204] sm:$0xf] }
 0x562   : > { %v8233_v63 = vld [vmem:[#allocation20 + $0x280] sm:$0xf]  ;;  %v8170_v46 = vor.u32 %v8909_v42, %v8169_v5  ;;  %v8925_v16 = vld [vmem:[#allocation20 + $0x284] sm:$0xf0] }
 0x563   : > { %5697 = vmatpush.bf16.msra.mxu2 %v8202_v28  ;;  %5755 = vmatpush.bf16.msra.mxu0 %v8206_v43  ;;  %v8235_v28 = vld [vmem:[#allocation20 + $0x288] sm:$0xf0]  ;;  %v8837_v43 = vld [vmem:[#allocation6 + $0x34] sm:$0xf0] }
 0x564   : > { %5726 = vmatpush.bf16.msra.mxu3 %v8266_v55  ;;  %5784 = vmatpush.bf16.msrb.mxu1 %v8270_v25  ;;  %v8035_v25 = vld [vmem:[#allocation6 + $0x38] sm:$0xf0] }
 0x565   : > { %5060 = vmatmul.bf16.gmra.mxu2 %v4860_v56  ;;  %5089 = vmatmul.bf16.gmra.mxu3 %v4868_v54 }
 0x566   : > { %5118 = vmatmul.bf16.gmra.mxu0 %v4860_v56  ;;  %5147 = vmatmul.bf16.gmra.mxu1 %v4868_v54  ;;  %v8018_v56 = vor.u32 %v8833_v2, %v8017_v6  ;;  %v8022_v54 = vor.u32 %v8832_v38, %v8019_v26  ;;  %v8027_v2 = vld [vmem:[#allocation6 + $0x28] sm:$0xf0]  ;;  %v8025_v26 = vld [vmem:[#allocation6 + $0x20] sm:$0xf]  ;;  %v8171_v6 = vld [vmem:[#allocation20 + $0x208] sm:$0xf0]  ;;  %v8234_v38 = vor.u32 %v8925_v16, %v8233_v63 }
 0x567   : > { %5756 = vmatpush.bf16.msra.mxu0 %v8198_v40  ;;  %v8026_v8 = vor.u32 %v8835_v59, %v8025_v26  ;;  %v8030_v44 = vor.u32 %v8834_v0, %v8027_v2 }
 0x568   : > { %5727 = vmatpush.bf16.msra.mxu3 %v8258_v34  ;;  %5785 = vmatpush.bf16.msrb.mxu1 %v8262_v60 }
 0x56b   : > { %5757 = vmatpush.bf16.msra.mxu0 %v8190_v58 }
 0x56c   : > { %5728 = vmatpush.bf16.msra.mxu3 %v8250_v37  ;;  %5786 = vmatpush.bf16.msrb.mxu1 %v8254_v35 }
 0x56f   : > { %5758 = vmatpush.bf16.msra.mxu0 %v8182_v21 }
 0x570   : > { %5729 = vmatpush.bf16.msra.mxu3 %v8242_v22  ;;  %5787 = vmatpush.bf16.msrb.mxu1 %v8246_v11 }
 0x574   : > { %5730 = vmatpush.bf16.msra.mxu3 %v8234_v38 }
 0x575   : > { %5361 = vmatmul.bf16.vlgmr.msrb.gmra.mxu2 %v8010_v10  ;;  %5390 = vmatmul.bf16.vlgmr.msrb.gmra.mxu3 %v8014_v39 }
 0x576   : > { %5419 = vmatmul.bf16.vlgmr.msrb.gmra.mxu0 %v8010_v10  ;;  %5448 = vmatmul.bf16.vlgmr.msra.gmra.mxu1 %v8014_v39  ;;  %v8193_v10 = vld [vmem:[#allocation20 + $0x230] sm:$0xf]  ;;  %v8915_v39 = vld [vmem:[#allocation20 + $0x234] sm:$0xf0] }
 0x577   : > { %v8194_v13 = vor.u32 %v8915_v39, %v8193_v10  ;;  %v8033_v10 = vld [vmem:[#allocation6 + $0x30] sm:$0xf]  ;;  %v8836_v39 = vld [vmem:[#allocation6 + $0x34] sm:$0xf] }
 0x578   : > { %v8034_v4 = vor.u32 %v8837_v43, %v8033_v10 }
 0x579   : > { %5698 = vmatpush.bf16.msra.mxu2 %v8194_v13  ;;  %v8038_v13 = vor.u32 %v8836_v39, %v8035_v25 }
 0x57d   : > { %5699 = vmatpush.bf16.msra.mxu2 %v8186_v49 }
 0x581   : > { %5700 = vmatpush.bf16.msra.mxu2 %v8178_v1 }
 0x585   : > { %5366 = vmatmul.bf16.gmra.mxu2 %v8018_v56  ;;  %5395 = vmatmul.bf16.gmra.mxu3 %v8022_v54 }
 0x586   : > { %5424 = vmatmul.bf16.gmra.mxu0 %v8018_v56  ;;  %5453 = vmatmul.bf16.gmra.mxu1 %v8022_v54  ;;  %v8174_v56 = vor.u32 %v8908_v23, %v8171_v6  ;;  %v8924_v54 = vld [vmem:[#allocation20 + $0x284] sm:$0xf] }
 0x587   : > { %5701 = vmatpush.bf16.msra.mxu2 %v8170_v46  ;;  %v8238_v55 = vor.u32 %v8924_v54, %v8235_v28 }
 0x588   : > { %5759 = vmatpush.bf16.msra.mxu0 %v8174_v56 }
 0x589   : > { %5788 = vmatpush.bf16.msrb.mxu1 %v8238_v55 }
 0x595   : > { %5371 = vmatmul.bf16.gmra.mxu2 %v8026_v8  ;;  %5400 = vmatmul.bf16.gmra.mxu3 %v8030_v44 }
 0x596   : > { %5429 = vmatmul.bf16.gmra.mxu0 %v8026_v8  ;;  %5458 = vmatmul.bf16.gmra.mxu1 %v8030_v44 }
 0x5a5   : > { %5376 = vmatmul.bf16.gmra.mxu2 %v8034_v4  ;;  %5405 = vmatmul.bf16.gmra.mxu3 %v8038_v13 }
 0x5a6   : > { %5434 = vmatmul.bf16.gmra.mxu0 %v8034_v4  ;;  %5463 = vmatmul.bf16.gmra.mxu1 %v8038_v13 }
 0x5b3   : > { %v5104_v61 = vpop.f32.mrf.mxu0  ;;  %v5133_v27 = vpop.f32.mrf.mxu1 }
 0x5b4   : > { %v5134_v51 = vadd.f32 %v5133_v27, %v5104_v61 }
 0x5b5   : > { %5702 = vmatmul.bf16.vlgmr.msra.gmra.mxu2 %v10616_v20  ;;  %5731 = vmatmul.bf16.vlgmr.msra.gmra.mxu3 %v10621_v50 }
 0x5b6   : > { %5760 = vmatmul.bf16.vlgmr.msra.gmra.mxu0 %v10616_v20  ;;  %5789 = vmatmul.bf16.vlgmr.msrb.gmra.mxu1 %v10621_v50 }
 0x5b8   : > { %v5046_v34 = vpop.f32.mrf.mxu2  ;;  %v5075_v40 = vpop.f32.mrf.mxu3 }
 0x5b9   : > { %v5076_v29 = vadd.f32 %v5075_v40, %v5046_v34 }
 0x5bb   : > { %v10711_v14 = vpop.f32.mrf.mxu0  ;;  %v10713_v32 = vpop.f32.mrf.mxu1 }
 0x5c0   : > { %v10715_v60 = vpop.f32.mrf.mxu2  ;;  %v10717_v48 = vpop.f32.mrf.mxu3 }
 0x5c3   : > { %v5109_v33 = vpop.f32.mrf.mxu0  ;;  %v5138_v9 = vpop.f32.mrf.mxu1 }
 0x5c4   : > { %v5139_v31 = vadd.f32 %v5138_v9, %v5109_v33 }
 0x5c5   : > { %5707 = vmatmul.bf16.gmra.mxu2 %v10659_v62  ;;  %5736 = vmatmul.bf16.gmra.mxu3 %v10671_v24 }
 0x5c6   : > { %5765 = vmatmul.bf16.gmra.mxu0 %v10659_v62  ;;  %5794 = vmatmul.bf16.gmra.mxu1 %v10671_v24 }
 0x5c8   : > { %v5051_v20 = vpop.f32.mrf.mxu2  ;;  %v5080_v50 = vpop.f32.mrf.mxu3 }
 0x5c9   : > { %v5081_v18 = vadd.f32 %v5080_v50, %v5051_v20 }
 0x5cb   : > { %v5111_v3 = vpop.f32.mrf.mxu0  ;;  %v5140_v49 = vpop.f32.mrf.mxu1 }
 0x5cc   : > { %v5141_v37 = vadd.f32 %v5140_v49, %v5111_v3 }
 0x5d0   : > { %v10723_v53 = vpop.f32.mrf.mxu2  ;;  %v10725_v12 = vpop.f32.mrf.mxu3 }
 0x5d3   : > { %v5114_v41 = vpop.f32.mrf.mxu0  ;;  %v5143_v58 = vpop.f32.mrf.mxu1 }
 0x5d4   : > { %v5144_v35 = vadd.f32 %v5143_v58, %v5114_v41 }
 0x5d5   : > { %5712 = vmatmul.bf16.gmra.mxu2 %v10690_v36  ;;  %5741 = vmatmul.bf16.gmra.mxu3 %v10695_v15 }
 0x5d6   : > { %5770 = vmatmul.bf16.gmra.mxu0 %v10690_v36  ;;  %5799 = vmatmul.bf16.gmra.mxu1 %v10695_v15 }
 0x5d8   : > { %v5056_v62 = vpop.f32.mrf.mxu2  ;;  %v5085_v24 = vpop.f32.mrf.mxu3 }
 0x5d9   : > { %v5086_v57 = vadd.f32 %v5085_v24, %v5056_v62 }
 0x5db   : > { %v5116_v45 = vpop.f32.mrf.mxu0  ;;  %v5145_v17 = vpop.f32.mrf.mxu1 }
 0x5dc   : > { %v5146_v19 = vadd.f32 %v5145_v17, %v5116_v45 }
 0x5e0   : > { %v10731_v47 = vpop.f32.mrf.mxu2  ;;  %v10733_v7 = vpop.f32.mrf.mxu3 }
 0x5e3   : > { %v5119_v1 = vpop.f32.mrf.mxu0  ;;  %v5148_v22 = vpop.f32.mrf.mxu1 }
 0x5e4   : > { %v5149_v59 = vadd.f32 %v5148_v22, %v5119_v1 }
 0x5e5   : > { %5717 = vmatmul.bf16.gmra.mxu2 %v10698_v30  ;;  %5746 = vmatmul.bf16.gmra.mxu3 %v10701_v52 }
 0x5e6   : > { %5775 = vmatmul.bf16.gmra.mxu0 %v10698_v30  ;;  %5804 = vmatmul.bf16.gmra.mxu1 %v10701_v52 }
 0x5e8   : > { %v5061_v36 = vpop.f32.mrf.mxu2  ;;  %v5090_v15 = vpop.f32.mrf.mxu3 }
 0x5e9   : > { %v5091_v2 = vadd.f32 %v5090_v15, %v5061_v36 }
 0x5eb   : > { %v5121_v21 = vpop.f32.mrf.mxu0  ;;  %v5150_v11 = vpop.f32.mrf.mxu1 }
 0x5ec   : > { %v5151_v26 = vadd.f32 %v5150_v11, %v5121_v21 }
 0x5f0   : > { %v5063_v0 = vpop.f32.mrf.mxu2  ;;  %v5092_v8 = vpop.f32.mrf.mxu3 }
 0x5f1   : > { %v5093_v44 = vadd.f32 %v5092_v8, %v5063_v0 }
 0x5f3   : > { %v5420_v5 = vpop.f32.mrf.mxu0  ;;  %v5449_v42 = vpop.f32.mrf.mxu1 }
 0x5f4   : > { %v5421_v63 = vadd.f32 %v5420_v5, %v5134_v51 }
 0x5f6   : > { %v5450_v46 = vadd.f32 %v5449_v42, %v5421_v63 }
 0x5f8   : > { %v5362_v16 = vpop.f32.mrf.mxu2  ;;  %v5391_v23 = vpop.f32.mrf.mxu3 }
 0x5f9   : > { %v5363_v6 = vadd.f32 %v5362_v16, %v5076_v29 }
 0x5fb   : > { %v10739_v38 = vadd.f32 %v5391_v23, %v5363_v6  ;;  %v5422_v30 = vpop.f32.mrf.mxu0  ;;  %v10741_v52 = vpop.f32.mrf.mxu1 }
 0x600   : > { %v10743_v56 = vpop.f32.mrf.mxu2  ;;  %v10745_v54 = vpop.f32.mrf.mxu3 }
 0x603   : > { %v5425_v28 = vpop.f32.mrf.mxu0  ;;  %v5454_v55 = vpop.f32.mrf.mxu1 }
 0x604   : > { %v5426_v43 = vadd.f32 %v5425_v28, %v5139_v31  ;;  %v5826_v28 = vld [vmem:[#allocation22] sm:$0x3] }
 0x606   : > { %v10747_v25 = vadd.f32 %v5454_v55, %v5426_v43  ;;  %v5136_v55 = vadd.f32 %v10713_v32, %v10711_v14  ;;  %v10777_v43 = vperm.slane %v5826_v28, 1 }
 0x608   : > { %v5367_v10 = vpop.f32.mrf.mxu2  ;;  %v5396_v39 = vpop.f32.mrf.mxu3 }
 0x609   : > { %v5368_v4 = vadd.f32 %v5367_v10, %v5081_v18 }
 0x60b   : > { %v10749_v13 = vadd.f32 %v5396_v39, %v5368_v4  ;;  %v5427_v61 = vpop.f32.mrf.mxu0  ;;  %v5456_v27 = vpop.f32.mrf.mxu1 }
 0x60c   : > { %v5428_v51 = vadd.f32 %v5427_v61, %v5141_v37  ;;  %v10779_v61 = vperm.slane %v5826_v28, 0 }
 0x60e   : > { %v10751_v34 = vadd.f32 %v5456_v27, %v5428_v51 }
 0x610   : > { %v10753_v40 = vpop.f32.mrf.mxu2  ;;  %v10755_v29 = vpop.f32.mrf.mxu3 }
 0x613   : > { %v5430_v33 = vpop.f32.mrf.mxu0  ;;  %v5459_v9 = vpop.f32.mrf.mxu1 }
 0x614   : > { %v5431_v20 = vadd.f32 %v5430_v33, %v5144_v35 }
 0x616   : > { %v10757_v31 = vadd.f32 %v5459_v9, %v5431_v20 }
 0x618   : > { %v5372_v50 = vpop.f32.mrf.mxu2  ;;  %v5401_v3 = vpop.f32.mrf.mxu3 }
 0x619   : > { %v5373_v49 = vadd.f32 %v5372_v50, %v5086_v57 }
 0x61b   : > { %v10759_v18 = vadd.f32 %v5401_v3, %v5373_v49  ;;  %v5432_v41 = vpop.f32.mrf.mxu0  ;;  %v5461_v58 = vpop.f32.mrf.mxu1 }
 0x61c   : > { %v5433_v62 = vadd.f32 %v5432_v41, %v5146_v19 }
 0x61e   : > { %v10761_v37 = vadd.f32 %v5461_v58, %v5433_v62 }
 0x620   : > { %v10763_v24 = vpop.f32.mrf.mxu2  ;;  %v10765_v45 = vpop.f32.mrf.mxu3 }
 0x623   : > { %v5435_v17 = vpop.f32.mrf.mxu0  ;;  %v5464_v1 = vpop.f32.mrf.mxu1 }
 0x624   : > { %v5436_v22 = vadd.f32 %v5435_v17, %v5149_v59 }
 0x626   : > { %v10767_v35 = vadd.f32 %v5464_v1, %v5436_v22 }
 0x628   : > { %v5377_v36 = vpop.f32.mrf.mxu2  ;;  %v5406_v15 = vpop.f32.mrf.mxu3 }
 0x629   : > { %v5378_v21 = vadd.f32 %v5377_v36, %v5091_v2 }
 0x62b   : > { %v10769_v57 = vadd.f32 %v5406_v15, %v5378_v21  ;;  %v5437_v11 = vpop.f32.mrf.mxu0  ;;  %v5466_v0 = vpop.f32.mrf.mxu1 }
 0x62c   : > { %v5438_v8 = vadd.f32 %v5437_v11, %v5151_v26  ;;  %v5423_v26 = vadd.f32 %v5422_v30, %v5136_v55 }
 0x62e   : > { %v10771_v19 = vadd.f32 %v5466_v0, %v5438_v8  ;;  %v5452_v14 = vadd.f32 %v10741_v52, %v5423_v26 }
 0x630   : > { %v5379_v5 = vpop.f32.mrf.mxu2  ;;  %v5408_v42 = vpop.f32.mrf.mxu3 }
 0x631   : > { %v5380_v63 = vadd.f32 %v5379_v5, %v5093_v44  ;;  %v5078_v44 = vadd.f32 %v10717_v48, %v10715_v60 }
 0x633   : > { %v10773_v16 = vadd.f32 %v5408_v42, %v5380_v63  ;;  %v5761_v23 = vpop.f32.mrf.mxu0  ;;  %v5790_v6 = vpop.f32.mrf.mxu1  ;;  %v5365_v32 = vadd.f32 %v10743_v56, %v5078_v44 }
 0x634   : > { %v5791_v59 = vadd.f32 %v5790_v6, %v5761_v23 }
 0x635   : > { %v5394_v60 = vadd.f32 %v10745_v54, %v5365_v32  ;;  %v5083_v54 = vadd.f32 %v10725_v12, %v10723_v53 }
 0x636   : > { %v5811_v2 = vadd.f32 %v5791_v59, %v5450_v46 }
 0x637   : > { %v5370_v59 = vadd.f32 %v10753_v40, %v5083_v54 }
 0x638   : > { %v5703_v10 = vpop.f32.mrf.mxu2  ;;  %v5732_v39 = vpop.f32.mrf.mxu3  ;;  %v5833_v27 = vadd.f32 %v10777_v43, %v5811_v2 }
 0x639   : > { %v5733_v4 = vadd.f32 %v5732_v39, %v5703_v10  ;;  %v5399_v53 = vadd.f32 %v10755_v29, %v5370_v59  ;;  %v5088_v29 = vadd.f32 %v10733_v7, %v10731_v47 }
 0x63a   : > { %v5849_v30 = vmax.f32 %v5833_v27, 0.0 }
 0x63b   : > { %v5810_v51 = vadd.f32 %v5733_v4, %v10739_v38  ;;  %v5763_v33 = vpop.f32.mrf.mxu0  ;;  %v5792_v9 = vpop.f32.mrf.mxu1 }
 0x63c   : > { %v5793_v20 = vadd.f32 %v5792_v9, %v5763_v33 }
 0x63d   : > { %v5832_v46 = vadd.f32 %v10779_v61, %v5810_v51 }
 0x63e   : > { %v5813_v3 = vadd.f32 %v5793_v20, %v5452_v14 }
 0x63f   : > { %v5848_v50 = vmax.f32 %v5832_v46, 0.0 }
 0x640   : > { %v5705_v49 = vpop.f32.mrf.mxu2  ;;  %v5734_v41 = vpop.f32.mrf.mxu3  ;;  %v5835_v38 = vadd.f32 %v10777_v43, %v5813_v3 }
 0x641   : > { %v5864_v48 = vpack.c.bf16 %v5849_v30, %v5848_v50  ;;  %v5735_v58 = vadd.f32 %v5734_v41, %v5705_v49 }
 0x642   : > { %v5851_v22 = vmax.f32 %v5835_v38, 0.0 }
 0x643   : > { %5872 = vst [vmem:[#allocation7] sm:$0xff] %v5864_v48  ;;  %v5812_v62 = vadd.f32 %v5735_v58, %v5394_v60  ;;  %v5766_v17 = vpop.f32.mrf.mxu0  ;;  %v5795_v1 = vpop.f32.mrf.mxu1  ;;  %v5375_v60 = vadd.f32 %v10763_v24, %v5088_v29  ;;  %v8437_v29 = vld [vmem:[#allocation23 + $0xd8] sm:$0xf0] }
 0x644   : > { %v5796_v52 = vadd.f32 %v5795_v1, %v5766_v17 }
 0x645   : > { %v5834_v56 = vadd.f32 %v10779_v61, %v5812_v62  ;;  %v5404_v47 = vadd.f32 %v10765_v45, %v5375_v60 }
 0x646   : > { %v5815_v15 = vadd.f32 %v5796_v52, %v10747_v25 }
 0x647   : > { %v5850_v36 = vmax.f32 %v5834_v56, 0.0 }
 0x648   : > { %v5708_v21 = vpop.f32.mrf.mxu2  ;;  %v5737_v11 = vpop.f32.mrf.mxu3  ;;  %v5837_v5 = vadd.f32 %v10777_v43, %v5815_v15 }
 0x649   : > { %v5865_v0 = vpack.c.bf16 %v5851_v22, %v5850_v36  ;;  %v5738_v8 = vadd.f32 %v5737_v11, %v5708_v21 }
 0x64a   : > { %v5853_v25 = vmax.f32 %v5837_v5, 0.0 }
 0x64b   : > { %5873 = vst [vmem:[#allocation7 + $0x8] sm:$0xff] %v5865_v0  ;;  %v5814_v42 = vadd.f32 %v5738_v8, %v10749_v13  ;;  %v5768_v63 = vpop.f32.mrf.mxu0  ;;  %v5797_v23 = vpop.f32.mrf.mxu1 }
 0x64c   : > { %v5798_v6 = vadd.f32 %v5797_v23, %v5768_v63 }
 0x64d   : > { %v5836_v28 = vadd.f32 %v10779_v61, %v5814_v42 }
 0x64e   : > { %v5817_v2 = vadd.f32 %v5798_v6, %v10751_v34 }
 0x64f   : > { %v5852_v55 = vmax.f32 %v5836_v28, 0.0 }
 0x650   : > { %v5710_v10 = vpop.f32.mrf.mxu2  ;;  %v5739_v39 = vpop.f32.mrf.mxu3  ;;  %v5839_v13 = vadd.f32 %v10777_v43, %v5817_v2 }
 0x651   : > { %v5866_v12 = vpack.c.bf16 %v5853_v25, %v5852_v55  ;;  %v5740_v26 = vadd.f32 %v5739_v39, %v5710_v10 }
 0x652   : > { %v5855_v33 = vmax.f32 %v5839_v13, 0.0 }
 0x653   : > { %5874 = vst [vmem:[#allocation7 + $0x10] sm:$0xff] %v5866_v12  ;;  %v5816_v4 = vadd.f32 %v5740_v26, %v5399_v53  ;;  %v5771_v44 = vpop.f32.mrf.mxu0  ;;  %v5800_v27 = vpop.f32.mrf.mxu1  ;;  %v8962_v12 = vld [vmem:[#allocation23 + $0x74] sm:$0xf] }
 0x654   : > { %v5801_v51 = vadd.f32 %v5800_v27, %v5771_v44  ;;  %v8978_v26 = vld [vmem:[#allocation23 + $0xf4] sm:$0xf]  ;;  %v8453_v44 = vld [vmem:[#allocation23 + $0xf8] sm:$0xf0]  ;;  %v8960_v27 = vld [vmem:[#allocation23 + $0x64] sm:$0xf] }
 0x655   : > { %v5838_v40 = vadd.f32 %v10779_v61, %v5816_v4 }
 0x656   : > { %v5819_v20 = vadd.f32 %v5801_v51, %v10757_v31  ;;  %v8381_v51 = vld [vmem:[#allocation23 + $0x68] sm:$0xf0] }
 0x657   : > { %v5854_v9 = vmax.f32 %v5838_v40, 0.0  ;;  %v8456_v40 = vor.u32 %v8978_v26, %v8453_v44  ;;  %v8299_v26 = vld [vmem:[#allocation7 + $0x8] sm:$0xf0] }
 0x658   : > { %v5713_v34 = vpop.f32.mrf.mxu2  ;;  %v5742_v14 = vpop.f32.mrf.mxu3  ;;  %v5841_v30 = vadd.f32 %v10777_v43, %v5819_v20 }
 0x659   : > { %v5867_v32 = vpack.c.bf16 %v5855_v33, %v5854_v9  ;;  %v5743_v46 = vadd.f32 %v5742_v14, %v5713_v34  ;;  %v8445_v33 = vld [vmem:[#allocation23 + $0xe8] sm:$0xf0]  ;;  %v8384_v34 = vor.u32 %v8960_v27, %v8381_v51  ;;  %6199 = vmatpush.bf16.msra.mxu1 %v8456_v40  ;;  %v8958_v14 = vld [vmem:[#allocation23 + $0x54] sm:$0xf]  ;;  %v8379_v51 = vld [vmem:[#allocation23 + $0x60] sm:$0xf] }
 0x65a   : > { %v5857_v31 = vmax.f32 %v5841_v30, 0.0 }
 0x65b   : > { %5875 = vst [vmem:[#allocation7 + $0x18] sm:$0xff] %v5867_v32  ;;  %v5818_v50 = vadd.f32 %v5743_v46, %v10759_v18  ;;  %v5773_v3 = vpop.f32.mrf.mxu0  ;;  %v5802_v49 = vpop.f32.mrf.mxu1  ;;  %v8974_v46 = vld [vmem:[#allocation23 + $0xd4] sm:$0xf] }
 0x65c   : > { %v5803_v41 = vadd.f32 %v5802_v49, %v5773_v3  ;;  %v8440_v30 = vor.u32 %v8974_v46, %v8437_v29  ;;  %v8365_v3 = vld [vmem:[#allocation23 + $0x48] sm:$0xf0]  ;;  %v8972_v49 = vld [vmem:[#allocation23 + $0xc4] sm:$0xf]  ;;  %v8435_v46 = vld [vmem:[#allocation23 + $0xd0] sm:$0xf] }
 0x65d   : > { %v5840_v48 = vadd.f32 %v10779_v61, %v5818_v50  ;;  %v8956_v50 = vld [vmem:[#allocation23 + $0x44] sm:$0xf]  ;;  %v8975_v29 = vld [vmem:[#allocation23 + $0xd4] sm:$0xf0] }
 0x65e   : > { %v5821_v38 = vadd.f32 %v5803_v41, %v10761_v37  ;;  %v8429_v41 = vld [vmem:[#allocation23 + $0xc8] sm:$0xf0]  ;;  %v8368_v60 = vor.u32 %v8956_v50, %v8365_v3  ;;  %v8363_v50 = vld [vmem:[#allocation23 + $0x40] sm:$0xf]  ;;  %v8957_v3 = vld [vmem:[#allocation23 + $0x44] sm:$0xf0] }
 0x65f   : > { %v5856_v58 = vmax.f32 %v5840_v48, 0.0  ;;  %v8432_v48 = vor.u32 %v8972_v49, %v8429_v41  ;;  %v8427_v49 = vld [vmem:[#allocation23 + $0xc0] sm:$0xf]  ;;  %v8973_v41 = vld [vmem:[#allocation23 + $0xc4] sm:$0xf0] }
 0x660   : > { %v5715_v62 = vpop.f32.mrf.mxu2  ;;  %v5744_v17 = vpop.f32.mrf.mxu3  ;;  %v5843_v18 = vadd.f32 %v10777_v43, %v5821_v38 }
 0x661   : > { %v5868_v7 = vpack.c.bf16 %v5857_v31, %v5856_v58  ;;  %v5745_v1 = vadd.f32 %v5744_v17, %v5715_v62  ;;  %v8954_v31 = vld [vmem:[#allocation23 + $0x34] sm:$0xf]  ;;  %v8357_v58 = vld [vmem:[#allocation23 + $0x38] sm:$0xf0] }
 0x662   : > { %v5859_v15 = vmax.f32 %v5843_v18, 0.0  ;;  %v8970_v62 = vld [vmem:[#allocation23 + $0xb4] sm:$0xf]  ;;  %v8421_v17 = vld [vmem:[#allocation23 + $0xb8] sm:$0xf0] }
 0x663   : > { %5876 = vst [vmem:[#allocation7 + $0x20] sm:$0xff] %v5868_v7  ;;  %v5820_v52 = vadd.f32 %v5745_v1, %v5404_v47  ;;  %v5776_v56 = vpop.f32.mrf.mxu0  ;;  %v5805_v22 = vpop.f32.mrf.mxu1 }
 0x664   : > { %v5806_v36 = vadd.f32 %v5805_v22, %v5776_v56  ;;  %v8360_v56 = vor.u32 %v8954_v31, %v8357_v58  ;;  %v8355_v31 = vld [vmem:[#allocation23 + $0x30] sm:$0xf]  ;;  %v8955_v58 = vld [vmem:[#allocation23 + $0x34] sm:$0xf0] }
 0x665   : > { %v5842_v24 = vadd.f32 %v10779_v61, %v5820_v52 }
 0x666   : > { %v5823_v11 = vadd.f32 %v5806_v36, %v10767_v35 }
 0x667   : > { %v5858_v21 = vmax.f32 %v5842_v24, 0.0  ;;  %v8424_v24 = vor.u32 %v8970_v62, %v8421_v17  ;;  %v8971_v62 = vld [vmem:[#allocation23 + $0xb4] sm:$0xf0]  ;;  %v8356_v17 = vor.u32 %v8955_v58, %v8355_v31 }
 0x668   : > { %v5718_v37 = vpop.f32.mrf.mxu2  ;;  %v5747_v0 = vpop.f32.mrf.mxu3  ;;  %v5845_v45 = vadd.f32 %v10777_v43, %v5823_v11  ;;  %v8952_v11 = vld [vmem:[#allocation23 + $0x24] sm:$0xf] }
 0x669   : > { %v5869_v8 = vpack.c.bf16 %v5859_v15, %v5858_v21  ;;  %v5748_v54 = vadd.f32 %v5747_v0, %v5718_v37  ;;  %v8349_v37 = vld [vmem:[#allocation23 + $0x28] sm:$0xf0] }
 0x66a   : > { %v5861_v59 = vmax.f32 %v5845_v45, 0.0  ;;  %v8313_v15 = vld [vmem:[#allocation7 + $0x20] sm:$0xf]  ;;  %v8944_v21 = vld [vmem:[#allocation7 + $0x24] sm:$0xf] }
 0x66b   : > { %5877 = vst [vmem:[#allocation7 + $0x28] sm:$0xff] %v5869_v8  ;;  %v5822_v5 = vadd.f32 %v5748_v54, %v10769_v57  ;;  %v5778_v42 = vpop.f32.mrf.mxu0  ;;  %v5807_v63 = vpop.f32.mrf.mxu1  ;;  %v8389_v57 = vld [vmem:[#allocation23 + $0x78] sm:$0xf0]  ;;  %v8352_v54 = vor.u32 %v8952_v11, %v8349_v37  ;;  %v8968_v45 = vld [vmem:[#allocation23 + $0xa4] sm:$0xf] }
 0x66c   : > { %v5808_v23 = vadd.f32 %v5807_v63, %v5778_v42  ;;  %v8392_v4 = vor.u32 %v8962_v12, %v8389_v57  ;;  %v8943_v42 = vld [vmem:[#allocation7 + $0x14] sm:$0xf0]  ;;  %v8307_v63 = vld [vmem:[#allocation7 + $0x18] sm:$0xf0]  ;;  %v8941_v57 = vld [vmem:[#allocation7 + $0x4] sm:$0xf0] }
 0x66d   : > { %v5844_v6 = vadd.f32 %v10779_v61, %v5822_v5  ;;  %v8413_v5 = vld [vmem:[#allocation23 + $0xa8] sm:$0xf0]  ;;  %v8967_v11 = vld [vmem:[#allocation23 + $0x94] sm:$0xf0]  ;;  %v8966_v37 = vld [vmem:[#allocation23 + $0x94] sm:$0xf] }
 0x66e   : > { %v5825_v25 = vadd.f32 %v5808_v23, %v10771_v19  ;;  %v8976_v19 = vld [vmem:[#allocation23 + $0xe4] sm:$0xf]  ;;  %6186 = vmatpush.bf16.msrb.mxu0 %v8392_v4  ;;  %v8416_v23 = vor.u32 %v8968_v45, %v8413_v5  ;;  %v8940_v4 = vld [vmem:[#allocation7 + $0x4] sm:$0xf]  ;;  %v8949_v45 = vld [vmem:[#allocation23 + $0x4] sm:$0xf0] }
 0x66f   : > { %v5860_v28 = vmax.f32 %v5844_v6, 0.0  ;;  %v8305_v6 = vld [vmem:[#allocation7 + $0x10] sm:$0xf] }
 0x670   : > { %v5720_v55 = vpop.f32.mrf.mxu2  ;;  %v5749_v35 = vpop.f32.mrf.mxu3  ;;  %v5847_v39 = vadd.f32 %v10777_v43, %v5825_v25  ;;  %v8448_v43 = vor.u32 %v8976_v19, %v8445_v33  ;;  %v8950_v25 = vld [vmem:[#allocation23 + $0x14] sm:$0xf]  ;;  %v8302_v19 = vor.u32 %v8940_v4, %v8299_v26  ;;  %v8961_v33 = vld [vmem:[#allocation23 + $0x64] sm:$0xf0]  ;;  %v8993_v26 = vld [vmem:[%s10900_s15 + $0x68] sm:$0xff] }
 0x671   : > { %v5870_v2 = vpack.c.bf16 %v5861_v59, %v5860_v28  ;;  %v5750_v10 = vadd.f32 %v5749_v35, %v5720_v55  ;;  %v8942_v59 = vld [vmem:[#allocation7 + $0x14] sm:$0xf]  ;;  %v8387_v28 = vld [vmem:[#allocation23 + $0x70] sm:$0xf]  ;;  %v8306_v35 = vor.u32 %v8943_v42, %v8305_v6  ;;  %v8992_v4 = vld [vmem:[%s10900_s15 + $0x60] sm:$0xff] }
 0x672   : > { %v5863_v9 = vmax.f32 %v5847_v39, 0.0  ;;  %6187 = vmatpush.bf16.msrb.mxu0 %v8384_v34  ;;  %6200 = vmatpush.bf16.msra.mxu1 %v8448_v43  ;;  %v8945_v22 = vld [vmem:[#allocation7 + $0x24] sm:$0xf0]  ;;  %v8315_v36 = vld [vmem:[#allocation7 + $0x28] sm:$0xf0]  ;;  %v8380_v43 = vor.u32 %v8961_v33, %v8379_v51 }
 0x673   : > { %5878 = vst [vmem:[#allocation7 + $0x30] sm:$0xff] %v5870_v2  ;;  %v5824_v53 = vadd.f32 %v5750_v10, %v10773_v16  ;;  %v8373_v16 = vld [vmem:[#allocation23 + $0x58] sm:$0xf0]  ;;  %v8314_v0 = vor.u32 %v8945_v22, %v8313_v15  ;;  %v8318_v8 = vor.u32 %v8944_v21, %v8315_v36  ;;  %v8310_v2 = vor.u32 %v8942_v59, %v8307_v63  ;;  %v8963_v10 = vld [vmem:[#allocation23 + $0x74] sm:$0xf0] }
 0x674   : > { %v8341_v55 = vld [vmem:[#allocation23 + $0x18] sm:$0xf0]  ;;  %v8451_v39 = vld [vmem:[#allocation23 + $0xf0] sm:$0xf]  ;;  %v8388_v44 = vor.u32 %v8963_v10, %v8387_v28  ;;  %v5880_v34 = vld [vmem:[%s10902_s17] sm:$0xf] }
 0x675   : > { %v5846_v13 = vadd.f32 %v10779_v61, %v5824_v53  ;;  %v8376_v61 = vor.u32 %v8958_v14, %v8373_v16  ;;  %v8979_v53 = vld [vmem:[#allocation23 + $0xf4] sm:$0xf0]  ;;  %v8344_v12 = vor.u32 %v8950_v25, %v8341_v55  ;;  %v8371_v16 = vld [vmem:[#allocation23 + $0x50] sm:$0xf]  ;;  %v8948_v63 = vld [vmem:[#allocation23 + $0x4] sm:$0xf] }
 0x676   : > { %6201 = vmatpush.bf16.msra.mxu1 %v8440_v30  ;;  %v8452_v27 = vor.u32 %v8979_v53, %v8451_v39  ;;  %v8436_v30 = vor.u32 %v8975_v29, %v8435_v46  ;;  %v8339_v36 = vld [vmem:[#allocation23 + $0x10] sm:$0xf]  ;;  %v8395_v6 = vld [vmem:[#allocation23 + $0x80] sm:$0xf]  ;;  %v8965_v28 = vld [vmem:[#allocation23 + $0x84] sm:$0xf0] }
 0x677   : > { %v5862_v20 = vmax.f32 %v5846_v13, 0.0  ;;  %6188 = vmatpush.bf16.msrb.mxu0 %v8376_v61  ;;  %v8297_v13 = vld [vmem:[#allocation7] sm:$0xf]  ;;  %v8403_v21 = vld [vmem:[#allocation23 + $0x90] sm:$0xf]  ;;  %v8988_v46 = vld [vmem:[%s10900_s15 + $0x40] sm:$0xff] }
 0x678   : > { %v8298_v40 = vor.u32 %v8941_v57, %v8297_v13  ;;  %v8964_v25 = vld [vmem:[#allocation23 + $0x84] sm:$0xf]  ;;  %v8397_v55 = vld [vmem:[#allocation23 + $0x88] sm:$0xf0]  ;;  %v8984_v13 = vld [vmem:[%s10900_s15 + $0x20] sm:$0xff] }
 0x679   : > { %v5871_v32 = vpack.c.bf16 %v5863_v9, %v5862_v20  ;;  %v8443_v9 = vld [vmem:[#allocation23 + $0xe0] sm:$0xf]  ;;  %v8977_v20 = vld [vmem:[#allocation23 + $0xe4] sm:$0xf0]  ;;  %v8995_v10 = vld [vmem:[%s10900_s15 + $0x78] sm:$0xff] }
 0x67a   : > { %v8321_v38 = vld [vmem:[#allocation7 + $0x30] sm:$0xf]  ;;  %v8946_v7 = vld [vmem:[#allocation7 + $0x34] sm:$0xf]  ;;  %6202 = vmatpush.bf16.msra.mxu1 %v8432_v48  ;;  %v8444_v14 = vor.u32 %v8977_v20, %v8443_v9  ;;  %v8428_v48 = vor.u32 %v8973_v41, %v8427_v49  ;;  %v8987_v39 = vld [vmem:[%s10900_s15 + $0x38] sm:$0xff] }
 0x67b   : > { %5879 = vst [vmem:[#allocation7 + $0x38] sm:$0xff] %v5871_v32  ;;  %6189 = vmatpush.bf16.msrb.mxu0 %v8368_v60  ;;  %v8959_v32 = vld [vmem:[#allocation23 + $0x54] sm:$0xf0]  ;;  %v8364_v60 = vor.u32 %v8957_v3, %v8363_v50  ;;  %v8986_v53 = vld [vmem:[%s10900_s15 + $0x30] sm:$0xff]  ;;  %v8985_v57 = vld [vmem:[%s10900_s15 + $0x28] sm:$0xff] }
 0x67c   : > { %v8372_v61 = vor.u32 %v8959_v32, %v8371_v16  ;;  %v8989_v16 = vld [vmem:[%s10900_s15 + $0x48] sm:$0xff]  ;;  %v8982_v32 = vld [vmem:[%s10900_s15 + $0x10] sm:$0xff] }
 0x67d   : > { %v8981_v29 = vld [vmem:[%s10900_s15 + $0x8] sm:$0xff] }
 0x67e   : > { %6203 = vmatpush.bf16.msra.mxu1 %v8424_v24  ;;  %v8951_v24 = vld [vmem:[#allocation23 + $0x14] sm:$0xf0] }
 0x67f   : > { %6190 = vmatpush.bf16.msrb.mxu0 %v8360_v56  ;;  %v8340_v15 = vor.u32 %v8951_v24, %v8339_v36  ;;  %v9209_v24 = vld [vmem:[#allocation8] ss:$0 sm:$0xff] }
 0x682   : > { %v8947_v47 = vld [vmem:[#allocation7 + $0x34] sm:$0xf0]  ;;  %v8323_v1 = vld [vmem:[#allocation7 + $0x38] sm:$0xf0]  ;;  %6204 = vmatpush.bf16.msra.mxu1 %v8416_v23  ;;  %v8333_v23 = vld [vmem:[#allocation23 + $0x8] sm:$0xf0] }
 0x683   : > { %v8322_v18 = vor.u32 %v8947_v47, %v8321_v38  ;;  %v8326_v52 = vor.u32 %v8946_v7, %v8323_v1  ;;  %6191 = vmatpush.bf16.msrb.mxu0 %v8352_v54  ;;  %v8419_v38 = vld [vmem:[#allocation23 + $0xb0] sm:$0xf]  ;;  %v8347_v7 = vld [vmem:[#allocation23 + $0x20] sm:$0xf]  ;;  %v8953_v1 = vld [vmem:[#allocation23 + $0x24] sm:$0xf0]  ;;  %v8336_v59 = vor.u32 %v8948_v63, %v8333_v23 }
 0x684   : > { %v8420_v47 = vor.u32 %v8971_v62, %v8419_v38  ;;  %v8348_v56 = vor.u32 %v8953_v1, %v8347_v7  ;;  %v8331_v54 = vld [vmem:[#allocation23] sm:$0xf] }
 0x685   : > { %5936 = vmatpush.bf16.msrb.mxu2 %v8322_v18  ;;  %5949 = vmatpush.bf16.msrb.mxu3 %v8326_v52  ;;  %v8411_v18 = vld [vmem:[#allocation23 + $0xa0] sm:$0xf]  ;;  %v8969_v52 = vld [vmem:[#allocation23 + $0xa4] sm:$0xf0]  ;;  %v8332_v42 = vor.u32 %v8949_v45, %v8331_v54 }
 0x686   : > { %v8412_v22 = vor.u32 %v8969_v52, %v8411_v18 }
 0x687   : > { %6192 = vmatpush.bf16.msrb.mxu0 %v8344_v12  ;;  %v8994_v12 = vld [vmem:[%s10900_s15 + $0x70] sm:$0xff] }
 0x689   : > { %5937 = vmatpush.bf16.msrb.mxu2 %v8314_v0  ;;  %5950 = vmatpush.bf16.msrb.mxu3 %v8318_v8  ;;  %v8404_v0 = vor.u32 %v8967_v11, %v8403_v21  ;;  %v8405_v8 = vld [vmem:[#allocation23 + $0x98] sm:$0xf0] }
 0x68a   : > { %v8408_v5 = vor.u32 %v8966_v37, %v8405_v8 }
 0x68b   : > { %6193 = vmatpush.bf16.msrb.mxu0 %v8336_v59 }
 0x68c   : > { %6205 = vmatpush.bf16.msra.mxu1 %v8408_v5 }
 0x68d   : > { %5938 = vmatpush.bf16.msrb.mxu2 %v8306_v35  ;;  %5951 = vmatpush.bf16.msrb.mxu3 %v8310_v2  ;;  %v8396_v35 = vor.u32 %v8965_v28, %v8395_v6  ;;  %v8400_v2 = vor.u32 %v8964_v25, %v8397_v55 }
 0x690   : > { %6206 = vmatpush.bf16.msra.mxu1 %v8400_v2 }
 0x691   : > { %5939 = vmatpush.bf16.msrb.mxu2 %v8298_v40  ;;  %5952 = vmatpush.bf16.msrb.mxu3 %v8302_v19 }
 0x694   : > { %8327 = vmatmul.msk.bf16.vlgmr.msrb.gmra.mxu2 %vm1184_vm3, %v5880_v34  ;;  %8328 = vmatmul.msk.bf16.vlgmr.msrb.gmra.mxu3 %vm1184_vm3, %v5880_v34 }
 0x695   : > { %6160 = vmatpush.bf16.msra.mxu2 %v8388_v44  ;;  %6173 = vmatpush.bf16.msra.mxu3 %v8452_v27  ;;  %v8991_v44 = vld [vmem:[%s10900_s15 + $0x58] sm:$0xff]  ;;  %v8990_v27 = vld [vmem:[%s10900_s15 + $0x50] sm:$0xff] }
 0x699   : > { %6161 = vmatpush.bf16.msra.mxu2 %v8380_v43  ;;  %6174 = vmatpush.bf16.msra.mxu3 %v8444_v14  ;;  %v8983_v14 = vld [vmem:[%s10900_s15 + $0x18] sm:$0xff] }
 0x69d   : > { %6162 = vmatpush.bf16.msra.mxu2 %v8372_v61  ;;  %6175 = vmatpush.bf16.msra.mxu3 %v8436_v30  ;;  %v8980_v61 = vld [vmem:[%s10900_s15] sm:$0xff] }
 0x69e   : > { %v5994_v30 = vld [vmem:[%s10899_s14] sm:$0x3] }
 0x69f   : > { %v5997_v50 = vperm.slane %v5994_v30, 1 }
 0x6a1   : > { %6163 = vmatpush.bf16.msra.mxu2 %v8364_v60  ;;  %6176 = vmatpush.bf16.msra.mxu3 %v8428_v48  ;;  %v5996_v48 = vperm.slane %v5994_v30, 0 }
 0x6a5   : > { %6164 = vmatpush.bf16.msra.mxu2 %v8356_v17  ;;  %6177 = vmatpush.bf16.msra.mxu3 %v8420_v47 }
 0x6a9   : > { %6165 = vmatpush.bf16.msra.mxu2 %v8348_v56  ;;  %6178 = vmatpush.bf16.msra.mxu3 %v8412_v22 }
 0x6ad   : > { %6166 = vmatpush.bf16.msra.mxu2 %v8340_v15  ;;  %6179 = vmatpush.bf16.msra.mxu3 %v8404_v0 }
 0x6b1   : > { %6167 = vmatpush.bf16.msra.mxu2 %v8332_v42  ;;  %6180 = vmatpush.bf16.msra.mxu3 %v8396_v35 }
 0x6b5   : > { %6348 = vmatpush.bf16.msrb.mxu2 %v8987_v39  ;;  %6361 = vmatpush.bf16.msrb.mxu3 %v8995_v10 }
 0x6b9   : > { %6349 = vmatpush.bf16.msrb.mxu2 %v8986_v53  ;;  %6362 = vmatpush.bf16.msrb.mxu3 %v8994_v12 }
 0x6bd   : > { %6350 = vmatpush.bf16.msrb.mxu2 %v8985_v57  ;;  %6363 = vmatpush.bf16.msrb.mxu3 %v8993_v26 }
 0x6c1   : > { %6351 = vmatpush.bf16.msrb.mxu2 %v8984_v13  ;;  %6364 = vmatpush.bf16.msrb.mxu3 %v8992_v4 }
 0x6c5   : > { %6365 = vmatpush.bf16.msrb.mxu3 %v8991_v44  ;;  %6352 = vmatpush.bf16.msrb.mxu2 %v8983_v14 }
 0x6c9   : > { %6366 = vmatpush.bf16.msrb.mxu3 %v8990_v27  ;;  %6353 = vmatpush.bf16.msrb.mxu2 %v8982_v32 }
 0x6cd   : > { %6367 = vmatpush.bf16.msrb.mxu3 %v8989_v16  ;;  %6354 = vmatpush.bf16.msrb.mxu2 %v8981_v29 }
 0x6d1   : > { %6368 = vmatpush.bf16.msrb.mxu3 %v8988_v46  ;;  %6355 = vmatpush.bf16.msrb.mxu2 %v8980_v61 }
 0x717   : > { %v5941_v51 = vpop.f32.mrf.mxu2  ;;  %v5954_v40 = vpop.f32.mrf.mxu3 }
 0x718   : > { %v5958_v19 = vmul.f32 0.5, %v5941_v51  ;;  %v5959_v33 = vmul.f32 0.5, %v5954_v40 }
 0x71a   : > { %v5960_v9 = vpack.c.bf16 %v5958_v19, %v5958_v19  ;;  %v5961_v20 = vpack.c.bf16 %v5959_v33, %v5959_v33 }
 0x71c   : > { %6168 = vmatmul.bf16.vlgmr.msra.gmra.mxu2 %v5960_v9  ;;  %6194 = vmatmul.bf16.vlgmr.msrb.gmra.mxu0 %v5960_v9 }
 0x71d   : > { %6181 = vmatmul.bf16.vlgmr.msra.gmra.mxu3 %v5961_v20  ;;  %6207 = vmatmul.bf16.vlgmr.msra.gmra.mxu1 %v5961_v20 }
 0x71f   : > { %v5943_v34 = vpop.f32.mrf.mxu2  ;;  %v5956_v43 = vpop.f32.mrf.mxu3 }
 0x799   : > { %v6195_v3 = vpop.f32.mrf.mxu0 }
 0x79a   : > { %v6196_v49 = vadd.f32 %v6195_v3, %v5997_v50  ;;  %v6208_v41 = vpop.f32.mrf.mxu1 }
 0x79c   : > { %v6209_v60 = vadd.f32 %v6208_v41, %v6196_v49 }
 0x79e   : > { %v6213_v31 = vmax.f32 %v6209_v60, 0.0 }
 0x79f   : > { %v6169_v58 = vpop.f32.mrf.mxu2 }
 0x7a0   : > { %v6215_v38 = vpack.c.bf16 %v6213_v31, %v6213_v31  ;;  %v6170_v62 = vadd.f32 %v6169_v58, %v5996_v48  ;;  %v6182_v17 = vpop.f32.mrf.mxu3 }
 0x7a1   : > { %v6197_v47 = vpop.f32.mrf.mxu0 }
 0x7a2   : > { %v6183_v7 = vadd.f32 %v6182_v17, %v6170_v62  ;;  %6369 = vmatmul.bf16.vlgmr.msrb.gmra.mxu3 %v6215_v38  ;;  %v6210_v1 = vpop.f32.mrf.mxu1 }
 0x7a4   : > { %v6212_v18 = vmax.f32 %v6183_v7, 0.0 }
 0x7a6   : > { %v6214_v52 = vpack.c.bf16 %v6212_v18, %v6212_v18 }
 0x7a7   : > { %v6171_v56 = vpop.f32.mrf.mxu2 }
 0x7a8   : > { %6356 = vmatmul.bf16.vlgmr.msrb.gmra.mxu2 %v6214_v52  ;;  %v6184_v22 = vpop.f32.mrf.mxu3 }
 0x825   : > { %v6370_v36 = vpop.f32.mrf.mxu3 }
 0x82b   : > { %v6357_v15 = vpop.f32.mrf.mxu2 }
 0x82c   : > { %v6358_v21 = vadd.f32 %v9209_v24, %v6357_v15 }
 0x82d   : > { %v6372_v11 = vpop.f32.mrf.mxu3 }
 0x82e   : > { %v6371_v37 = vadd.f32 %v6370_v36, %v6358_v21 }
 0x830   : > { %6375 = vst.msk [vmem:[%s735_s29] sm:$0xff] %vm6374_vm6, %v6371_v37 }
 0x833   : > { %v6359_v0 = vpop.f32.mrf.mxu2 }
 0x834 PF: > { %s10926_s26 = sld [smem:[#allocation31_spill]] }
 0x83a   : > { %s36_s29 = sadd.s32 1, %s10926_s26  }
 0x83b   : > { %p33_p8 = scmp.ge.s32.totalorder %s36_s29, 4  }
 0x83d   :  { %35 = sbr.rel (!%p33_p8) target bundleno = 13 (0xd), region = 173 }
 0x842   :  { %6395 = vsyncpa [#allocation10], 1 }
 0x843   :  { %6397 = vsyncpa [#allocation10 + $0x1], 1 }
 0x844   :  { %6398 = vsyncpa [#allocation12], 1 }
 0x845   :  { %6399 = vsyncpa [#allocation15], 1 }
 0x846   :  { %6400 = vsyncpa [#allocation18], 1 }
 0x847   :  { %6401 = vsyncpa [#allocation21], 1 }
 0x848   :  { %6402 = vsyncpa [#allocation24], 1 }

</bundles_post_ra>
